<compile_context>
chip_gen: v7x
topology: tpu7x:2x2x1
jax: 0.10.0
libtpu: 0.0.40
codegen_flags: <defaults>
</compile_context>

<pallas_src>
import jax
import jax.numpy as jnp
from jax.experimental import pallas as pl
from jax.experimental.pallas import tpu as pltpu

# Layer sizes of the MLP: 768 -> 1024 -> 128 -> 64 -> 16 -> 1
DIMS = (768, 1024, 128, 64, 16, 1)


def mlp_kernel(x_ref, w1_ref, b1_ref, wt_ref, bt_ref, o_ref):
    # Wide 768 -> 1024 layer on the MXU, f32 accumulation.  x is cast to the
    # weight dtype in-kernel (no separate host-side astype pass over HBM).
    x = x_ref[...].astype(w1_ref.dtype)
    h1 = jnp.dot(x, w1_ref[...], preferred_element_type=jnp.float32) + b1_ref[...]
    # Folded affine tail (1024 -> 128 -> 64 -> 16 -> 1) == a (1024,) matvec.
    # Done as a VPU multiply + lane reduction in f32 so the N=1 pass does not
    # consume MXU streaming time (the MXU is this kernel's bottleneck).
    y = jnp.sum(h1 * wt_ref[...], axis=-1, keepdims=True) + bt_ref[...]
    o_ref[...] = y.astype(o_ref.dtype)


def init_params(key, dtype=jnp.float32):
    """Deterministic PyTorch-style init: U(-1/sqrt(fan_in), 1/sqrt(fan_in))."""
    params = []
    for idx in range(len(DIMS) - 1):
        fan_in, fan_out = DIMS[idx], DIMS[idx + 1]
        key, kw, kb = jax.random.split(key, 3)
        bound = 1.0 / (fan_in ** 0.5)
        w = jax.random.uniform(kw, (fan_in, fan_out), dtype, -bound, bound)
        b = jax.random.uniform(kb, (1, fan_out), dtype, -bound, bound)
        params.extend([w, b])
    return params


def fold_params(params, compute_dtype=None):
    """Once-per-parameter-set host preprocessing (hoisted off the call path).

    Dropout is identity in eval and there is no nonlinearity, so layers
    2..5 (1024->128->64->16->1) fold exactly into one (1, 1024) weight row
    `wt` and a (1, 1) bias `bt`.  Only the wide 768->1024 layer stays a real
    matmul in the kernel.

    compute_dtype=jnp.bfloat16 is recommended on v5e, v6e and v7x alike:
    the MXU takes bf16 natively, accumulation stays f32 in the kernel, and
    operand DMA bytes halve.  Tail weight + biases always stay f32.
    """
    w1, b1, w2, b2, w3, b3, w4, b4, w5, b5 = [p.astype(jnp.float32) for p in params]
    wt = w2 @ w3 @ w4 @ w5                               # (1024, 1)
    bt = ((b2 @ w3 + b3) @ w4 + b4) @ w5 + b5            # (1, 1)
    if compute_dtype is not None:
        # TODO(synk): on v7x an fp8 cast of w1/x for the wide matmul is
        # possible (f32 accumulation) but needs accuracy validation; gated off.
        w1 = w1.astype(compute_dtype)
    return (w1, b1, wt.reshape(1, DIMS[1]), bt)


def _round_up(v, m):
    return ((v + m - 1) // m) * m


def _pick_tile_b(batch, tile_b, w1_dtype):
    # Sublane / MXU-M friendly alignment (16 covers bf16 row packing).
    align = 16 if w1_dtype == jnp.bfloat16 else 8
    # v7x has 2 TensorCores; the "parallel" grid axis is what shards across
    # them, so keep >= 2 grid steps once the batch is big enough to split.
    if batch >= 512:
        tile_b = min(tile_b, _round_up(pl.cdiv(batch, 2), 256))
    # Never tile past the (rounded-up) batch.
    tile_b = min(tile_b, _round_up(batch, align))
    return max(align, _round_up(tile_b, align))


def mlp_forward(x, folded_params, *, tile_b=512):
    """Single-Pallas-kernel forward of the MLP head.

    x: (B, 768), kept in its HBM dtype; cast to the compute dtype in-kernel.
    folded_params: output of fold_params().
    tile_b: batch rows per grid step (default 512; 1024-2048 also fit the
        48 MiB scoped-VMEM budget and amortize step overhead further).
    """
    w1, b1, wt, bt = folded_params
    B, d_in = x.shape
    assert d_in == DIMS[0], f"expected input dim {DIMS[0]}, got {d_in}"

    tile_b = _pick_tile_b(B, tile_b, w1.dtype)
    # Last block may be partial: Pallas masks the partial output store and
    # every output row depends only on its own input row, so no host-side
    # jnp.pad (and its extra HBM pass over x) is needed.
    num_tiles = pl.cdiv(B, tile_b)

    def const_spec(arr):
        # Whole (small) parameter array; constant index_map -> DMA'd once and
        # resident across all grid steps.
        return pl.BlockSpec(arr.shape, lambda i: (0, 0))

    nbytes = lambda a: a.size * a.dtype.itemsize
    cost = pl.CostEstimate(
        flops=2 * B * (DIMS[0] * DIMS[1] + DIMS[1]),
        transcendentals=0,
        bytes_accessed=(nbytes(x) + nbytes(w1) + nbytes(b1)
                        + nbytes(wt) + nbytes(bt) + B * x.dtype.itemsize),
    )

    return pl.pallas_call(
        mlp_kernel,
        out_shape=jax.ShapeDtypeStruct((B, 1), x.dtype),
        grid_spec=pltpu.PrefetchScalarGridSpec(
            num_scalar_prefetch=0,
            grid=(num_tiles,),
            in_specs=[pl.BlockSpec((tile_b, DIMS[0]), lambda i: (i, 0)),
                      const_spec(w1), const_spec(b1),
                      const_spec(wt), const_spec(bt)],
            out_specs=pl.BlockSpec((tile_b, 1), lambda i: (i, 0)),
        ),
        compiler_params=pltpu.CompilerParams(
            dimension_semantics=("parallel",),
            vmem_limit_bytes=48 * 1024 * 1024,
        ),
        cost_estimate=cost,
    )(x, w1, b1, wt, bt)


def mlp_reference(x, params):
    h = x
    for i in range(0, len(params), 2):
        w, b = params[i], params[i + 1]
        h = h @ w + b
    return h


if __name__ == "__main__":
    key = jax.random.PRNGKey(0)
    key, kx1, kx2 = jax.random.split(key, 3)
    params = init_params(key)

    # Case 1: f32 path, small tile -> 2-step grid with a partial last block
    # (exercises the no-pad / masked-store path).
    B1 = 200
    x1 = jax.random.normal(kx1, (B1, DIMS[0]), jnp.float32)
    ref1 = mlp_reference(x1, params)
    folded_f32 = fold_params(params)                       # hoisted: once per params
    out1 = jax.block_until_ready(mlp_forward(x1, folded_f32, tile_b=128))
    assert out1.shape == (B1, 1), out1.shape
    assert jnp.allclose(out1, ref1, atol=1e-4, rtol=1e-4), "f32 mismatch vs reference"

    # Case 2: bf16 operands (recommended on v5e/v6e/v7x), batch large enough
    # for a 2-step "parallel" grid (both v7x TensorCores) + a partial block.
    B2 = 600
    x2 = jax.random.normal(kx2, (B2, DIMS[0]), jnp.float32)
    ref2 = mlp_reference(x2, params)
    folded_bf16 = fold_params(params, compute_dtype=jnp.bfloat16)
    out2 = jax.block_until_ready(mlp_forward(x2, folded_bf16))
    assert out2.shape == (B2, 1), out2.shape
    assert jnp.allclose(out2, ref2, atol=5e-2, rtol=5e-2), "bf16 mismatch vs reference"

    # TODO(synk): Dropout is identity here (inference only); a training-mode
    # kernel would need pltpu.prng_seed / prng_random_bits masks per layer.
    print("KERNEL_OK")
</pallas_src>

<mosaic_0001>
module attributes {stable_mosaic.version = 11 : i64} {
  func.func @mlp_kernel(%arg0: i32, %arg1: memref<128x768xf32, #tpu.memory_space<vmem>>, %arg2: memref<768x1024xf32, #tpu.memory_space<vmem>>, %arg3: memref<1x1024xf32, #tpu.memory_space<vmem>>, %arg4: memref<1x1024xf32, #tpu.memory_space<vmem>>, %arg5: memref<1x1xf32, #tpu.memory_space<vmem>>, %arg6: memref<128x1xf32, #tpu.memory_space<vmem>>) attributes {dimension_semantics = [#tpu.dimension_semantics<parallel>], iteration_bounds = array<i64: 2>, scalar_prefetch = 0 : i64, scratch_operands = 0 : i64, tpu.core_type = #tpu.core_type<tc>, window_params = [{transform_indices = @transform_0, window_bounds = array<i64: 128, 768>}, {pipeline_mode = #tpu.pipeline_mode<synchronous>, transform_indices = @transform_1, window_bounds = array<i64: 768, 1024>}, {pipeline_mode = #tpu.pipeline_mode<synchronous>, transform_indices = @transform_2, window_bounds = array<i64: 1, 1024>}, {pipeline_mode = #tpu.pipeline_mode<synchronous>, transform_indices = @transform_3, window_bounds = array<i64: 1, 1024>}, {pipeline_mode = #tpu.pipeline_mode<synchronous>, transform_indices = @transform_4, window_bounds = array<i64: 1, 1>}, {transform_indices = @transform_5, window_bounds = array<i64: 128, 1>}]} {
    %c0 = arith.constant 0 : index
    %c0_0 = arith.constant 0 : index
    %0 = vector.load %arg1[%c0, %c0_0] : memref<128x768xf32, #tpu.memory_space<vmem>>, vector<128x768xf32>
    %c0_1 = arith.constant 0 : index
    %c0_2 = arith.constant 0 : index
    %1 = vector.load %arg2[%c0_1, %c0_2] : memref<768x1024xf32, #tpu.memory_space<vmem>>, vector<768x1024xf32>
    %cst = arith.constant dense<0.000000e+00> : vector<128x1024xf32>
    %2 = tpu.matmul %0, %1, %cst {dimension_numbers = #tpu.dot_dimension_numbers<[1], [0], [0], [1], [0, 0, 1, 1], [], []>} : vector<128x768xf32>, vector<768x1024xf32>, vector<128x1024xf32> -> vector<128x1024xf32>
    %c0_3 = arith.constant 0 : index
    %c0_4 = arith.constant 0 : index
    %3 = vector.load %arg3[%c0_3, %c0_4] : memref<1x1024xf32, #tpu.memory_space<vmem>>, vector<1x1024xf32>
    %4 = vector.broadcast %3 : vector<1x1024xf32> to vector<128x1024xf32>
    %5 = arith.addf %2, %4 : vector<128x1024xf32>
    %c0_5 = arith.constant 0 : index
    %c0_6 = arith.constant 0 : index
    %6 = vector.load %arg4[%c0_5, %c0_6] : memref<1x1024xf32, #tpu.memory_space<vmem>>, vector<1x1024xf32>
    %7 = vector.broadcast %6 : vector<1x1024xf32> to vector<128x1024xf32>
    %8 = arith.mulf %5, %7 : vector<128x1024xf32>
    %cst_7 = arith.constant dense<0.000000e+00> : vector<128xf32>
    %9 = vector.multi_reduction <add>, %8, %cst_7 [1] : vector<128x1024xf32> to vector<128xf32>
    %10 = vector.shape_cast %9 : vector<128xf32> to vector<128x1xf32>
    %c0_8 = arith.constant 0 : index
    %c0_9 = arith.constant 0 : index
    %11 = vector.load %arg5[%c0_8, %c0_9] : memref<1x1xf32, #tpu.memory_space<vmem>>, vector<1x1xf32>
    %12 = vector.broadcast %11 : vector<1x1xf32> to vector<128x1xf32>
    %13 = arith.addf %10, %12 : vector<128x1xf32>
    %c0_10 = arith.constant 0 : index
    %c0_11 = arith.constant 0 : index
    %14 = vector.load %arg6[%c0_10, %c0_11] : memref<128x1xf32, #tpu.memory_space<vmem>>, vector<128x1xf32>
    tpu.vector_store %arg6[%c0_10, %c0_11], %13 {strides = array<i32>} : memref<128x1xf32, #tpu.memory_space<vmem>>, vector<128x1xf32>,
    return
  }
  func.func @transform_0(%arg0: i32) -> (i32, i32) {
    %c0_i32 = arith.constant 0 : i32
    %c0_i32_0 = arith.constant 0 : i32
    return %arg0, %c0_i32 : i32, i32
  }
  func.func @transform_1(%arg0: i32) -> (i32, i32) {
    %c0_i32 = arith.constant 0 : i32
    %c0_i32_0 = arith.constant 0 : i32
    %c0_i32_1 = arith.constant 0 : i32
    return %c0_i32, %c0_i32_0 : i32, i32
  }
  func.func @transform_2(%arg0: i32) -> (i32, i32) {
    %c0_i32 = arith.constant 0 : i32
    %c0_i32_0 = arith.constant 0 : i32
    %c0_i32_1 = arith.constant 0 : i32
    return %c0_i32, %c0_i32_0 : i32, i32
  }
  func.func @transform_3(%arg0: i32) -> (i32, i32) {
    %c0_i32 = arith.constant 0 : i32
    %c0_i32_0 = arith.constant 0 : i32
    %c0_i32_1 = arith.constant 0 : i32
    return %c0_i32, %c0_i32_0 : i32, i32
  }
  func.func @transform_4(%arg0: i32) -> (i32, i32) {
    %c0_i32 = arith.constant 0 : i32
    %c0_i32_0 = arith.constant 0 : i32
    %c0_i32_1 = arith.constant 0 : i32
    return %c0_i32, %c0_i32_0 : i32, i32
  }
  func.func @transform_5(%arg0: i32) -> (i32, i32) {
    %c0_i32 = arith.constant 0 : i32
    %c0_i32_0 = arith.constant 0 : i32
    return %arg0, %c0_i32 : i32, i32
  }
}

</mosaic_0001>

<bundles_post_ra>
// kernel: tpu_custom_call.1
= control target key start
LH: loop header
LB: loop body
LE: loop exit
PB: predicated region body
PF: predicated region fallthrough
CT: control target
= control target key end

     0   :  { %s6393_s0 = inlined_call_operand.hbm [shape: f32[200,768], index: 0, kind: input, shape index: {}]   ;;  %s6394_s1 = inlined_call_operand.hbm [shape: f32[768,1024], index: 1, kind: input, shape index: {}]   ;;  %s6395_s2 = inlined_call_operand.hbm [shape: f32[1,1024], index: 2, kind: input, shape index: {}]   ;;  %s6396_s3 = inlined_call_operand.hbm [shape: f32[1,1024], index: 3, kind: input, shape index: {}]   ;;  %s6397_s4 = inlined_call_operand.<no memory space> [shape: f32[1,1], index: 4, kind: input, shape index: {}]   ;;  %s6398_s5 = inlined_call_operand.vmem [shape: f32[200,1], index: 5, kind: output, shape index: {}]  }
   0x1   :  { %v10_v0 = vstv %s6397_s4 }
   0x2   :  { %11 = vst [vmem:[#allocation2] sm:$0x1] %v10_v0 }
   0x3   :  { %12 = vsyncpa [#allocation4], 0 }
   0x4   :  { %14 = vsyncpa [#allocation4 + $0x1], 0 }
   0x5   :  { %15 = vsyncpa [#allocation6], 0 }
   0x6   :  { %16 = vsyncpa [#allocation9], 0  ;;  %s5490_s20 = smov 0   ;;  %s5492_s21 = smov 0  }
   0x7   :  { %s5494_s22 = smov 0   ;;  %s5496_s23 = smov 0  }
   0x8 LB: > { %s5509_s4 = sadd.s32 4294967295, %s5415_s23   ;;  %s5512_s24 = sadd.s32 1, %s5415_s23   ;;  %s5415_s23 = sphi %s5496_s23, %s6422_s23   ;;  %s5411_s22 = sphi %s5494_s22, %s6421_s22   ;;  %s5407_s21 = sphi %s5492_s21, %s6420_s21   ;;  %s5403_s20 = sphi %s5490_s20, %s6419_s20  }
   0x9   : > { %s26_s25 = ssub.s32 %s5415_s23, %s5512_s24  ;;  %s29_s26 = sadd.s32 1, %s5411_s22 }
   0xa   : > { %p27_p0 = scmp.eq.s32.totalorder %s26_s25, 0  ;;  %p36_p1 = scmp.ne.s32.totalorder %s5411_s22, %s5407_s21 }
   0xb   : > { %p37_p2 = scmp.eq.s32.totalorder %s5415_s23, 0  ;;  %p42_p3 = scmp.ne.s32.totalorder %s5407_s21, %s5403_s20 }
   0xc   : > { %s5522_s27 = scalar_select %p27_p0, %s5411_s22, %s29_s26  }
   0xd   : > { %p5524_p4 = por %p37_p2, %p36_p1  ;;  %p6399_p5 = scmp.eq.s32.totalorder %s5509_s4, 0 }
   0xe   : > { %p150_p6 = scmp.eq.s32.totalorder %s5509_s4, 1  ;;  %p3808_p7 = scmp.ge.s32.totalorder %s5415_s23, 1 }
   0xf   : > { %s6402_s28 = scalar_select %p5524_p4, 1, 0 }
  0x10   : > { %p5533_p8 = por %p6399_p5, %p42_p3  ;;  %p163_p9 = scmp.lt.s32.totalorder %s5415_s23, 3 }
  0x11   : > { %p5538_p10 = por %p150_p6, %p36_p1  ;;  %s5449_s7 = smov [#allocation5]  }
  0x12   : > { %s6403_s29 = scalar_select %p5533_p8, 1, 0 }
  0x13   : > { %s6404_s30 = scalar_select %p5538_p10, 1, 0 }
  0x14   : > { %p5542_p11 = pnand %p3808_p7, %p163_p9  ;;  %s175_s8 = sshll.u32 %s5449_s7, 4  ;;  %s5548_s8 = int_to_ptr.vmem [resolvable:$true] %s175_s8 }
  0x15   : > { %s5450_s10 = smov [#allocation7]   ;;  %s5451_s12 = smov [#allocation8]  }
  0x16   : > { %s6405_s6 = scalar_select %p5542_p11, 1, 0 }
  0x17   : > { %p5014_p12 = pneg %p5542_p11  ;;  %s189_s11 = sshll.u32 %s5450_s10, 4  ;;  %s5556_s11 = int_to_ptr.vmem [resolvable:$true] %s189_s11 }
  0x18   : > { %s5558_s13 = sshll.u32 %s5451_s12, 4  ;;  %s5229_s16 = scalar_lea.hbm %s6394_s1, 98304  ;;  %s201_s13 = int_to_ptr.vmem [resolvable:$true] %s5558_s13 }
  0x19   : > { %p5552_p13 = pnand %p5014_p12, %p6399_p5  ;;  %p5230_p0 = scmp.ne.s32.totalorder %s6394_s1, %s5229_s16 }
  0x1a   : > { %p5236_p6 = scmp.lt.u32.totalorder %s5229_s16, %s6394_s1 }
  0x1b   : > { %p5568_p1 = pneg %p5552_p13 }
  0x1d   : > { %p5232_p2 = pnand %p5568_p1, %p5230_p0 }
  0x1f   : > { %p5233_p3 = pneg %p5232_p2 }
  0x21   : > { %p5238_p7 = pnand %p5236_p6, %p5233_p3 }
  0x23   : > { %5241 = shalt.err (!%p5238_p7)
}
  0x24   : > { %s5242_s26 = scalar_lea.vmem %s5548_s8, 98304  ;;  %p5250_p10 = scmp.lt.s32.totalorder %s5548_s8, %s5548_s8 }
  0x25   : > { %p5243_p9 = scmp.ne.s32.totalorder %s5548_s8, %s5242_s26  ;;  %p5251_p8 = scmp.lt.s32.totalorder %s5242_s26, %s5242_s26 }
  0x27   : > { %p5245_p12 = pnand %p5243_p9, %p5568_p1  ;;  %p5252_p0 = por %p5251_p8, %p5250_p10 }
  0x29   : > { %p5246_p5 = pneg %p5245_p12 }
  0x2b   : > { %p5253_p2 = pnand %p5252_p0, %p5246_p5 }
  0x2d   : > { %5256 = shalt.err (!%p5253_p2)
}
  0x2e   : > { %s5452_s7 = smov 1024   ;;  %s5453_s10 = smov 64  }
  0x2f   : > { %5017 = dma.hbm_to_vmem [thread:$0]  (!%p5552_p13), %s6394_s1, 98304, %s5548_s8, [#allocation6], %s5452_s7, %s5452_s7, %s5453_s10  }
  0x30   : > { %s5257_s17 = scalar_lea.hbm %s6395_s2, 128 }
  0x31   : > { %p5258_p8 = scmp.ne.s32.totalorder %s6395_s2, %s5257_s17  ;;  %p5264_p3 = scmp.lt.u32.totalorder %s5257_s17, %s6395_s2 }
  0x33   : > { %p5260_p5 = pnand %p5258_p8, %p5568_p1 }
  0x35   : > { %p5261_p10 = pneg %p5260_p5 }
  0x37   : > { %p5266_p6 = pnand %p5264_p3, %p5261_p10 }
  0x39   : > { %5269 = shalt.err (!%p5266_p6)
}
  0x3a   : > { %s5270_s8 = scalar_lea.vmem %s5556_s11, 128  ;;  %p5278_p0 = scmp.lt.s32.totalorder %s5556_s11, %s5556_s11 }
  0x3b   : > { %p5271_p7 = scmp.ne.s32.totalorder %s5556_s11, %s5270_s8  ;;  %p5279_p2 = scmp.lt.s32.totalorder %s5270_s8, %s5270_s8 }
  0x3d   : > { %p5273_p9 = pnand %p5271_p7, %p5568_p1  ;;  %p5280_p8 = por %p5279_p2, %p5278_p0 }
  0x3f   : > { %p5274_p12 = pneg %p5273_p9 }
  0x41   : > { %p5281_p5 = pnand %p5280_p8, %p5274_p12 }
  0x43   : > { %5284 = shalt.err (!%p5281_p5)
}
  0x44   : > { %5020 = dma.hbm_to_vmem [thread:$0]  (!%p5552_p13), %s6395_s2, 128, %s5556_s11, [#allocation6]  }
  0x45   : > { %s5285_s15 = scalar_lea.hbm %s6396_s3, 128 }
  0x46   : > { %p5286_p10 = scmp.ne.s32.totalorder %s6396_s3, %s5285_s15  ;;  %p5292_p7 = scmp.lt.u32.totalorder %s5285_s15, %s6396_s3 }
  0x48   : > { %p5288_p3 = pnand %p5286_p10, %p5568_p1 }
  0x4a   : > { %p5289_p6 = pneg %p5288_p3 }
  0x4c   : > { %p5294_p9 = pnand %p5292_p7, %p5289_p6 }
  0x4e   : > { %5297 = shalt.err (!%p5294_p9)
}
  0x4f   : > { %s5298_s25 = scalar_lea.vmem %s201_s13, 128  ;;  %p5306_p8 = scmp.lt.s32.totalorder %s201_s13, %s201_s13 }
  0x50   : > { %p5299_p12 = scmp.ne.s32.totalorder %s201_s13, %s5298_s25  ;;  %p5307_p5 = scmp.lt.s32.totalorder %s5298_s25, %s5298_s25 }
  0x52   : > { %p5301_p0 = pnand %p5299_p12, %p5568_p1  ;;  %p5308_p11 = por %p5307_p5, %p5306_p8 }
  0x54   : > { %p5302_p2 = pneg %p5301_p0 }
  0x56   : > { %p5309_p4 = pnand %p5308_p11, %p5302_p2 }
  0x58   : > { %5312 = shalt.err (!%p5309_p4)
}
  0x59   : > { %5023 = dma.hbm_to_vmem [thread:$0]  (!%p5552_p13), %s6396_s3, 128, %s201_s13, [#allocation9]  }
  0x5a   : > { %p3812_p10 = scmp.ge.s32.totalorder %s5415_s23, 2 }
  0x5b   : > { %p6408_p3 = scmp.ne.s32.totalorder (!%p3812_p10), %s6402_s28, 0 }
  0x5c   : > { %210 = sbr.rel (%p3812_p10) target bundleno = 135 (0x87), region = 32 }
  0x63   : > { %213 = sbr.rel (!%p6408_p3) target bundleno = 135 (0x87), region = 36  ;;  %s214_s19 = sand.u32 (%p6408_p3), 1, %s5411_s22  }
  0x64   : > { %s3813_s8 = sshll.u32 (%p6408_p3), %s5415_s23, 4  ;;  %s4998_s7 = smul.u32 (%p6408_p3), 768, %s214_s19 }
  0x65   : > { %s220_s10 = ssub.s32 (%p6408_p3), 25, %s3813_s8  ;;  %s5639_s14 = scalar_lea.sflag (%p6408_p3), [#allocation4], %s214_s19 }
  0x66   : > { %p221_p11 = scmp.lt.s32.totalorder (%p6408_p3), %s220_s10, 16  ;;  %s218_s13 = scalar_lea.vmem (%p6408_p3), [#allocation3], %s4998_s7 }
  0x6a   : > { %s6424_s10 = smov (!%p221_p11, %s220_s10), 16 }
  0x6b   : > { %s5636_s12 = smul.u32 768, %s6424_s10 }
  0x6d   : > { %s226_s9 = ssub.s32 12288, %s5636_s12 }
  0x6e   : > { %227 = vsyncadd %s5639_s14, %s226_s9  ;;  %p3816_p4 = scmp.ne.s32.totalorder %s5636_s12, 0  ;;  %s4999_s28 = smul.u32 12288, %s5415_s23 }
  0x6f   : > { %s233_s15 = sshll.u32 %s218_s13, 4  ;;  %s5317_s23 = scalar_lea.hbm %s6393_s0, 19200  ;;  %s5649_s15 = int_to_ptr.vmem [resolvable:$true] %s233_s15 }
  0x70   : > { %s5647_s18 = scalar_lea.hbm %s6393_s0, %s4999_s28 }
  0x71   : > { %s5313_s20 = scalar_lea.hbm %s5647_s18, %s5636_s12  ;;  %p5318_p7 = scmp.lt.u32.totalorder %s5647_s18, %s6393_s0 }
  0x72   : > { %p5314_p13 = scmp.ne.s32.totalorder %s5647_s18, %s5313_s20  ;;  %p5319_p9 = scmp.lt.u32.totalorder %s5317_s23, %s5313_s20 }
  0x73   : > { %p5321_p0 = scmp.lt.u32.totalorder %s5313_s20, %s5647_s18 }
  0x74   : > { %p5315_p1 = pnand %p5314_p13, %p3816_p4  ;;  %p5320_p12 = por %p5319_p9, %p5318_p7 }
  0x76   : > { %p5316_p6 = pneg %p5315_p1  ;;  %p5322_p2 = por %p5321_p0, %p5320_p12 }
  0x78   : > { %p5323_p8 = pnand %p5322_p2, %p5316_p6 }
  0x7a   : > { %5326 = shalt.err (!%p5323_p8)
}
  0x7b   : > { %s5327_s8 = scalar_lea.vmem %s5649_s15, %s5636_s12  ;;  %s5454_s7 = smov [#allocation3]  }
  0x7c   : > { %p5328_p5 = scmp.ne.s32.totalorder %s5649_s15, %s5327_s8  ;;  %s5331_s10 = sshll.u32 %s5454_s7, 4  ;;  %s5332_s10 = int_to_ptr.vmem [resolvable:$false] %s5331_s10 }
  0x7d   : > { %s5333_s9 = scalar_lea.vmem %s5332_s10, 24576  ;;  %p5334_p11 = scmp.lt.s32.totalorder %s5649_s15, %s5332_s10 }
  0x7e   : > { %p5329_p10 = pnand %p5328_p5, %p3816_p4  ;;  %p5335_p13 = scmp.lt.s32.totalorder %s5333_s9, %s5327_s8 }
  0x80   : > { %p5330_p3 = pneg %p5329_p10  ;;  %p5336_p1 = por %p5335_p13, %p5334_p11 }
  0x82   : > { %p5337_p7 = pnand %p5336_p1, %p5330_p3 }
  0x84   : > { %5340 = shalt.err (!%p5337_p7)
}
  0x85   : > { %s5455_s13 = smov 768   ;;  %s5456_s28 = smov 48  }
  0x86   : > { %239 = dma.hbm_to_vmem [thread:$0]  (%p3816_p4), %s5647_s18, %s5636_s12, %s5649_s15, %s5639_s14, %s5455_s13, %s5455_s13, %s5456_s28  }
  0x87 PF: > { %p6409_p6 = scmp.ne.s32.totalorder %s6405_s6, 0 }
  0x88   : > { %s5679_s16 = sand.u32 (!%p6409_p6), 1, %s5407_s21   ;;  %p6410_p9 = scmp.ne.s32.totalorder (!%p6409_p6), %s6403_s29, 0 }
  0x89   : > { %245 = sbr.rel (%p6409_p6) target bundleno = 1017 (0x3f9), region = 40  ;;  %s248_s20 = scalar_lea.sflag (!%p6409_p6), [#allocation4], %s5679_s16 }
  0x8a   : > { %s5000_s17 = smul.u32 (!%p6409_p6), 768, %s5679_s16 }
  0x8c   : > { %s5683_s25 = scalar_lea.vmem (!%p6409_p6), [#allocation3], %s5000_s17 }
  0x90   : > { %5390 = dma.done.wait (%p6410_p9), %s248_s20, 12288  }
  0x91   : > { %5392 = vsyncadd (%p6410_p9), %s248_s20, 4294955008  ;;  %p6411_p4 = scmp.eq.s32.totalorder %s5509_s4, 0 }
  0x93   : > { %5394 = dma.done.wait (%p6411_p4), [#allocation6], 98432   ;;  %p6412_p12 = pmov %p6411_p4 }
  0x94   : > { %p6413_p0 = pmov %p6411_p4 }
  0x95   : > { %5396 = vsyncadd (%p6412_p12), [#allocation6], 4294868864 }
  0x96   : > { %5398 = dma.done.wait (%p6413_p0), [#allocation9], 128   ;;  %p6414_p2 = pmov %p6413_p0 }
  0x97   : > { %v397_v1 = vld [vmem:[#allocation5 + $0x8] sm:$0xff]  ;;  %v399_v3 = vld [vmem:[#allocation5 + $0x18] sm:$0xff]  ;;  %v396_v6 = vld [vmem:[#allocation5] sm:$0xff]  ;;  %s3824_s29 = sshll.u32 %s5679_s16, 7  ;;  %vm3475_vm0 = vcmask 7168   ;;  %p6415_p8 = scmp.ne.s32.totalorder %s6404_s30, 0 }
  0x98   : > { %5400 = vsyncadd (%p6414_p2), [#allocation9], 4294967168  ;;  %v405_v2 = vld [vmem:[#allocation5 + $0x48] sm:$0xff]  ;;  %v407_v5 = vld [vmem:[#allocation5 + $0x58] sm:$0xff]  ;;  %s6256_s6 = scalar_lea.vmem [#allocation10], %s3824_s29   ;;  %s3827_s12 = sshll.u32 (%p6415_p8), %s5509_s4, 4 }
  0x99   : > { %v3846_v4 = vpack.c.bf16 %v405_v2, %v397_v1  ;;  %v404_v7 = vld [vmem:[#allocation5 + $0x40] sm:$0xff]  ;;  %v4038_v8 = vpack.c.bf16 %v407_v5, %v399_v3  ;;  %v398_v10 = vld [vmem:[#allocation5 + $0x10] sm:$0xff]  ;;  %v413_v12 = vld [vmem:[#allocation5 + $0x88] sm:$0xff]  ;;  %s3843_s14 = sshll.u32 (%p6415_p8), %s5509_s4, 7  ;;  %s3500_s15 = ssub.s32 (%p6415_p8), 25, %s3827_s12 }
  0x9a   : > { %v3848_v9 = vpack.c.bf16 %v404_v7, %v396_v6  ;;  %v406_v11 = vld [vmem:[#allocation5 + $0x50] sm:$0xff]  ;;  %v421_v14 = vld [vmem:[#allocation5 + $0xc8] sm:$0xff]  ;;  %v415_v15 = vld [vmem:[#allocation5 + $0x98] sm:$0xff]  ;;  %s6297_s23 = scalar_lea.vmem (%p6415_p8), %s6398_s5, %s3843_s14   ;;  %p3501_p5 = scmp.lt.s32.totalorder (%p6415_p8), %s3500_s15, 16 }
  0x9b   : > { %3847 = vmatprep.subr.bf16.mxu0 %v3846_v4  ;;  %v4040_v13 = vpack.c.bf16 %v406_v11, %v398_v10  ;;  %v423_v16 = vld [vmem:[#allocation5 + $0xd8] sm:$0xff]  ;;  %4039 = vmatprep.subr.bf16.mxu1 %v4038_v8  ;;  %v3850_v17 = vpack.c.bf16 %v421_v14, %v413_v12  ;;  %v412_v19 = vld [vmem:[#allocation5 + $0x80] sm:$0xff]  ;;  %v414_v21 = vld [vmem:[#allocation5 + $0x90] sm:$0xff] }
  0x9c   : > { %3849 = vmatpush1.bf16.msra.mxu0 %v3848_v9  ;;  %v4042_v18 = vpack.c.bf16 %v423_v16, %v415_v15  ;;  %v420_v20 = vld [vmem:[#allocation5 + $0xc0] sm:$0xff]  ;;  %v422_v23 = vld [vmem:[#allocation5 + $0xd0] sm:$0xff]  ;;  %v429_v24 = vld [vmem:[#allocation5 + $0x108] sm:$0xff] }
  0x9d   : > { %4041 = vmatpush1.bf16.msra.mxu1 %v4040_v13  ;;  %v3852_v22 = vpack.c.bf16 %v420_v20, %v412_v19  ;;  %v437_v25 = vld [vmem:[#allocation5 + $0x148] sm:$0xff]  ;;  %3851 = vmatprep.subr.bf16.mxu0 %v3850_v17  ;;  %v4044_v26 = vpack.c.bf16 %v422_v23, %v414_v21  ;;  %v431_v28 = vld [vmem:[#allocation5 + $0x118] sm:$0xff]  ;;  %v428_v30 = vld [vmem:[#allocation5 + $0x100] sm:$0xff] }
  0x9e   : > { %4043 = vmatprep.subr.bf16.mxu1 %v4042_v18  ;;  %v3854_v27 = vpack.c.bf16 %v437_v25, %v429_v24  ;;  %v439_v29 = vld [vmem:[#allocation5 + $0x158] sm:$0xff]  ;;  %v436_v32 = vld [vmem:[#allocation5 + $0x140] sm:$0xff]  ;;  %v430_v33 = vld [vmem:[#allocation5 + $0x110] sm:$0xff] }
  0x9f   : > { %v4046_v31 = vpack.c.bf16 %v439_v29, %v431_v28  ;;  %v438_v34 = vld [vmem:[#allocation5 + $0x150] sm:$0xff]  ;;  %v3856_v35 = vpack.c.bf16 %v436_v32, %v428_v30  ;;  %v445_v36 = vld [vmem:[#allocation5 + $0x188] sm:$0xff]  ;;  %v447_v38 = vld [vmem:[#allocation5 + $0x198] sm:$0xff] }
  0xa0   : > { %3853 = vmatpush1.bf16.msra.mxu0 %v3852_v22  ;;  %v453_v37 = vld [vmem:[#allocation5 + $0x1c8] sm:$0xff]  ;;  %v4048_v39 = vpack.c.bf16 %v438_v34, %v430_v33  ;;  %v455_v41 = vld [vmem:[#allocation5 + $0x1d8] sm:$0xff]  ;;  %v444_v42 = vld [vmem:[#allocation5 + $0x180] sm:$0xff] }
  0xa1   : > { %4045 = vmatpush1.bf16.msra.mxu1 %v4044_v26  ;;  %3855 = vmatprep.subr.bf16.mxu0 %v3854_v27  ;;  %v3858_v40 = vpack.c.bf16 %v453_v37, %v445_v36  ;;  %v452_v43 = vld [vmem:[#allocation5 + $0x1c0] sm:$0xff]  ;;  %v4050_v44 = vpack.c.bf16 %v455_v41, %v447_v38  ;;  %v446_v45 = vld [vmem:[#allocation5 + $0x190] sm:$0xff]  ;;  %v461_v47 = vld [vmem:[#allocation5 + $0x208] sm:$0xff] }
  0xa2   : > { %4047 = vmatprep.subr.bf16.mxu1 %v4046_v31  ;;  %v454_v46 = vld [vmem:[#allocation5 + $0x1d0] sm:$0xff]  ;;  %v469_v48 = vld [vmem:[#allocation5 + $0x248] sm:$0xff]  ;;  %v463_v49 = vld [vmem:[#allocation5 + $0x218] sm:$0xff]  ;;  %v3860_v51 = vpack.c.bf16 %v452_v43, %v444_v42 }
  0xa3   : > { %v471_v50 = vld [vmem:[#allocation5 + $0x258] sm:$0xff]  ;;  %v4052_v52 = vpack.c.bf16 %v454_v46, %v446_v45  ;;  %v3862_v53 = vpack.c.bf16 %v469_v48, %v461_v47  ;;  %v460_v54 = vld [vmem:[#allocation5 + $0x200] sm:$0xff]  ;;  %v462_v56 = vld [vmem:[#allocation5 + $0x210] sm:$0xff] }
  0xa4   : > { %3857 = vmatpush1.bf16.msra.mxu0 %v3856_v35  ;;  %v468_v55 = vld [vmem:[#allocation5 + $0x240] sm:$0xff]  ;;  %v4054_v57 = vpack.c.bf16 %v471_v50, %v463_v49  ;;  %v470_v58 = vld [vmem:[#allocation5 + $0x250] sm:$0xff]  ;;  %v477_v59 = vld [vmem:[#allocation5 + $0x288] sm:$0xff] }
  0xa5   : > { %4049 = vmatpush1.bf16.msra.mxu1 %v4048_v39  ;;  %3859 = vmatprep.subr.bf16.mxu0 %v3858_v40  ;;  %v485_v60 = vld [vmem:[#allocation5 + $0x2c8] sm:$0xff]  ;;  %v479_v61 = vld [vmem:[#allocation5 + $0x298] sm:$0xff]  ;;  %v3864_v63 = vpack.c.bf16 %v468_v55, %v460_v54  ;;  %v4056_v0 = vpack.c.bf16 %v470_v58, %v462_v56  ;;  %v476_v2 = vld [vmem:[#allocation5 + $0x280] sm:$0xff] }
  0xa6   : > { %4051 = vmatprep.subr.bf16.mxu1 %v4050_v44  ;;  %v487_v62 = vld [vmem:[#allocation5 + $0x2d8] sm:$0xff]  ;;  %v3866_v1 = vpack.c.bf16 %v485_v60, %v477_v59  ;;  %v484_v3 = vld [vmem:[#allocation5 + $0x2c0] sm:$0xff]  ;;  %v478_v4 = vld [vmem:[#allocation5 + $0x290] sm:$0xff] }
  0xa7   : > { %v4058_v5 = vpack.c.bf16 %v487_v62, %v479_v61  ;;  %v486_v6 = vld [vmem:[#allocation5 + $0x2d0] sm:$0xff]  ;;  %v493_v7 = vld [vmem:[#allocation5 + $0x308] sm:$0xff]  ;;  %v495_v9 = vld [vmem:[#allocation5 + $0x318] sm:$0xff]  ;;  %v3868_v11 = vpack.c.bf16 %v484_v3, %v476_v2 }
  0xa8   : > { %3861 = vmatpush1.bf16.msra.mxu0 %v3860_v51  ;;  %v501_v8 = vld [vmem:[#allocation5 + $0x348] sm:$0xff]  ;;  %v503_v10 = vld [vmem:[#allocation5 + $0x358] sm:$0xff]  ;;  %v4060_v12 = vpack.c.bf16 %v486_v6, %v478_v4  ;;  %v492_v14 = vld [vmem:[#allocation5 + $0x300] sm:$0xff] }
  0xa9   : > { %4053 = vmatpush1.bf16.msra.mxu1 %v4052_v52  ;;  %3863 = vmatprep.subr.bf16.mxu0 %v3862_v53  ;;  %v3870_v13 = vpack.c.bf16 %v501_v8, %v493_v7  ;;  %v500_v15 = vld [vmem:[#allocation5 + $0x340] sm:$0xff]  ;;  %v494_v16 = vld [vmem:[#allocation5 + $0x310] sm:$0xff]  ;;  %v4062_v17 = vpack.c.bf16 %v503_v10, %v495_v9  ;;  %v509_v19 = vld [vmem:[#allocation5 + $0x388] sm:$0xff] }
  0xaa   : > { %4055 = vmatprep.subr.bf16.mxu1 %v4054_v57  ;;  %v502_v18 = vld [vmem:[#allocation5 + $0x350] sm:$0xff]  ;;  %v517_v20 = vld [vmem:[#allocation5 + $0x3c8] sm:$0xff]  ;;  %v511_v21 = vld [vmem:[#allocation5 + $0x398] sm:$0xff]  ;;  %v3872_v23 = vpack.c.bf16 %v500_v15, %v492_v14 }
  0xab   : > { %v519_v22 = vld [vmem:[#allocation5 + $0x3d8] sm:$0xff]  ;;  %v4064_v24 = vpack.c.bf16 %v502_v18, %v494_v16  ;;  %v3874_v25 = vpack.c.bf16 %v517_v20, %v509_v19  ;;  %v508_v26 = vld [vmem:[#allocation5 + $0x380] sm:$0xff]  ;;  %v510_v28 = vld [vmem:[#allocation5 + $0x390] sm:$0xff] }
  0xac   : > { %3865 = vmatpush1.bf16.msra.mxu0 %v3864_v63  ;;  %v516_v27 = vld [vmem:[#allocation5 + $0x3c0] sm:$0xff]  ;;  %v4066_v29 = vpack.c.bf16 %v519_v22, %v511_v21  ;;  %v518_v30 = vld [vmem:[#allocation5 + $0x3d0] sm:$0xff]  ;;  %v525_v31 = vld [vmem:[#allocation5 + $0x408] sm:$0xff] }
  0xad   : > { %4057 = vmatpush1.bf16.msra.mxu1 %v4056_v0  ;;  %3867 = vmatprep.subr.bf16.mxu0 %v3866_v1  ;;  %v533_v32 = vld [vmem:[#allocation5 + $0x448] sm:$0xff]  ;;  %v527_v33 = vld [vmem:[#allocation5 + $0x418] sm:$0xff]  ;;  %v3876_v35 = vpack.c.bf16 %v516_v27, %v508_v26  ;;  %v4068_v36 = vpack.c.bf16 %v518_v30, %v510_v28  ;;  %v524_v38 = vld [vmem:[#allocation5 + $0x400] sm:$0xff] }
  0xae   : > { %4059 = vmatprep.subr.bf16.mxu1 %v4058_v5  ;;  %v535_v34 = vld [vmem:[#allocation5 + $0x458] sm:$0xff]  ;;  %v3878_v37 = vpack.c.bf16 %v533_v32, %v525_v31  ;;  %v532_v39 = vld [vmem:[#allocation5 + $0x440] sm:$0xff]  ;;  %v526_v40 = vld [vmem:[#allocation5 + $0x410] sm:$0xff] }
  0xaf   : > { %v4070_v41 = vpack.c.bf16 %v535_v34, %v527_v33  ;;  %v534_v42 = vld [vmem:[#allocation5 + $0x450] sm:$0xff]  ;;  %v541_v43 = vld [vmem:[#allocation5 + $0x488] sm:$0xff]  ;;  %v543_v45 = vld [vmem:[#allocation5 + $0x498] sm:$0xff]  ;;  %v3880_v47 = vpack.c.bf16 %v532_v39, %v524_v38 }
  0xb0   : > { %3869 = vmatpush1.bf16.msra.mxu0 %v3868_v11  ;;  %v549_v44 = vld [vmem:[#allocation5 + $0x4c8] sm:$0xff]  ;;  %v551_v46 = vld [vmem:[#allocation5 + $0x4d8] sm:$0xff]  ;;  %v4072_v48 = vpack.c.bf16 %v534_v42, %v526_v40  ;;  %v540_v50 = vld [vmem:[#allocation5 + $0x480] sm:$0xff] }
  0xb1   : > { %4061 = vmatpush1.bf16.msra.mxu1 %v4060_v12  ;;  %3871 = vmatprep.subr.bf16.mxu0 %v3870_v13  ;;  %v3882_v49 = vpack.c.bf16 %v549_v44, %v541_v43  ;;  %v548_v51 = vld [vmem:[#allocation5 + $0x4c0] sm:$0xff]  ;;  %v542_v52 = vld [vmem:[#allocation5 + $0x490] sm:$0xff]  ;;  %v4074_v53 = vpack.c.bf16 %v551_v46, %v543_v45  ;;  %v557_v55 = vld [vmem:[#allocation5 + $0x508] sm:$0xff] }
  0xb2   : > { %4063 = vmatprep.subr.bf16.mxu1 %v4062_v17  ;;  %v550_v54 = vld [vmem:[#allocation5 + $0x4d0] sm:$0xff]  ;;  %v565_v56 = vld [vmem:[#allocation5 + $0x548] sm:$0xff]  ;;  %v559_v57 = vld [vmem:[#allocation5 + $0x518] sm:$0xff]  ;;  %v3884_v59 = vpack.c.bf16 %v548_v51, %v540_v50 }
  0xb3   : > { %v567_v58 = vld [vmem:[#allocation5 + $0x558] sm:$0xff]  ;;  %v4076_v60 = vpack.c.bf16 %v550_v54, %v542_v52  ;;  %v3886_v61 = vpack.c.bf16 %v565_v56, %v557_v55  ;;  %v556_v62 = vld [vmem:[#allocation5 + $0x500] sm:$0xff]  ;;  %v558_v0 = vld [vmem:[#allocation5 + $0x510] sm:$0xff] }
  0xb4   : > { %3873 = vmatpush1.bf16.msra.mxu0 %v3872_v23  ;;  %v564_v63 = vld [vmem:[#allocation5 + $0x540] sm:$0xff]  ;;  %v4078_v1 = vpack.c.bf16 %v567_v58, %v559_v57  ;;  %v566_v2 = vld [vmem:[#allocation5 + $0x550] sm:$0xff]  ;;  %v573_v3 = vld [vmem:[#allocation5 + $0x588] sm:$0xff] }
  0xb5   : > { %4065 = vmatpush1.bf16.msra.mxu1 %v4064_v24  ;;  %3875 = vmatprep.subr.bf16.mxu0 %v3874_v25  ;;  %v581_v4 = vld [vmem:[#allocation5 + $0x5c8] sm:$0xff]  ;;  %v575_v5 = vld [vmem:[#allocation5 + $0x598] sm:$0xff]  ;;  %v3888_v7 = vpack.c.bf16 %v564_v63, %v556_v62  ;;  %v572_v8 = vld [vmem:[#allocation5 + $0x580] sm:$0xff]  ;;  %v4080_v9 = vpack.c.bf16 %v566_v2, %v558_v0 }
  0xb6   : > { %4067 = vmatprep.subr.bf16.mxu1 %v4066_v29  ;;  %v583_v6 = vld [vmem:[#allocation5 + $0x5d8] sm:$0xff]  ;;  %v3890_v10 = vpack.c.bf16 %v581_v4, %v573_v3  ;;  %v580_v11 = vld [vmem:[#allocation5 + $0x5c0] sm:$0xff]  ;;  %v574_v12 = vld [vmem:[#allocation5 + $0x590] sm:$0xff] }
  0xb7   : > { %v582_v13 = vld [vmem:[#allocation5 + $0x5d0] sm:$0xff]  ;;  %v4082_v14 = vpack.c.bf16 %v583_v6, %v575_v5  ;;  %v589_v15 = vld [vmem:[#allocation5 + $0x608] sm:$0xff]  ;;  %v591_v18 = vld [vmem:[#allocation5 + $0x618] sm:$0xff]  ;;  %v3892_v20 = vpack.c.bf16 %v580_v11, %v572_v8 }
  0xb8   : > { %3877 = vmatpush1.bf16.msra.mxu0 %v3876_v35  ;;  %v597_v16 = vld [vmem:[#allocation5 + $0x648] sm:$0xff]  ;;  %v599_v19 = vld [vmem:[#allocation5 + $0x658] sm:$0xff]  ;;  %v4084_v21 = vpack.c.bf16 %v582_v13, %v574_v12  ;;  %v588_v23 = vld [vmem:[#allocation5 + $0x600] sm:$0xff] }
  0xb9   : > { %4069 = vmatpush1.bf16.msra.mxu1 %v4068_v36  ;;  %3879 = vmatprep.subr.bf16.mxu0 %v3878_v37  ;;  %v301_v17 = vld [vmem:[%s5683_s25 + $0x8] sm:$0xff]  ;;  %v3894_v22 = vpack.c.bf16 %v597_v16, %v589_v15  ;;  %v596_v24 = vld [vmem:[#allocation5 + $0x640] sm:$0xff]  ;;  %v590_v25 = vld [vmem:[#allocation5 + $0x610] sm:$0xff]  ;;  %v4086_v26 = vpack.c.bf16 %v599_v19, %v591_v18 }
  0xba   : > { %4071 = vmatprep.subr.bf16.mxu1 %v4070_v41  ;;  %1270 = vmatprep.mubr.f32.mxu0 %v301_v17  ;;  %v598_v27 = vld [vmem:[#allocation5 + $0x650] sm:$0xff]  ;;  %v605_v28 = vld [vmem:[#allocation5 + $0x688] sm:$0xff]  ;;  %v607_v30 = vld [vmem:[#allocation5 + $0x698] sm:$0xff]  ;;  %v3896_v32 = vpack.c.bf16 %v596_v24, %v588_v23 }
  0xbb   : > { %1753 = vmatprep.mubr.f32.mxu1 %v301_v17  ;;  %v613_v29 = vld [vmem:[#allocation5 + $0x6c8] sm:$0xff]  ;;  %v615_v31 = vld [vmem:[#allocation5 + $0x6d8] sm:$0xff]  ;;  %v4088_v33 = vpack.c.bf16 %v598_v27, %v590_v25  ;;  %v604_v35 = vld [vmem:[#allocation5 + $0x680] sm:$0xff] }
  0xbc   : > { %3881 = vmatpush1.bf16.msra.mxu0 %v3880_v47  ;;  %v3898_v34 = vpack.c.bf16 %v613_v29, %v605_v28  ;;  %v612_v36 = vld [vmem:[#allocation5 + $0x6c0] sm:$0xff]  ;;  %v606_v37 = vld [vmem:[#allocation5 + $0x690] sm:$0xff]  ;;  %v4090_v38 = vpack.c.bf16 %v615_v31, %v607_v30  ;;  %v621_v40 = vld [vmem:[#allocation5 + $0x708] sm:$0xff] }
  0xbd   : > { %4073 = vmatpush1.bf16.msra.mxu1 %v4072_v48  ;;  %3883 = vmatprep.subr.bf16.mxu0 %v3882_v49  ;;  %v614_v39 = vld [vmem:[#allocation5 + $0x6d0] sm:$0xff]  ;;  %v629_v41 = vld [vmem:[#allocation5 + $0x748] sm:$0xff]  ;;  %v623_v42 = vld [vmem:[#allocation5 + $0x718] sm:$0xff]  ;;  %v3900_v44 = vpack.c.bf16 %v612_v36, %v604_v35 }
  0xbe   : > { %4075 = vmatprep.subr.bf16.mxu1 %v4074_v53  ;;  %v631_v43 = vld [vmem:[#allocation5 + $0x758] sm:$0xff]  ;;  %v4092_v45 = vpack.c.bf16 %v614_v39, %v606_v37  ;;  %v3902_v46 = vpack.c.bf16 %v629_v41, %v621_v40  ;;  %v620_v47 = vld [vmem:[#allocation5 + $0x700] sm:$0xff]  ;;  %v622_v49 = vld [vmem:[#allocation5 + $0x710] sm:$0xff] }
  0xbf   : > { %v628_v48 = vld [vmem:[#allocation5 + $0x740] sm:$0xff]  ;;  %v4094_v50 = vpack.c.bf16 %v631_v43, %v623_v42  ;;  %v630_v51 = vld [vmem:[#allocation5 + $0x750] sm:$0xff]  ;;  %v637_v52 = vld [vmem:[#allocation5 + $0x788] sm:$0xff] }
  0xc0   : > { %3885 = vmatpush1.bf16.msra.mxu0 %v3884_v59  ;;  %v645_v53 = vld [vmem:[#allocation5 + $0x7c8] sm:$0xff]  ;;  %v639_v54 = vld [vmem:[#allocation5 + $0x798] sm:$0xff]  ;;  %v3904_v56 = vpack.c.bf16 %v628_v48, %v620_v47  ;;  %v4096_v57 = vpack.c.bf16 %v630_v51, %v622_v49  ;;  %v636_v59 = vld [vmem:[#allocation5 + $0x780] sm:$0xff] }
  0xc1   : > { %4077 = vmatpush1.bf16.msra.mxu1 %v4076_v60  ;;  %3887 = vmatprep.subr.bf16.mxu0 %v3886_v61  ;;  %v647_v55 = vld [vmem:[#allocation5 + $0x7d8] sm:$0xff]  ;;  %v3906_v58 = vpack.c.bf16 %v645_v53, %v637_v52  ;;  %v644_v60 = vld [vmem:[#allocation5 + $0x7c0] sm:$0xff]  ;;  %v638_v61 = vld [vmem:[#allocation5 + $0x790] sm:$0xff] }
  0xc2   : > { %4079 = vmatprep.subr.bf16.mxu1 %v4078_v1  ;;  %v4098_v62 = vpack.c.bf16 %v647_v55, %v639_v54  ;;  %v646_v63 = vld [vmem:[#allocation5 + $0x7d0] sm:$0xff]  ;;  %v653_v0 = vld [vmem:[#allocation5 + $0x808] sm:$0xff]  ;;  %v655_v2 = vld [vmem:[#allocation5 + $0x818] sm:$0xff]  ;;  %v3908_v4 = vpack.c.bf16 %v644_v60, %v636_v59 }
  0xc3   : > { %v661_v1 = vld [vmem:[#allocation5 + $0x848] sm:$0xff]  ;;  %v663_v3 = vld [vmem:[#allocation5 + $0x858] sm:$0xff]  ;;  %v4100_v5 = vpack.c.bf16 %v646_v63, %v638_v61  ;;  %v660_v8 = vld [vmem:[#allocation5 + $0x840] sm:$0xff] }
  0xc4   : > { %3889 = vmatpush1.bf16.msra.mxu0 %v3888_v7  ;;  %v3910_v6 = vpack.c.bf16 %v661_v1, %v653_v0  ;;  %v652_v7 = vld [vmem:[#allocation5 + $0x800] sm:$0xff]  ;;  %v662_v11 = vld [vmem:[#allocation5 + $0x850] sm:$0xff]  ;;  %v669_v12 = vld [vmem:[#allocation5 + $0x888] sm:$0xff] }
  0xc5   : > { %4081 = vmatpush1.bf16.msra.mxu1 %v4080_v9  ;;  %3891 = vmatprep.subr.bf16.mxu0 %v3890_v10  ;;  %v4102_v9 = vpack.c.bf16 %v663_v3, %v655_v2  ;;  %v654_v10 = vld [vmem:[#allocation5 + $0x810] sm:$0xff]  ;;  %v677_v13 = vld [vmem:[#allocation5 + $0x8c8] sm:$0xff]  ;;  %v3912_v15 = vpack.c.bf16 %v660_v8, %v652_v7  ;;  %v671_v16 = vld [vmem:[#allocation5 + $0x898] sm:$0xff] }
  0xc6   : > { %4083 = vmatprep.subr.bf16.mxu1 %v4082_v14  ;;  %v300_v14 = vld [vmem:[%s5683_s25] sm:$0xff]  ;;  %v679_v17 = vld [vmem:[#allocation5 + $0x8d8] sm:$0xff]  ;;  %v4104_v18 = vpack.c.bf16 %v662_v11, %v654_v10  ;;  %v670_v23 = vld [vmem:[#allocation5 + $0x890] sm:$0xff] }
  0xc7   : > { %v668_v19 = vld [vmem:[#allocation5 + $0x880] sm:$0xff]  ;;  %v678_v24 = vld [vmem:[#allocation5 + $0x8d0] sm:$0xff]  ;;  %v4106_v25 = vpack.c.bf16 %v679_v17, %v671_v16  ;;  %v693_v27 = vld [vmem:[#allocation5 + $0x948] sm:$0xff] }
  0xc8   : > { %3893 = vmatpush1.bf16.msra.mxu0 %v3892_v20  ;;  %v676_v20 = vld [vmem:[#allocation5 + $0x8c0] sm:$0xff]  ;;  %v306_v28 = vld [vmem:[%s5683_s25 + $0x30] sm:$0xff]  ;;  %v687_v30 = vld [vmem:[#allocation5 + $0x918] sm:$0xff] }
  0xc9   : > { %4085 = vmatpush1.bf16.msra.mxu1 %v4084_v21  ;;  %3895 = vmatprep.subr.bf16.mxu0 %v3894_v22  ;;  %v307_v21 = vld [vmem:[%s5683_s25 + $0x38] sm:$0xff]  ;;  %v3914_v22 = vpack.c.bf16 %v677_v13, %v669_v12  ;;  %v3916_v29 = vpack.c.bf16 %v676_v20, %v668_v19  ;;  %v313_v35 = vld [vmem:[%s5683_s25 + $0x68] sm:$0xff]  ;;  %v686_v37 = vld [vmem:[#allocation5 + $0x910] sm:$0xff] }
  0xca   : > { %4087 = vmatprep.subr.bf16.mxu1 %v4086_v26  ;;  %v685_v26 = vld [vmem:[#allocation5 + $0x908] sm:$0xff]  ;;  %v695_v31 = vld [vmem:[#allocation5 + $0x958] sm:$0xff]  ;;  %v312_v42 = vld [vmem:[%s5683_s25 + $0x60] sm:$0xff] }
  0xcb   : > { %v3918_v36 = vpack.c.bf16 %v693_v27, %v685_v26  ;;  %v4110_v39 = vpack.c.bf16 %v695_v31, %v687_v30  ;;  %v701_v40 = vld [vmem:[#allocation5 + $0x988] sm:$0xff]  ;;  %v700_v47 = vld [vmem:[#allocation5 + $0x980] sm:$0xff]  ;;  %v319_v49 = vld [vmem:[%s5683_s25 + $0x98] sm:$0xff] }
  0xcc   : > { %3897 = vmatpush1.bf16.msra.mxu0 %v3896_v32  ;;  %v4108_v32 = vpack.c.bf16 %v678_v24, %v670_v23  ;;  %v709_v41 = vld [vmem:[#allocation5 + $0x9c8] sm:$0xff]  ;;  %v708_v48 = vld [vmem:[#allocation5 + $0x9c0] sm:$0xff]  ;;  %v702_v51 = vld [vmem:[#allocation5 + $0x990] sm:$0xff] }
  0xcd   : > { %4089 = vmatpush1.bf16.msra.mxu1 %v4088_v33  ;;  %3899 = vmatprep.subr.bf16.mxu0 %v3898_v34  ;;  %v684_v33 = vld [vmem:[#allocation5 + $0x900] sm:$0xff]  ;;  %v710_v52 = vld [vmem:[#allocation5 + $0x9d0] sm:$0xff]  ;;  %v717_v54 = vld [vmem:[#allocation5 + $0xa08] sm:$0xff] }
  0xce   : > { %4091 = vmatprep.subr.bf16.mxu1 %v4090_v38  ;;  %v692_v34 = vld [vmem:[#allocation5 + $0x940] sm:$0xff]  ;;  %v694_v38 = vld [vmem:[#allocation5 + $0x950] sm:$0xff]  ;;  %v725_v55 = vld [vmem:[#allocation5 + $0xa48] sm:$0xff]  ;;  %v4116_v60 = vpack.c.bf16 %v710_v52, %v702_v51 }
  0xcf   : > { %v3920_v43 = vpack.c.bf16 %v692_v34, %v684_v33  ;;  %v727_v59 = vld [vmem:[#allocation5 + $0xa58] sm:$0xff]  ;;  %v716_v61 = vld [vmem:[#allocation5 + $0xa00] sm:$0xff]  ;;  %v325_v63 = vld [vmem:[%s5683_s25 + $0xc8] sm:$0xff]  ;;  %v3926_v0 = vpack.c.bf16 %v725_v55, %v717_v54 }
  0xd0   : > { %3901 = vmatpush1.bf16.msra.mxu0 %v3900_v44  ;;  %v703_v44 = vld [vmem:[#allocation5 + $0x998] sm:$0xff]  ;;  %v718_v1 = vld [vmem:[#allocation5 + $0xa10] sm:$0xff]  ;;  %v732_v11 = vld [vmem:[#allocation5 + $0xa80] sm:$0xff] }
  0xd1   : > { %4093 = vmatpush1.bf16.msra.mxu1 %v4092_v45  ;;  %3903 = vmatprep.subr.bf16.mxu0 %v3902_v46  ;;  %v711_v45 = vld [vmem:[#allocation5 + $0x9d8] sm:$0xff]  ;;  %v4112_v46 = vpack.c.bf16 %v694_v38, %v686_v37  ;;  %v726_v2 = vld [vmem:[#allocation5 + $0xa50] sm:$0xff]  ;;  %v740_v12 = vld [vmem:[#allocation5 + $0xac0] sm:$0xff] }
  0xd2   : > { %4095 = vmatprep.subr.bf16.mxu1 %v4094_v50  ;;  %v3922_v50 = vpack.c.bf16 %v709_v41, %v701_v40  ;;  %v4114_v53 = vpack.c.bf16 %v711_v45, %v703_v44  ;;  %v735_v8 = vld [vmem:[#allocation5 + $0xa98] sm:$0xff]  ;;  %v4120_v10 = vpack.c.bf16 %v726_v2, %v718_v1  ;;  %v742_v16 = vld [vmem:[#allocation5 + $0xad0] sm:$0xff]  ;;  %v757_v19 = vld [vmem:[#allocation5 + $0xb48] sm:$0xff] }
  0xd3   : > { %v331_v13 = vld [vmem:[%s5683_s25 + $0xf8] sm:$0xff]  ;;  %v330_v20 = vld [vmem:[%s5683_s25 + $0xf0] sm:$0xff]  ;;  %v756_v26 = vld [vmem:[#allocation5 + $0xb40] sm:$0xff] }
  0xd4   : > { %3905 = vmatpush1.bf16.msra.mxu0 %v3904_v56  ;;  %v318_v56 = vld [vmem:[%s5683_s25 + $0x90] sm:$0xff]  ;;  %v759_v23 = vld [vmem:[#allocation5 + $0xb58] sm:$0xff]  ;;  %v337_v27 = vld [vmem:[%s5683_s25 + $0x128] sm:$0xff] }
  0xd5   : > { %4097 = vmatpush1.bf16.msra.mxu1 %v4096_v57  ;;  %3907 = vmatprep.subr.bf16.mxu0 %v3906_v58  ;;  %v3924_v57 = vpack.c.bf16 %v708_v48, %v700_v47  ;;  %v719_v58 = vld [vmem:[#allocation5 + $0xa18] sm:$0xff]  ;;  %v758_v30 = vld [vmem:[#allocation5 + $0xb50] sm:$0xff]  ;;  %v773_v33 = vld [vmem:[#allocation5 + $0xbc8] sm:$0xff] }
  0xd6   : > { %4099 = vmatprep.subr.bf16.mxu1 %v4098_v62  ;;  %v724_v62 = vld [vmem:[#allocation5 + $0xa40] sm:$0xff]  ;;  %v4118_v3 = vpack.c.bf16 %v727_v59, %v719_v58  ;;  %v775_v37 = vld [vmem:[#allocation5 + $0xbd8] sm:$0xff]  ;;  %v774_v44 = vld [vmem:[#allocation5 + $0xbd0] sm:$0xff] }
  0xd7   : > { %v3928_v7 = vpack.c.bf16 %v724_v62, %v716_v61  ;;  %v336_v34 = vld [vmem:[%s5683_s25 + $0x120] sm:$0xff]  ;;  %v343_v41 = vld [vmem:[%s5683_s25 + $0x158] sm:$0xff]  ;;  %v789_v47 = vld [vmem:[#allocation5 + $0xc48] sm:$0xff] }
  0xd8   : > { %3909 = vmatpush1.bf16.msra.mxu0 %v3908_v4  ;;  %v733_v4 = vld [vmem:[#allocation5 + $0xa88] sm:$0xff]  ;;  %v772_v40 = vld [vmem:[#allocation5 + $0xbc0] sm:$0xff]  ;;  %v342_v48 = vld [vmem:[%s5683_s25 + $0x150] sm:$0xff] }
  0xd9   : > { %4101 = vmatpush1.bf16.msra.mxu1 %v4100_v5  ;;  %3911 = vmatprep.subr.bf16.mxu0 %v3910_v6  ;;  %v741_v5 = vld [vmem:[#allocation5 + $0xac8] sm:$0xff]  ;;  %v324_v6 = vld [vmem:[%s5683_s25 + $0xc0] sm:$0xff]  ;;  %v791_v51 = vld [vmem:[#allocation5 + $0xc58] sm:$0xff] }
  0xda   : > { %4103 = vmatprep.subr.bf16.mxu1 %v4102_v9  ;;  %v743_v9 = vld [vmem:[#allocation5 + $0xad8] sm:$0xff]  ;;  %v788_v54 = vld [vmem:[#allocation5 + $0xc40] sm:$0xff]  ;;  %v349_v55 = vld [vmem:[%s5683_s25 + $0x188] sm:$0xff] }
  0xdb   : > { %1271 = vmatmul.mubr.f32.vlgmr.msra.gmra.mrb[0].mxu0 %v300_v14  ;;  %v4122_v17 = vpack.c.bf16 %v743_v9, %v735_v8  ;;  %v790_v58 = vld [vmem:[#allocation5 + $0xc50] sm:$0xff]  ;;  %v805_v61 = vld [vmem:[#allocation5 + $0xcc8] sm:$0xff]  ;;  %v348_v62 = vld [vmem:[%s5683_s25 + $0x180] sm:$0xff] }
  0xdc   : > { %1754 = vmatmul.mubr.f32.vlgmr.msra.gmra.mrb[0].mxu1 %v300_v14  ;;  %3913 = vmatpush1.bf16.msra.mxu0 %v3912_v15  ;;  %v3930_v14 = vpack.c.bf16 %v741_v5, %v733_v4  ;;  %v734_v15 = vld [vmem:[#allocation5 + $0xa90] sm:$0xff]  ;;  %v807_v1 = vld [vmem:[#allocation5 + $0xcd8] sm:$0xff]  ;;  %v804_v4 = vld [vmem:[#allocation5 + $0xcc0] sm:$0xff] }
  0xdd   : > { %4105 = vmatpush1.bf16.msra.mxu1 %v4104_v18  ;;  %1276 = vmatprep.mubr.f32.mxu0 %v307_v21  ;;  %v749_v18 = vld [vmem:[#allocation5 + $0xb08] sm:$0xff]  ;;  %v4124_v24 = vpack.c.bf16 %v742_v16, %v734_v15  ;;  %v355_v5 = vld [vmem:[%s5683_s25 + $0x1b8] sm:$0xff]  ;;  %v806_v8 = vld [vmem:[#allocation5 + $0xcd0] sm:$0xff] }
  0xde   : > { %1759 = vmatprep.mubr.f32.mxu1 %v307_v21  ;;  %3915 = vmatprep.subr.bf16.mxu0 %v3914_v22  ;;  %v3932_v21 = vpack.c.bf16 %v740_v12, %v732_v11  ;;  %v751_v22 = vld [vmem:[#allocation5 + $0xb18] sm:$0xff]  ;;  %v821_v11 = vld [vmem:[#allocation5 + $0xd48] sm:$0xff]  ;;  %v354_v12 = vld [vmem:[%s5683_s25 + $0x1b0] sm:$0xff] }
  0xdf   : > { %1277 = vmatmul.mubr.f32.gmra.mrb[2].mxu0 %v306_v28  ;;  %4107 = vmatprep.subr.bf16.mxu1 %v4106_v25  ;;  %v748_v25 = vld [vmem:[#allocation5 + $0xb00] sm:$0xff]  ;;  %v4126_v31 = vpack.c.bf16 %v759_v23, %v751_v22  ;;  %v823_v15 = vld [vmem:[#allocation5 + $0xd58] sm:$0xff]  ;;  %v822_v22 = vld [vmem:[#allocation5 + $0xd50] sm:$0xff] }
  0xe0   : > { %1760 = vmatmul.mubr.f32.gmra.mrb[2].mxu1 %v306_v28  ;;  %3917 = vmatpush1.bf16.msra.mxu0 %v3916_v29  ;;  %v3934_v28 = vpack.c.bf16 %v757_v19, %v749_v18  ;;  %v750_v29 = vld [vmem:[#allocation5 + $0xb10] sm:$0xff]  ;;  %v820_v18 = vld [vmem:[#allocation5 + $0xd40] sm:$0xff]  ;;  %v361_v19 = vld [vmem:[%s5683_s25 + $0x1e8] sm:$0xff] }
  0xe1   : > { %4109 = vmatpush1.bf16.msra.mxu1 %v4108_v32  ;;  %1282 = vmatprep.mubr.f32.mxu0 %v313_v35  ;;  %v765_v32 = vld [vmem:[#allocation5 + $0xb88] sm:$0xff]  ;;  %v4128_v38 = vpack.c.bf16 %v758_v30, %v750_v29  ;;  %v839_v29 = vld [vmem:[#allocation5 + $0xdd8] sm:$0xff] }
  0xe2   : > { %1765 = vmatprep.mubr.f32.mxu1 %v313_v35  ;;  %3919 = vmatprep.subr.bf16.mxu0 %v3918_v36  ;;  %v3936_v35 = vpack.c.bf16 %v756_v26, %v748_v25  ;;  %v767_v36 = vld [vmem:[#allocation5 + $0xb98] sm:$0xff]  ;;  %v837_v25 = vld [vmem:[#allocation5 + $0xdc8] sm:$0xff]  ;;  %v360_v26 = vld [vmem:[%s5683_s25 + $0x1e0] sm:$0xff] }
  0xe3   : > { %1283 = vmatmul.mubr.f32.gmra.mrb[4].mxu0 %v312_v42  ;;  %4111 = vmatprep.subr.bf16.mxu1 %v4110_v39  ;;  %v764_v39 = vld [vmem:[#allocation5 + $0xb80] sm:$0xff]  ;;  %v4130_v45 = vpack.c.bf16 %v775_v37, %v767_v36  ;;  %v838_v36 = vld [vmem:[#allocation5 + $0xdd0] sm:$0xff] }
  0xe4   : > { %1766 = vmatmul.mubr.f32.gmra.mrb[4].mxu1 %v312_v42  ;;  %3921 = vmatpush1.bf16.msra.mxu0 %v3920_v43  ;;  %v3938_v42 = vpack.c.bf16 %v773_v33, %v765_v32  ;;  %v766_v43 = vld [vmem:[#allocation5 + $0xb90] sm:$0xff]  ;;  %v836_v32 = vld [vmem:[#allocation5 + $0xdc0] sm:$0xff]  ;;  %v367_v33 = vld [vmem:[%s5683_s25 + $0x218] sm:$0xff] }
  0xe5   : > { %4113 = vmatpush1.bf16.msra.mxu1 %v4112_v46  ;;  %1288 = vmatprep.mubr.f32.mxu0 %v319_v49  ;;  %v781_v46 = vld [vmem:[#allocation5 + $0xc08] sm:$0xff]  ;;  %v4132_v52 = vpack.c.bf16 %v774_v44, %v766_v43  ;;  %v855_v43 = vld [vmem:[#allocation5 + $0xe58] sm:$0xff] }
  0xe6   : > { %1771 = vmatprep.mubr.f32.mxu1 %v319_v49  ;;  %3923 = vmatprep.subr.bf16.mxu0 %v3922_v50  ;;  %v3940_v49 = vpack.c.bf16 %v772_v40, %v764_v39  ;;  %v783_v50 = vld [vmem:[#allocation5 + $0xc18] sm:$0xff]  ;;  %v853_v39 = vld [vmem:[#allocation5 + $0xe48] sm:$0xff]  ;;  %v366_v40 = vld [vmem:[%s5683_s25 + $0x210] sm:$0xff] }
  0xe7   : > { %1289 = vmatmul.mubr.f32.gmra.mrb[6].mxu0 %v318_v56  ;;  %4115 = vmatprep.subr.bf16.mxu1 %v4114_v53  ;;  %v780_v53 = vld [vmem:[#allocation5 + $0xc00] sm:$0xff]  ;;  %v4134_v59 = vpack.c.bf16 %v791_v51, %v783_v50  ;;  %v854_v50 = vld [vmem:[#allocation5 + $0xe50] sm:$0xff] }
  0xe8   : > { %1772 = vmatmul.mubr.f32.gmra.mrb[6].mxu1 %v318_v56  ;;  %3925 = vmatpush1.bf16.msra.mxu0 %v3924_v57  ;;  %v3942_v56 = vpack.c.bf16 %v789_v47, %v781_v46  ;;  %v782_v57 = vld [vmem:[#allocation5 + $0xc10] sm:$0xff]  ;;  %v852_v46 = vld [vmem:[#allocation5 + $0xe40] sm:$0xff]  ;;  %v373_v47 = vld [vmem:[%s5683_s25 + $0x248] sm:$0xff] }
  0xe9   : > { %4117 = vmatpush1.bf16.msra.mxu1 %v4116_v60  ;;  %1294 = vmatprep.mubr.f32.mxu0 %v325_v63  ;;  %v797_v60 = vld [vmem:[#allocation5 + $0xc88] sm:$0xff]  ;;  %v4136_v2 = vpack.c.bf16 %v790_v58, %v782_v57  ;;  %v871_v57 = vld [vmem:[#allocation5 + $0xed8] sm:$0xff] }
  0xea   : > { %1777 = vmatprep.mubr.f32.mxu1 %v325_v63  ;;  %3927 = vmatprep.subr.bf16.mxu0 %v3926_v0  ;;  %v3944_v63 = vpack.c.bf16 %v788_v54, %v780_v53  ;;  %v799_v0 = vld [vmem:[#allocation5 + $0xc98] sm:$0xff]  ;;  %v869_v53 = vld [vmem:[#allocation5 + $0xec8] sm:$0xff]  ;;  %v372_v54 = vld [vmem:[%s5683_s25 + $0x240] sm:$0xff] }
  0xeb   : > { %1295 = vmatmul.mubr.f32.gmra.mrb[8].mxu0 %v324_v6  ;;  %4119 = vmatprep.subr.bf16.mxu1 %v4118_v3  ;;  %v796_v3 = vld [vmem:[#allocation5 + $0xc80] sm:$0xff]  ;;  %v4138_v9 = vpack.c.bf16 %v807_v1, %v799_v0  ;;  %v870_v0 = vld [vmem:[#allocation5 + $0xed0] sm:$0xff] }
  0xec   : > { %1778 = vmatmul.mubr.f32.gmra.mrb[8].mxu1 %v324_v6  ;;  %3929 = vmatpush1.bf16.msra.mxu0 %v3928_v7  ;;  %v3946_v6 = vpack.c.bf16 %v805_v61, %v797_v60  ;;  %v798_v7 = vld [vmem:[#allocation5 + $0xc90] sm:$0xff]  ;;  %v868_v60 = vld [vmem:[#allocation5 + $0xec0] sm:$0xff]  ;;  %v379_v61 = vld [vmem:[%s5683_s25 + $0x278] sm:$0xff] }
  0xed   : > { %4121 = vmatpush1.bf16.msra.mxu1 %v4120_v10  ;;  %1300 = vmatprep.mubr.f32.mxu0 %v331_v13  ;;  %v813_v10 = vld [vmem:[#allocation5 + $0xd08] sm:$0xff]  ;;  %v4140_v16 = vpack.c.bf16 %v806_v8, %v798_v7  ;;  %v887_v7 = vld [vmem:[#allocation5 + $0xf58] sm:$0xff] }
  0xee   : > { %1783 = vmatprep.mubr.f32.mxu1 %v331_v13  ;;  %3931 = vmatprep.subr.bf16.mxu0 %v3930_v14  ;;  %v3948_v13 = vpack.c.bf16 %v804_v4, %v796_v3  ;;  %v815_v14 = vld [vmem:[#allocation5 + $0xd18] sm:$0xff]  ;;  %v885_v3 = vld [vmem:[#allocation5 + $0xf48] sm:$0xff]  ;;  %v378_v4 = vld [vmem:[%s5683_s25 + $0x270] sm:$0xff] }
  0xef   : > { %1301 = vmatmul.mubr.f32.gmra.mrb[10].mxu0 %v330_v20  ;;  %4123 = vmatprep.subr.bf16.mxu1 %v4122_v17  ;;  %v812_v17 = vld [vmem:[#allocation5 + $0xd00] sm:$0xff]  ;;  %v4142_v23 = vpack.c.bf16 %v823_v15, %v815_v14  ;;  %v886_v14 = vld [vmem:[#allocation5 + $0xf50] sm:$0xff] }
  0xf0   : > { %1784 = vmatmul.mubr.f32.gmra.mrb[10].mxu1 %v330_v20  ;;  %3933 = vmatpush1.bf16.msra.mxu0 %v3932_v21  ;;  %v3950_v20 = vpack.c.bf16 %v821_v11, %v813_v10  ;;  %v814_v21 = vld [vmem:[#allocation5 + $0xd10] sm:$0xff]  ;;  %v884_v10 = vld [vmem:[#allocation5 + $0xf40] sm:$0xff]  ;;  %v385_v11 = vld [vmem:[%s5683_s25 + $0x2a8] sm:$0xff] }
  0xf1   : > { %4125 = vmatpush1.bf16.msra.mxu1 %v4124_v24  ;;  %1306 = vmatprep.mubr.f32.mxu0 %v337_v27  ;;  %v829_v24 = vld [vmem:[#allocation5 + $0xd88] sm:$0xff]  ;;  %v4144_v30 = vpack.c.bf16 %v822_v22, %v814_v21  ;;  %v903_v21 = vld [vmem:[#allocation5 + $0xfd8] sm:$0xff] }
  0xf2   : > { %1789 = vmatprep.mubr.f32.mxu1 %v337_v27  ;;  %3935 = vmatprep.subr.bf16.mxu0 %v3934_v28  ;;  %v3952_v27 = vpack.c.bf16 %v820_v18, %v812_v17  ;;  %v831_v28 = vld [vmem:[#allocation5 + $0xd98] sm:$0xff]  ;;  %v901_v17 = vld [vmem:[#allocation5 + $0xfc8] sm:$0xff]  ;;  %v384_v18 = vld [vmem:[%s5683_s25 + $0x2a0] sm:$0xff] }
  0xf3   : > { %1307 = vmatmul.mubr.f32.gmra.mrb[12].mxu0 %v336_v34  ;;  %4127 = vmatprep.subr.bf16.mxu1 %v4126_v31  ;;  %v828_v31 = vld [vmem:[#allocation5 + $0xd80] sm:$0xff]  ;;  %v4146_v37 = vpack.c.bf16 %v839_v29, %v831_v28  ;;  %v902_v28 = vld [vmem:[#allocation5 + $0xfd0] sm:$0xff] }
  0xf4   : > { %1790 = vmatmul.mubr.f32.gmra.mrb[12].mxu1 %v336_v34  ;;  %3937 = vmatpush1.bf16.msra.mxu0 %v3936_v35  ;;  %v3954_v34 = vpack.c.bf16 %v837_v25, %v829_v24  ;;  %v830_v35 = vld [vmem:[#allocation5 + $0xd90] sm:$0xff]  ;;  %v900_v24 = vld [vmem:[#allocation5 + $0xfc0] sm:$0xff]  ;;  %v391_v25 = vld [vmem:[%s5683_s25 + $0x2d8] sm:$0xff] }
  0xf5   : > { %4129 = vmatpush1.bf16.msra.mxu1 %v4128_v38  ;;  %1312 = vmatprep.mubr.f32.mxu0 %v343_v41  ;;  %v845_v38 = vld [vmem:[#allocation5 + $0xe08] sm:$0xff]  ;;  %v4148_v44 = vpack.c.bf16 %v838_v36, %v830_v35  ;;  %v919_v35 = vld [vmem:[#allocation5 + $0x1058] sm:$0xff] }
  0xf6   : > { %1795 = vmatprep.mubr.f32.mxu1 %v343_v41  ;;  %3939 = vmatprep.subr.bf16.mxu0 %v3938_v42  ;;  %v3956_v41 = vpack.c.bf16 %v836_v32, %v828_v31  ;;  %v847_v42 = vld [vmem:[#allocation5 + $0xe18] sm:$0xff]  ;;  %v917_v31 = vld [vmem:[#allocation5 + $0x1048] sm:$0xff]  ;;  %v390_v32 = vld [vmem:[%s5683_s25 + $0x2d0] sm:$0xff] }
  0xf7   : > { %1313 = vmatmul.mubr.f32.gmra.mrb[14].mxu0 %v342_v48  ;;  %4131 = vmatprep.subr.bf16.mxu1 %v4130_v45  ;;  %v844_v45 = vld [vmem:[#allocation5 + $0xe00] sm:$0xff]  ;;  %v4150_v51 = vpack.c.bf16 %v855_v43, %v847_v42  ;;  %v918_v42 = vld [vmem:[#allocation5 + $0x1050] sm:$0xff] }
  0xf8   : > { %1796 = vmatmul.mubr.f32.gmra.mrb[14].mxu1 %v342_v48  ;;  %3941 = vmatpush1.bf16.msra.mxu0 %v3940_v49  ;;  %v3958_v48 = vpack.c.bf16 %v853_v39, %v845_v38  ;;  %v846_v49 = vld [vmem:[#allocation5 + $0xe10] sm:$0xff]  ;;  %v916_v38 = vld [vmem:[#allocation5 + $0x1040] sm:$0xff]  ;;  %v303_v39 = vld [vmem:[%s5683_s25 + $0x18] sm:$0xff] }
  0xf9   : > { %4133 = vmatpush1.bf16.msra.mxu1 %v4132_v52  ;;  %1318 = vmatprep.mubr.f32.mxu0 %v349_v55  ;;  %v861_v52 = vld [vmem:[#allocation5 + $0xe88] sm:$0xff]  ;;  %v4152_v58 = vpack.c.bf16 %v854_v50, %v846_v49  ;;  %v935_v49 = vld [vmem:[#allocation5 + $0x10d8] sm:$0xff] }
  0xfa   : > { %1801 = vmatprep.mubr.f32.mxu1 %v349_v55  ;;  %3943 = vmatprep.subr.bf16.mxu0 %v3942_v56  ;;  %v3960_v55 = vpack.c.bf16 %v852_v46, %v844_v45  ;;  %v863_v56 = vld [vmem:[#allocation5 + $0xe98] sm:$0xff]  ;;  %v933_v45 = vld [vmem:[#allocation5 + $0x10c8] sm:$0xff]  ;;  %v302_v46 = vld [vmem:[%s5683_s25 + $0x10] sm:$0xff] }
  0xfb   : > { %1319 = vmatmul.mubr.f32.gmra.mrb[16].mxu0 %v348_v62  ;;  %4135 = vmatprep.subr.bf16.mxu1 %v4134_v59  ;;  %v860_v59 = vld [vmem:[#allocation5 + $0xe80] sm:$0xff]  ;;  %v4154_v1 = vpack.c.bf16 %v871_v57, %v863_v56  ;;  %v934_v56 = vld [vmem:[#allocation5 + $0x10d0] sm:$0xff] }
  0xfc   : > { %1802 = vmatmul.mubr.f32.gmra.mrb[16].mxu1 %v348_v62  ;;  %3945 = vmatpush1.bf16.msra.mxu0 %v3944_v63  ;;  %v3962_v62 = vpack.c.bf16 %v869_v53, %v861_v52  ;;  %v862_v63 = vld [vmem:[#allocation5 + $0xe90] sm:$0xff]  ;;  %v932_v52 = vld [vmem:[#allocation5 + $0x10c0] sm:$0xff]  ;;  %v309_v53 = vld [vmem:[%s5683_s25 + $0x48] sm:$0xff] }
  0xfd   : > { %4137 = vmatpush1.bf16.msra.mxu1 %v4136_v2  ;;  %1324 = vmatprep.mubr.f32.mxu0 %v355_v5  ;;  %v877_v2 = vld [vmem:[#allocation5 + $0xf08] sm:$0xff]  ;;  %v4156_v8 = vpack.c.bf16 %v870_v0, %v862_v63  ;;  %v951_v63 = vld [vmem:[#allocation5 + $0x1158] sm:$0xff] }
  0xfe   : > { %1807 = vmatprep.mubr.f32.mxu1 %v355_v5  ;;  %3947 = vmatprep.subr.bf16.mxu0 %v3946_v6  ;;  %v3964_v5 = vpack.c.bf16 %v868_v60, %v860_v59  ;;  %v879_v6 = vld [vmem:[#allocation5 + $0xf18] sm:$0xff]  ;;  %v949_v59 = vld [vmem:[#allocation5 + $0x1148] sm:$0xff]  ;;  %v308_v60 = vld [vmem:[%s5683_s25 + $0x40] sm:$0xff] }
  0xff   : > { %1325 = vmatmul.mubr.f32.gmra.mrb[18].mxu0 %v354_v12  ;;  %4139 = vmatprep.subr.bf16.mxu1 %v4138_v9  ;;  %v876_v9 = vld [vmem:[#allocation5 + $0xf00] sm:$0xff]  ;;  %v4158_v15 = vpack.c.bf16 %v887_v7, %v879_v6  ;;  %v950_v6 = vld [vmem:[#allocation5 + $0x1150] sm:$0xff] }
 0x100   : > { %1808 = vmatmul.mubr.f32.gmra.mrb[18].mxu1 %v354_v12  ;;  %3949 = vmatpush1.bf16.msra.mxu0 %v3948_v13  ;;  %v3966_v12 = vpack.c.bf16 %v885_v3, %v877_v2  ;;  %v878_v13 = vld [vmem:[#allocation5 + $0xf10] sm:$0xff]  ;;  %v948_v2 = vld [vmem:[#allocation5 + $0x1140] sm:$0xff]  ;;  %v315_v3 = vld [vmem:[%s5683_s25 + $0x78] sm:$0xff] }
 0x101   : > { %4141 = vmatpush1.bf16.msra.mxu1 %v4140_v16  ;;  %1330 = vmatprep.mubr.f32.mxu0 %v361_v19  ;;  %v893_v16 = vld [vmem:[#allocation5 + $0xf88] sm:$0xff]  ;;  %v4160_v22 = vpack.c.bf16 %v886_v14, %v878_v13  ;;  %v967_v13 = vld [vmem:[#allocation5 + $0x11d8] sm:$0xff] }
 0x102   : > { %1813 = vmatprep.mubr.f32.mxu1 %v361_v19  ;;  %3951 = vmatprep.subr.bf16.mxu0 %v3950_v20  ;;  %v3968_v19 = vpack.c.bf16 %v884_v10, %v876_v9  ;;  %v895_v20 = vld [vmem:[#allocation5 + $0xf98] sm:$0xff]  ;;  %v965_v9 = vld [vmem:[#allocation5 + $0x11c8] sm:$0xff]  ;;  %v314_v10 = vld [vmem:[%s5683_s25 + $0x70] sm:$0xff] }
 0x103   : > { %1331 = vmatmul.mubr.f32.gmra.mrb[20].mxu0 %v360_v26  ;;  %4143 = vmatprep.subr.bf16.mxu1 %v4142_v23  ;;  %v892_v23 = vld [vmem:[#allocation5 + $0xf80] sm:$0xff]  ;;  %v4162_v29 = vpack.c.bf16 %v903_v21, %v895_v20  ;;  %v966_v20 = vld [vmem:[#allocation5 + $0x11d0] sm:$0xff] }
 0x104   : > { %1814 = vmatmul.mubr.f32.gmra.mrb[20].mxu1 %v360_v26  ;;  %3953 = vmatpush1.bf16.msra.mxu0 %v3952_v27  ;;  %v3970_v26 = vpack.c.bf16 %v901_v17, %v893_v16  ;;  %v894_v27 = vld [vmem:[#allocation5 + $0xf90] sm:$0xff]  ;;  %v964_v16 = vld [vmem:[#allocation5 + $0x11c0] sm:$0xff]  ;;  %v321_v17 = vld [vmem:[%s5683_s25 + $0xa8] sm:$0xff] }
 0x105   : > { %4145 = vmatpush1.bf16.msra.mxu1 %v4144_v30  ;;  %1336 = vmatprep.mubr.f32.mxu0 %v367_v33  ;;  %v909_v30 = vld [vmem:[#allocation5 + $0x1008] sm:$0xff]  ;;  %v4164_v36 = vpack.c.bf16 %v902_v28, %v894_v27  ;;  %v983_v27 = vld [vmem:[#allocation5 + $0x1258] sm:$0xff] }
 0x106   : > { %1819 = vmatprep.mubr.f32.mxu1 %v367_v33  ;;  %3955 = vmatprep.subr.bf16.mxu0 %v3954_v34  ;;  %v3972_v33 = vpack.c.bf16 %v900_v24, %v892_v23  ;;  %v911_v34 = vld [vmem:[#allocation5 + $0x1018] sm:$0xff]  ;;  %v981_v23 = vld [vmem:[#allocation5 + $0x1248] sm:$0xff]  ;;  %v320_v24 = vld [vmem:[%s5683_s25 + $0xa0] sm:$0xff] }
 0x107   : > { %1337 = vmatmul.mubr.f32.gmra.mrb[22].mxu0 %v366_v40  ;;  %4147 = vmatprep.subr.bf16.mxu1 %v4146_v37  ;;  %v908_v37 = vld [vmem:[#allocation5 + $0x1000] sm:$0xff]  ;;  %v4166_v43 = vpack.c.bf16 %v919_v35, %v911_v34  ;;  %v982_v34 = vld [vmem:[#allocation5 + $0x1250] sm:$0xff] }
 0x108   : > { %1820 = vmatmul.mubr.f32.gmra.mrb[22].mxu1 %v366_v40  ;;  %3957 = vmatpush1.bf16.msra.mxu0 %v3956_v41  ;;  %v3974_v40 = vpack.c.bf16 %v917_v31, %v909_v30  ;;  %v910_v41 = vld [vmem:[#allocation5 + $0x1010] sm:$0xff]  ;;  %v980_v30 = vld [vmem:[#allocation5 + $0x1240] sm:$0xff]  ;;  %v327_v31 = vld [vmem:[%s5683_s25 + $0xd8] sm:$0xff] }
 0x109   : > { %4149 = vmatpush1.bf16.msra.mxu1 %v4148_v44  ;;  %1342 = vmatprep.mubr.f32.mxu0 %v373_v47  ;;  %v925_v44 = vld [vmem:[#allocation5 + $0x1088] sm:$0xff]  ;;  %v4168_v50 = vpack.c.bf16 %v918_v42, %v910_v41  ;;  %v999_v41 = vld [vmem:[#allocation5 + $0x12d8] sm:$0xff] }
 0x10a   : > { %1825 = vmatprep.mubr.f32.mxu1 %v373_v47  ;;  %3959 = vmatprep.subr.bf16.mxu0 %v3958_v48  ;;  %v3976_v47 = vpack.c.bf16 %v916_v38, %v908_v37  ;;  %v927_v48 = vld [vmem:[#allocation5 + $0x1098] sm:$0xff]  ;;  %v997_v37 = vld [vmem:[#allocation5 + $0x12c8] sm:$0xff]  ;;  %v326_v38 = vld [vmem:[%s5683_s25 + $0xd0] sm:$0xff] }
 0x10b   : > { %1343 = vmatmul.mubr.f32.gmra.mrb[24].mxu0 %v372_v54  ;;  %4151 = vmatprep.subr.bf16.mxu1 %v4150_v51  ;;  %v924_v51 = vld [vmem:[#allocation5 + $0x1080] sm:$0xff]  ;;  %v4170_v57 = vpack.c.bf16 %v935_v49, %v927_v48  ;;  %v998_v48 = vld [vmem:[#allocation5 + $0x12d0] sm:$0xff] }
 0x10c   : > { %1826 = vmatmul.mubr.f32.gmra.mrb[24].mxu1 %v372_v54  ;;  %3961 = vmatpush1.bf16.msra.mxu0 %v3960_v55  ;;  %v3978_v54 = vpack.c.bf16 %v933_v45, %v925_v44  ;;  %v926_v55 = vld [vmem:[#allocation5 + $0x1090] sm:$0xff]  ;;  %v996_v44 = vld [vmem:[#allocation5 + $0x12c0] sm:$0xff]  ;;  %v333_v45 = vld [vmem:[%s5683_s25 + $0x108] sm:$0xff] }
 0x10d   : > { %4153 = vmatpush1.bf16.msra.mxu1 %v4152_v58  ;;  %1348 = vmatprep.mubr.f32.mxu0 %v379_v61  ;;  %v941_v58 = vld [vmem:[#allocation5 + $0x1108] sm:$0xff]  ;;  %v4172_v0 = vpack.c.bf16 %v934_v56, %v926_v55  ;;  %v1015_v55 = vld [vmem:[#allocation5 + $0x1358] sm:$0xff] }
 0x10e   : > { %1831 = vmatprep.mubr.f32.mxu1 %v379_v61  ;;  %3963 = vmatprep.subr.bf16.mxu0 %v3962_v62  ;;  %v3980_v61 = vpack.c.bf16 %v932_v52, %v924_v51  ;;  %v943_v62 = vld [vmem:[#allocation5 + $0x1118] sm:$0xff]  ;;  %v1013_v51 = vld [vmem:[#allocation5 + $0x1348] sm:$0xff]  ;;  %v332_v52 = vld [vmem:[%s5683_s25 + $0x100] sm:$0xff] }
 0x10f   : > { %1349 = vmatmul.mubr.f32.gmra.mrb[26].mxu0 %v378_v4  ;;  %4155 = vmatprep.subr.bf16.mxu1 %v4154_v1  ;;  %v940_v1 = vld [vmem:[#allocation5 + $0x1100] sm:$0xff]  ;;  %v4174_v7 = vpack.c.bf16 %v951_v63, %v943_v62  ;;  %v1014_v62 = vld [vmem:[#allocation5 + $0x1350] sm:$0xff] }
 0x110   : > { %1832 = vmatmul.mubr.f32.gmra.mrb[26].mxu1 %v378_v4  ;;  %3965 = vmatpush1.bf16.msra.mxu0 %v3964_v5  ;;  %v3982_v4 = vpack.c.bf16 %v949_v59, %v941_v58  ;;  %v942_v5 = vld [vmem:[#allocation5 + $0x1110] sm:$0xff]  ;;  %v1012_v58 = vld [vmem:[#allocation5 + $0x1340] sm:$0xff]  ;;  %v339_v59 = vld [vmem:[%s5683_s25 + $0x138] sm:$0xff] }
 0x111   : > { %4157 = vmatpush1.bf16.msra.mxu1 %v4156_v8  ;;  %1354 = vmatprep.mubr.f32.mxu0 %v385_v11  ;;  %v957_v8 = vld [vmem:[#allocation5 + $0x1188] sm:$0xff]  ;;  %v4176_v14 = vpack.c.bf16 %v950_v6, %v942_v5  ;;  %v1031_v5 = vld [vmem:[#allocation5 + $0x13d8] sm:$0xff] }
 0x112   : > { %1837 = vmatprep.mubr.f32.mxu1 %v385_v11  ;;  %3967 = vmatprep.subr.bf16.mxu0 %v3966_v12  ;;  %v3984_v11 = vpack.c.bf16 %v948_v2, %v940_v1  ;;  %v959_v12 = vld [vmem:[#allocation5 + $0x1198] sm:$0xff]  ;;  %v1029_v1 = vld [vmem:[#allocation5 + $0x13c8] sm:$0xff]  ;;  %v338_v2 = vld [vmem:[%s5683_s25 + $0x130] sm:$0xff] }
 0x113   : > { %1355 = vmatmul.mubr.f32.gmra.mrb[28].mxu0 %v384_v18  ;;  %4159 = vmatprep.subr.bf16.mxu1 %v4158_v15  ;;  %v956_v15 = vld [vmem:[#allocation5 + $0x1180] sm:$0xff]  ;;  %v4178_v21 = vpack.c.bf16 %v967_v13, %v959_v12  ;;  %v1030_v12 = vld [vmem:[#allocation5 + $0x13d0] sm:$0xff] }
 0x114   : > { %1838 = vmatmul.mubr.f32.gmra.mrb[28].mxu1 %v384_v18  ;;  %3969 = vmatpush1.bf16.msra.mxu0 %v3968_v19  ;;  %v3986_v18 = vpack.c.bf16 %v965_v9, %v957_v8  ;;  %v958_v19 = vld [vmem:[#allocation5 + $0x1190] sm:$0xff]  ;;  %v1028_v8 = vld [vmem:[#allocation5 + $0x13c0] sm:$0xff]  ;;  %v345_v9 = vld [vmem:[%s5683_s25 + $0x168] sm:$0xff] }
 0x115   : > { %4161 = vmatpush1.bf16.msra.mxu1 %v4160_v22  ;;  %1360 = vmatprep.mubr.f32.mxu0 %v391_v25  ;;  %v973_v22 = vld [vmem:[#allocation5 + $0x1208] sm:$0xff]  ;;  %v4180_v28 = vpack.c.bf16 %v966_v20, %v958_v19  ;;  %v1047_v19 = vld [vmem:[#allocation5 + $0x1458] sm:$0xff] }
 0x116   : > { %1843 = vmatprep.mubr.f32.mxu1 %v391_v25  ;;  %3971 = vmatprep.subr.bf16.mxu0 %v3970_v26  ;;  %v3988_v25 = vpack.c.bf16 %v964_v16, %v956_v15  ;;  %v975_v26 = vld [vmem:[#allocation5 + $0x1218] sm:$0xff]  ;;  %v1045_v15 = vld [vmem:[#allocation5 + $0x1448] sm:$0xff]  ;;  %v344_v16 = vld [vmem:[%s5683_s25 + $0x160] sm:$0xff] }
 0x117   : > { %1361 = vmatmul.mubr.f32.gmra.mrb[30].mxu0 %v390_v32  ;;  %4163 = vmatprep.subr.bf16.mxu1 %v4162_v29  ;;  %v972_v29 = vld [vmem:[#allocation5 + $0x1200] sm:$0xff]  ;;  %v4182_v35 = vpack.c.bf16 %v983_v27, %v975_v26  ;;  %v1046_v26 = vld [vmem:[#allocation5 + $0x1450] sm:$0xff] }
 0x118   : > { %1844 = vmatmul.mubr.f32.gmra.mrb[30].mxu1 %v390_v32  ;;  %3973 = vmatpush1.bf16.msra.mxu0 %v3972_v33  ;;  %v3990_v32 = vpack.c.bf16 %v981_v23, %v973_v22  ;;  %v974_v33 = vld [vmem:[#allocation5 + $0x1210] sm:$0xff]  ;;  %v1044_v22 = vld [vmem:[#allocation5 + $0x1440] sm:$0xff]  ;;  %v351_v23 = vld [vmem:[%s5683_s25 + $0x198] sm:$0xff] }
 0x119   : > { %4165 = vmatpush1.bf16.msra.mxu1 %v4164_v36  ;;  %1431 = vmatprep.mubr.f32.mxu0 %v303_v39  ;;  %v989_v36 = vld [vmem:[#allocation5 + $0x1288] sm:$0xff]  ;;  %v4184_v42 = vpack.c.bf16 %v982_v34, %v974_v33  ;;  %v1063_v33 = vld [vmem:[#allocation5 + $0x14d8] sm:$0xff] }
 0x11a   : > { %1914 = vmatprep.mubr.f32.mxu1 %v303_v39  ;;  %3975 = vmatprep.subr.bf16.mxu0 %v3974_v40  ;;  %v3992_v39 = vpack.c.bf16 %v980_v30, %v972_v29  ;;  %v991_v40 = vld [vmem:[#allocation5 + $0x1298] sm:$0xff]  ;;  %v1061_v29 = vld [vmem:[#allocation5 + $0x14c8] sm:$0xff]  ;;  %v350_v30 = vld [vmem:[%s5683_s25 + $0x190] sm:$0xff] }
 0x11b   : > { %1432 = vmatmul.mubr.f32.vlgmr.msra.gmra.mrb[0].mxu0 %v302_v46  ;;  %4167 = vmatprep.subr.bf16.mxu1 %v4166_v43  ;;  %v988_v43 = vld [vmem:[#allocation5 + $0x1280] sm:$0xff]  ;;  %v4186_v49 = vpack.c.bf16 %v999_v41, %v991_v40  ;;  %v1062_v40 = vld [vmem:[#allocation5 + $0x14d0] sm:$0xff] }
 0x11c   : > { %1915 = vmatmul.mubr.f32.vlgmr.msra.gmra.mrb[0].mxu1 %v302_v46  ;;  %3977 = vmatpush1.bf16.msra.mxu0 %v3976_v47  ;;  %v3994_v46 = vpack.c.bf16 %v997_v37, %v989_v36  ;;  %v990_v47 = vld [vmem:[#allocation5 + $0x1290] sm:$0xff]  ;;  %v1060_v36 = vld [vmem:[#allocation5 + $0x14c0] sm:$0xff]  ;;  %v357_v37 = vld [vmem:[%s5683_s25 + $0x1c8] sm:$0xff] }
 0x11d   : > { %4169 = vmatpush1.bf16.msra.mxu1 %v4168_v50  ;;  %1437 = vmatprep.mubr.f32.mxu0 %v309_v53  ;;  %v1005_v50 = vld [vmem:[#allocation5 + $0x1308] sm:$0xff]  ;;  %v4188_v56 = vpack.c.bf16 %v998_v48, %v990_v47  ;;  %v1079_v47 = vld [vmem:[#allocation5 + $0x1558] sm:$0xff] }
 0x11e   : > { %1920 = vmatprep.mubr.f32.mxu1 %v309_v53  ;;  %3979 = vmatprep.subr.bf16.mxu0 %v3978_v54  ;;  %v3996_v53 = vpack.c.bf16 %v996_v44, %v988_v43  ;;  %v1007_v54 = vld [vmem:[#allocation5 + $0x1318] sm:$0xff]  ;;  %v1077_v43 = vld [vmem:[#allocation5 + $0x1548] sm:$0xff]  ;;  %v356_v44 = vld [vmem:[%s5683_s25 + $0x1c0] sm:$0xff] }
 0x11f   : > { %1438 = vmatmul.mubr.f32.gmra.mrb[2].mxu0 %v308_v60  ;;  %4171 = vmatprep.subr.bf16.mxu1 %v4170_v57  ;;  %v1004_v57 = vld [vmem:[#allocation5 + $0x1300] sm:$0xff]  ;;  %v4190_v63 = vpack.c.bf16 %v1015_v55, %v1007_v54  ;;  %v1078_v54 = vld [vmem:[#allocation5 + $0x1550] sm:$0xff] }
 0x120   : > { %1921 = vmatmul.mubr.f32.gmra.mrb[2].mxu1 %v308_v60  ;;  %3981 = vmatpush1.bf16.msra.mxu0 %v3980_v61  ;;  %v3998_v60 = vpack.c.bf16 %v1013_v51, %v1005_v50  ;;  %v1006_v61 = vld [vmem:[#allocation5 + $0x1310] sm:$0xff]  ;;  %v1076_v50 = vld [vmem:[#allocation5 + $0x1540] sm:$0xff]  ;;  %v363_v51 = vld [vmem:[%s5683_s25 + $0x1f8] sm:$0xff] }
 0x121   : > { %4173 = vmatpush1.bf16.msra.mxu1 %v4172_v0  ;;  %1443 = vmatprep.mubr.f32.mxu0 %v315_v3  ;;  %v1021_v0 = vld [vmem:[#allocation5 + $0x1388] sm:$0xff]  ;;  %v4192_v6 = vpack.c.bf16 %v1014_v62, %v1006_v61  ;;  %v1095_v61 = vld [vmem:[#allocation5 + $0x15d8] sm:$0xff] }
 0x122   : > { %1926 = vmatprep.mubr.f32.mxu1 %v315_v3  ;;  %3983 = vmatprep.subr.bf16.mxu0 %v3982_v4  ;;  %v4000_v3 = vpack.c.bf16 %v1012_v58, %v1004_v57  ;;  %v1023_v4 = vld [vmem:[#allocation5 + $0x1398] sm:$0xff]  ;;  %v1093_v57 = vld [vmem:[#allocation5 + $0x15c8] sm:$0xff]  ;;  %v362_v58 = vld [vmem:[%s5683_s25 + $0x1f0] sm:$0xff] }
 0x123   : > { %1444 = vmatmul.mubr.f32.gmra.mrb[4].mxu0 %v314_v10  ;;  %4175 = vmatprep.subr.bf16.mxu1 %v4174_v7  ;;  %v1020_v7 = vld [vmem:[#allocation5 + $0x1380] sm:$0xff]  ;;  %v4194_v13 = vpack.c.bf16 %v1031_v5, %v1023_v4  ;;  %v1094_v4 = vld [vmem:[#allocation5 + $0x15d0] sm:$0xff] }
 0x124   : > { %1927 = vmatmul.mubr.f32.gmra.mrb[4].mxu1 %v314_v10  ;;  %3985 = vmatpush1.bf16.msra.mxu0 %v3984_v11  ;;  %v4002_v10 = vpack.c.bf16 %v1029_v1, %v1021_v0  ;;  %v1022_v11 = vld [vmem:[#allocation5 + $0x1390] sm:$0xff]  ;;  %v1092_v0 = vld [vmem:[#allocation5 + $0x15c0] sm:$0xff]  ;;  %v369_v1 = vld [vmem:[%s5683_s25 + $0x228] sm:$0xff] }
 0x125   : > { %4177 = vmatpush1.bf16.msra.mxu1 %v4176_v14  ;;  %1449 = vmatprep.mubr.f32.mxu0 %v321_v17  ;;  %v1037_v14 = vld [vmem:[#allocation5 + $0x1408] sm:$0xff]  ;;  %v4196_v20 = vpack.c.bf16 %v1030_v12, %v1022_v11  ;;  %v1111_v11 = vld [vmem:[#allocation5 + $0x1658] sm:$0xff] }
 0x126   : > { %1932 = vmatprep.mubr.f32.mxu1 %v321_v17  ;;  %3987 = vmatprep.subr.bf16.mxu0 %v3986_v18  ;;  %v4004_v17 = vpack.c.bf16 %v1028_v8, %v1020_v7  ;;  %v1039_v18 = vld [vmem:[#allocation5 + $0x1418] sm:$0xff]  ;;  %v1109_v7 = vld [vmem:[#allocation5 + $0x1648] sm:$0xff]  ;;  %v368_v8 = vld [vmem:[%s5683_s25 + $0x220] sm:$0xff] }
 0x127   : > { %1450 = vmatmul.mubr.f32.gmra.mrb[6].mxu0 %v320_v24  ;;  %4179 = vmatprep.subr.bf16.mxu1 %v4178_v21  ;;  %v1036_v21 = vld [vmem:[#allocation5 + $0x1400] sm:$0xff]  ;;  %v4198_v27 = vpack.c.bf16 %v1047_v19, %v1039_v18  ;;  %v1110_v18 = vld [vmem:[#allocation5 + $0x1650] sm:$0xff] }
 0x128   : > { %1933 = vmatmul.mubr.f32.gmra.mrb[6].mxu1 %v320_v24  ;;  %3989 = vmatpush1.bf16.msra.mxu0 %v3988_v25  ;;  %v4006_v24 = vpack.c.bf16 %v1045_v15, %v1037_v14  ;;  %v1038_v25 = vld [vmem:[#allocation5 + $0x1410] sm:$0xff]  ;;  %v1108_v14 = vld [vmem:[#allocation5 + $0x1640] sm:$0xff]  ;;  %v375_v15 = vld [vmem:[%s5683_s25 + $0x258] sm:$0xff] }
 0x129   : > { %4181 = vmatpush1.bf16.msra.mxu1 %v4180_v28  ;;  %1455 = vmatprep.mubr.f32.mxu0 %v327_v31  ;;  %v1053_v28 = vld [vmem:[#allocation5 + $0x1488] sm:$0xff]  ;;  %v4200_v34 = vpack.c.bf16 %v1046_v26, %v1038_v25  ;;  %v1127_v25 = vld [vmem:[#allocation5 + $0x16d8] sm:$0xff] }
 0x12a   : > { %1938 = vmatprep.mubr.f32.mxu1 %v327_v31  ;;  %3991 = vmatprep.subr.bf16.mxu0 %v3990_v32  ;;  %v4008_v31 = vpack.c.bf16 %v1044_v22, %v1036_v21  ;;  %v1055_v32 = vld [vmem:[#allocation5 + $0x1498] sm:$0xff]  ;;  %v1125_v21 = vld [vmem:[#allocation5 + $0x16c8] sm:$0xff]  ;;  %v374_v22 = vld [vmem:[%s5683_s25 + $0x250] sm:$0xff] }
 0x12b   : > { %1456 = vmatmul.mubr.f32.gmra.mrb[8].mxu0 %v326_v38  ;;  %4183 = vmatprep.subr.bf16.mxu1 %v4182_v35  ;;  %v1052_v35 = vld [vmem:[#allocation5 + $0x1480] sm:$0xff]  ;;  %v4202_v41 = vpack.c.bf16 %v1063_v33, %v1055_v32  ;;  %v1126_v32 = vld [vmem:[#allocation5 + $0x16d0] sm:$0xff] }
 0x12c   : > { %1939 = vmatmul.mubr.f32.gmra.mrb[8].mxu1 %v326_v38  ;;  %3993 = vmatpush1.bf16.msra.mxu0 %v3992_v39  ;;  %v4010_v38 = vpack.c.bf16 %v1061_v29, %v1053_v28  ;;  %v1054_v39 = vld [vmem:[#allocation5 + $0x1490] sm:$0xff]  ;;  %v1124_v28 = vld [vmem:[#allocation5 + $0x16c0] sm:$0xff]  ;;  %v381_v29 = vld [vmem:[%s5683_s25 + $0x288] sm:$0xff] }
 0x12d   : > { %4185 = vmatpush1.bf16.msra.mxu1 %v4184_v42  ;;  %1461 = vmatprep.mubr.f32.mxu0 %v333_v45  ;;  %v1069_v42 = vld [vmem:[#allocation5 + $0x1508] sm:$0xff]  ;;  %v4204_v48 = vpack.c.bf16 %v1062_v40, %v1054_v39  ;;  %v1143_v39 = vld [vmem:[#allocation5 + $0x1758] sm:$0xff] }
 0x12e   : > { %1944 = vmatprep.mubr.f32.mxu1 %v333_v45  ;;  %3995 = vmatprep.subr.bf16.mxu0 %v3994_v46  ;;  %v4012_v45 = vpack.c.bf16 %v1060_v36, %v1052_v35  ;;  %v1071_v46 = vld [vmem:[#allocation5 + $0x1518] sm:$0xff]  ;;  %v1141_v35 = vld [vmem:[#allocation5 + $0x1748] sm:$0xff]  ;;  %v380_v36 = vld [vmem:[%s5683_s25 + $0x280] sm:$0xff] }
 0x12f   : > { %1462 = vmatmul.mubr.f32.gmra.mrb[10].mxu0 %v332_v52  ;;  %4187 = vmatprep.subr.bf16.mxu1 %v4186_v49  ;;  %v1068_v49 = vld [vmem:[#allocation5 + $0x1500] sm:$0xff]  ;;  %v4206_v55 = vpack.c.bf16 %v1079_v47, %v1071_v46  ;;  %v1142_v46 = vld [vmem:[#allocation5 + $0x1750] sm:$0xff] }
 0x130   : > { %1945 = vmatmul.mubr.f32.gmra.mrb[10].mxu1 %v332_v52  ;;  %3997 = vmatpush1.bf16.msra.mxu0 %v3996_v53  ;;  %v4014_v52 = vpack.c.bf16 %v1077_v43, %v1069_v42  ;;  %v1070_v53 = vld [vmem:[#allocation5 + $0x1510] sm:$0xff]  ;;  %v1140_v42 = vld [vmem:[#allocation5 + $0x1740] sm:$0xff]  ;;  %v387_v43 = vld [vmem:[%s5683_s25 + $0x2b8] sm:$0xff] }
 0x131   : > { %4189 = vmatpush1.bf16.msra.mxu1 %v4188_v56  ;;  %1467 = vmatprep.mubr.f32.mxu0 %v339_v59  ;;  %v1085_v56 = vld [vmem:[#allocation5 + $0x1588] sm:$0xff]  ;;  %v4208_v62 = vpack.c.bf16 %v1078_v54, %v1070_v53  ;;  %v1159_v53 = vld [vmem:[#allocation5 + $0x17d8] sm:$0xff] }
 0x132   : > { %1950 = vmatprep.mubr.f32.mxu1 %v339_v59  ;;  %3999 = vmatprep.subr.bf16.mxu0 %v3998_v60  ;;  %v4016_v59 = vpack.c.bf16 %v1076_v50, %v1068_v49  ;;  %v1087_v60 = vld [vmem:[#allocation5 + $0x1598] sm:$0xff]  ;;  %v1157_v49 = vld [vmem:[#allocation5 + $0x17c8] sm:$0xff]  ;;  %v386_v50 = vld [vmem:[%s5683_s25 + $0x2b0] sm:$0xff] }
 0x133   : > { %1468 = vmatmul.mubr.f32.gmra.mrb[12].mxu0 %v338_v2  ;;  %4191 = vmatprep.subr.bf16.mxu1 %v4190_v63  ;;  %v1084_v63 = vld [vmem:[#allocation5 + $0x1580] sm:$0xff]  ;;  %v4210_v5 = vpack.c.bf16 %v1095_v61, %v1087_v60  ;;  %v1158_v60 = vld [vmem:[#allocation5 + $0x17d0] sm:$0xff] }
 0x134   : > { %1951 = vmatmul.mubr.f32.gmra.mrb[12].mxu1 %v338_v2  ;;  %4001 = vmatpush1.bf16.msra.mxu0 %v4000_v3  ;;  %v4018_v2 = vpack.c.bf16 %v1093_v57, %v1085_v56  ;;  %v1086_v3 = vld [vmem:[#allocation5 + $0x1590] sm:$0xff]  ;;  %v1156_v56 = vld [vmem:[#allocation5 + $0x17c0] sm:$0xff]  ;;  %v393_v57 = vld [vmem:[%s5683_s25 + $0x2e8] sm:$0xff] }
 0x135   : > { %4193 = vmatpush1.bf16.msra.mxu1 %v4192_v6  ;;  %1473 = vmatprep.mubr.f32.mxu0 %v345_v9  ;;  %v1101_v6 = vld [vmem:[#allocation5 + $0x1608] sm:$0xff]  ;;  %v4212_v12 = vpack.c.bf16 %v1094_v4, %v1086_v3  ;;  %v411_v3 = vld [vmem:[#allocation5 + $0x78] sm:$0xff] }
 0x136   : > { %1956 = vmatprep.mubr.f32.mxu1 %v345_v9  ;;  %4003 = vmatprep.subr.bf16.mxu0 %v4002_v10  ;;  %v4020_v9 = vpack.c.bf16 %v1092_v0, %v1084_v63  ;;  %v1103_v10 = vld [vmem:[#allocation5 + $0x1618] sm:$0xff]  ;;  %v409_v63 = vld [vmem:[#allocation5 + $0x68] sm:$0xff]  ;;  %v392_v0 = vld [vmem:[%s5683_s25 + $0x2e0] sm:$0xff] }
 0x137   : > { %1474 = vmatmul.mubr.f32.gmra.mrb[14].mxu0 %v344_v16  ;;  %4195 = vmatprep.subr.bf16.mxu1 %v4194_v13  ;;  %v1100_v13 = vld [vmem:[#allocation5 + $0x1600] sm:$0xff]  ;;  %v4214_v19 = vpack.c.bf16 %v1111_v11, %v1103_v10  ;;  %v410_v10 = vld [vmem:[#allocation5 + $0x70] sm:$0xff] }
 0x138   : > { %1957 = vmatmul.mubr.f32.gmra.mrb[14].mxu1 %v344_v16  ;;  %4005 = vmatpush1.bf16.msra.mxu0 %v4004_v17  ;;  %v4022_v16 = vpack.c.bf16 %v1109_v7, %v1101_v6  ;;  %v1102_v17 = vld [vmem:[#allocation5 + $0x1610] sm:$0xff]  ;;  %v408_v6 = vld [vmem:[#allocation5 + $0x60] sm:$0xff]  ;;  %v305_v7 = vld [vmem:[%s5683_s25 + $0x28] sm:$0xff] }
 0x139   : > { %4197 = vmatpush1.bf16.msra.mxu1 %v4196_v20  ;;  %1479 = vmatprep.mubr.f32.mxu0 %v351_v23  ;;  %v1117_v20 = vld [vmem:[#allocation5 + $0x1688] sm:$0xff]  ;;  %v4216_v26 = vpack.c.bf16 %v1110_v18, %v1102_v17  ;;  %v427_v17 = vld [vmem:[#allocation5 + $0xf8] sm:$0xff] }
 0x13a   : > { %1962 = vmatprep.mubr.f32.mxu1 %v351_v23  ;;  %4007 = vmatprep.subr.bf16.mxu0 %v4006_v24  ;;  %v4024_v23 = vpack.c.bf16 %v1108_v14, %v1100_v13  ;;  %v1119_v24 = vld [vmem:[#allocation5 + $0x1698] sm:$0xff]  ;;  %v425_v13 = vld [vmem:[#allocation5 + $0xe8] sm:$0xff]  ;;  %v304_v14 = vld [vmem:[%s5683_s25 + $0x20] sm:$0xff] }
 0x13b   : > { %1480 = vmatmul.mubr.f32.gmra.mrb[16].mxu0 %v350_v30  ;;  %4199 = vmatprep.subr.bf16.mxu1 %v4198_v27  ;;  %v1116_v27 = vld [vmem:[#allocation5 + $0x1680] sm:$0xff]  ;;  %v4218_v33 = vpack.c.bf16 %v1127_v25, %v1119_v24  ;;  %v426_v24 = vld [vmem:[#allocation5 + $0xf0] sm:$0xff] }
 0x13c   : > { %1963 = vmatmul.mubr.f32.gmra.mrb[16].mxu1 %v350_v30  ;;  %4009 = vmatpush1.bf16.msra.mxu0 %v4008_v31  ;;  %v4026_v30 = vpack.c.bf16 %v1125_v21, %v1117_v20  ;;  %v1118_v31 = vld [vmem:[#allocation5 + $0x1690] sm:$0xff]  ;;  %v424_v20 = vld [vmem:[#allocation5 + $0xe0] sm:$0xff]  ;;  %v311_v21 = vld [vmem:[%s5683_s25 + $0x58] sm:$0xff] }
 0x13d   : > { %4201 = vmatpush1.bf16.msra.mxu1 %v4200_v34  ;;  %1485 = vmatprep.mubr.f32.mxu0 %v357_v37  ;;  %v1133_v34 = vld [vmem:[#allocation5 + $0x1708] sm:$0xff]  ;;  %v4220_v40 = vpack.c.bf16 %v1126_v32, %v1118_v31  ;;  %v443_v31 = vld [vmem:[#allocation5 + $0x178] sm:$0xff] }
 0x13e   : > { %1968 = vmatprep.mubr.f32.mxu1 %v357_v37  ;;  %4011 = vmatprep.subr.bf16.mxu0 %v4010_v38  ;;  %v4028_v37 = vpack.c.bf16 %v1124_v28, %v1116_v27  ;;  %v1135_v38 = vld [vmem:[#allocation5 + $0x1718] sm:$0xff]  ;;  %v441_v27 = vld [vmem:[#allocation5 + $0x168] sm:$0xff]  ;;  %v310_v28 = vld [vmem:[%s5683_s25 + $0x50] sm:$0xff] }
 0x13f   : > { %1486 = vmatmul.mubr.f32.gmra.mrb[18].mxu0 %v356_v44  ;;  %4203 = vmatprep.subr.bf16.mxu1 %v4202_v41  ;;  %v1132_v41 = vld [vmem:[#allocation5 + $0x1700] sm:$0xff]  ;;  %v4222_v47 = vpack.c.bf16 %v1143_v39, %v1135_v38  ;;  %v442_v38 = vld [vmem:[#allocation5 + $0x170] sm:$0xff] }
 0x140   : > { %1969 = vmatmul.mubr.f32.gmra.mrb[18].mxu1 %v356_v44  ;;  %4013 = vmatpush1.bf16.msra.mxu0 %v4012_v45  ;;  %v4030_v44 = vpack.c.bf16 %v1141_v35, %v1133_v34  ;;  %v1134_v45 = vld [vmem:[#allocation5 + $0x1710] sm:$0xff]  ;;  %v440_v34 = vld [vmem:[#allocation5 + $0x160] sm:$0xff]  ;;  %v317_v35 = vld [vmem:[%s5683_s25 + $0x88] sm:$0xff] }
 0x141   : > { %4205 = vmatpush1.bf16.msra.mxu1 %v4204_v48  ;;  %1491 = vmatprep.mubr.f32.mxu0 %v363_v51  ;;  %v1149_v48 = vld [vmem:[#allocation5 + $0x1788] sm:$0xff]  ;;  %v4224_v54 = vpack.c.bf16 %v1142_v46, %v1134_v45  ;;  %v459_v45 = vld [vmem:[#allocation5 + $0x1f8] sm:$0xff] }
 0x142   : > { %1974 = vmatprep.mubr.f32.mxu1 %v363_v51  ;;  %4015 = vmatprep.subr.bf16.mxu0 %v4014_v52  ;;  %v4032_v51 = vpack.c.bf16 %v1140_v42, %v1132_v41  ;;  %v1151_v52 = vld [vmem:[#allocation5 + $0x1798] sm:$0xff]  ;;  %v457_v41 = vld [vmem:[#allocation5 + $0x1e8] sm:$0xff]  ;;  %v316_v42 = vld [vmem:[%s5683_s25 + $0x80] sm:$0xff] }
 0x143   : > { %1492 = vmatmul.mubr.f32.gmra.mrb[20].mxu0 %v362_v58  ;;  %4207 = vmatprep.subr.bf16.mxu1 %v4206_v55  ;;  %v1148_v55 = vld [vmem:[#allocation5 + $0x1780] sm:$0xff]  ;;  %v4226_v61 = vpack.c.bf16 %v1159_v53, %v1151_v52  ;;  %v458_v52 = vld [vmem:[#allocation5 + $0x1f0] sm:$0xff] }
 0x144   : > { %1975 = vmatmul.mubr.f32.gmra.mrb[20].mxu1 %v362_v58  ;;  %4017 = vmatpush1.bf16.msra.mxu0 %v4016_v59  ;;  %v4034_v58 = vpack.c.bf16 %v1157_v49, %v1149_v48  ;;  %v1150_v59 = vld [vmem:[#allocation5 + $0x1790] sm:$0xff]  ;;  %v456_v48 = vld [vmem:[#allocation5 + $0x1e0] sm:$0xff]  ;;  %v323_v49 = vld [vmem:[%s5683_s25 + $0xb8] sm:$0xff] }
 0x145   : > { %4209 = vmatpush1.bf16.msra.mxu1 %v4208_v62  ;;  %1497 = vmatprep.mubr.f32.mxu0 %v369_v1  ;;  %v401_v62 = vld [vmem:[#allocation5 + $0x28] sm:$0xff]  ;;  %v4228_v4 = vpack.c.bf16 %v1158_v60, %v1150_v59  ;;  %v475_v59 = vld [vmem:[#allocation5 + $0x278] sm:$0xff] }
 0x146   : > { %1980 = vmatprep.mubr.f32.mxu1 %v369_v1  ;;  %4019 = vmatprep.subr.bf16.mxu0 %v4018_v2  ;;  %v4036_v1 = vpack.c.bf16 %v1156_v56, %v1148_v55  ;;  %v403_v2 = vld [vmem:[#allocation5 + $0x38] sm:$0xff]  ;;  %v473_v55 = vld [vmem:[#allocation5 + $0x268] sm:$0xff]  ;;  %v322_v56 = vld [vmem:[%s5683_s25 + $0xb0] sm:$0xff] }
 0x147   : > { %1498 = vmatmul.mubr.f32.gmra.mrb[22].mxu0 %v368_v8  ;;  %4211 = vmatprep.subr.bf16.mxu1 %v4210_v5  ;;  %v400_v5 = vld [vmem:[#allocation5 + $0x20] sm:$0xff]  ;;  %v4422_v11 = vpack.c.bf16 %v411_v3, %v403_v2  ;;  %v474_v2 = vld [vmem:[#allocation5 + $0x270] sm:$0xff] }
 0x148   : > { %1981 = vmatmul.mubr.f32.gmra.mrb[22].mxu1 %v368_v8  ;;  %4021 = vmatpush1.bf16.msra.mxu0 %v4020_v9  ;;  %v4230_v8 = vpack.c.bf16 %v409_v63, %v401_v62  ;;  %v402_v9 = vld [vmem:[#allocation5 + $0x30] sm:$0xff]  ;;  %v472_v62 = vld [vmem:[#allocation5 + $0x260] sm:$0xff]  ;;  %v329_v63 = vld [vmem:[%s5683_s25 + $0xe8] sm:$0xff] }
 0x149   : > { %4213 = vmatpush1.bf16.msra.mxu1 %v4212_v12  ;;  %1503 = vmatprep.mubr.f32.mxu0 %v375_v15  ;;  %v417_v12 = vld [vmem:[#allocation5 + $0xa8] sm:$0xff]  ;;  %v4424_v18 = vpack.c.bf16 %v410_v10, %v402_v9  ;;  %v491_v9 = vld [vmem:[#allocation5 + $0x2f8] sm:$0xff] }
 0x14a   : > { %1986 = vmatprep.mubr.f32.mxu1 %v375_v15  ;;  %4023 = vmatprep.subr.bf16.mxu0 %v4022_v16  ;;  %v4232_v15 = vpack.c.bf16 %v408_v6, %v400_v5  ;;  %v419_v16 = vld [vmem:[#allocation5 + $0xb8] sm:$0xff]  ;;  %v489_v5 = vld [vmem:[#allocation5 + $0x2e8] sm:$0xff]  ;;  %v328_v6 = vld [vmem:[%s5683_s25 + $0xe0] sm:$0xff] }
 0x14b   : > { %1504 = vmatmul.mubr.f32.gmra.mrb[24].mxu0 %v374_v22  ;;  %4215 = vmatprep.subr.bf16.mxu1 %v4214_v19  ;;  %v416_v19 = vld [vmem:[#allocation5 + $0xa0] sm:$0xff]  ;;  %v4426_v25 = vpack.c.bf16 %v427_v17, %v419_v16  ;;  %v490_v16 = vld [vmem:[#allocation5 + $0x2f0] sm:$0xff] }
 0x14c   : > { %1987 = vmatmul.mubr.f32.gmra.mrb[24].mxu1 %v374_v22  ;;  %4025 = vmatpush1.bf16.msra.mxu0 %v4024_v23  ;;  %v4234_v22 = vpack.c.bf16 %v425_v13, %v417_v12  ;;  %v418_v23 = vld [vmem:[#allocation5 + $0xb0] sm:$0xff]  ;;  %v488_v12 = vld [vmem:[#allocation5 + $0x2e0] sm:$0xff]  ;;  %v335_v13 = vld [vmem:[%s5683_s25 + $0x118] sm:$0xff] }
 0x14d   : > { %4217 = vmatpush1.bf16.msra.mxu1 %v4216_v26  ;;  %1509 = vmatprep.mubr.f32.mxu0 %v381_v29  ;;  %v433_v26 = vld [vmem:[#allocation5 + $0x128] sm:$0xff]  ;;  %v4428_v32 = vpack.c.bf16 %v426_v24, %v418_v23  ;;  %v507_v23 = vld [vmem:[#allocation5 + $0x378] sm:$0xff] }
 0x14e   : > { %1992 = vmatprep.mubr.f32.mxu1 %v381_v29  ;;  %4027 = vmatprep.subr.bf16.mxu0 %v4026_v30  ;;  %v4236_v29 = vpack.c.bf16 %v424_v20, %v416_v19  ;;  %v435_v30 = vld [vmem:[#allocation5 + $0x138] sm:$0xff]  ;;  %v505_v19 = vld [vmem:[#allocation5 + $0x368] sm:$0xff]  ;;  %v334_v20 = vld [vmem:[%s5683_s25 + $0x110] sm:$0xff] }
 0x14f   : > { %1510 = vmatmul.mubr.f32.gmra.mrb[26].mxu0 %v380_v36  ;;  %4219 = vmatprep.subr.bf16.mxu1 %v4218_v33  ;;  %v432_v33 = vld [vmem:[#allocation5 + $0x120] sm:$0xff]  ;;  %v4430_v39 = vpack.c.bf16 %v443_v31, %v435_v30  ;;  %v506_v30 = vld [vmem:[#allocation5 + $0x370] sm:$0xff] }
 0x150   : > { %1993 = vmatmul.mubr.f32.gmra.mrb[26].mxu1 %v380_v36  ;;  %4029 = vmatpush1.bf16.msra.mxu0 %v4028_v37  ;;  %v4238_v36 = vpack.c.bf16 %v441_v27, %v433_v26  ;;  %v434_v37 = vld [vmem:[#allocation5 + $0x130] sm:$0xff]  ;;  %v504_v26 = vld [vmem:[#allocation5 + $0x360] sm:$0xff]  ;;  %v341_v27 = vld [vmem:[%s5683_s25 + $0x148] sm:$0xff] }
 0x151   : > { %4221 = vmatpush1.bf16.msra.mxu1 %v4220_v40  ;;  %1515 = vmatprep.mubr.f32.mxu0 %v387_v43  ;;  %v449_v40 = vld [vmem:[#allocation5 + $0x1a8] sm:$0xff]  ;;  %v4432_v46 = vpack.c.bf16 %v442_v38, %v434_v37  ;;  %v523_v37 = vld [vmem:[#allocation5 + $0x3f8] sm:$0xff] }
 0x152   : > { %1998 = vmatprep.mubr.f32.mxu1 %v387_v43  ;;  %4031 = vmatprep.subr.bf16.mxu0 %v4030_v44  ;;  %v4240_v43 = vpack.c.bf16 %v440_v34, %v432_v33  ;;  %v451_v44 = vld [vmem:[#allocation5 + $0x1b8] sm:$0xff]  ;;  %v521_v33 = vld [vmem:[#allocation5 + $0x3e8] sm:$0xff]  ;;  %v340_v34 = vld [vmem:[%s5683_s25 + $0x140] sm:$0xff] }
 0x153   : > { %1516 = vmatmul.mubr.f32.gmra.mrb[28].mxu0 %v386_v50  ;;  %4223 = vmatprep.subr.bf16.mxu1 %v4222_v47  ;;  %v448_v47 = vld [vmem:[#allocation5 + $0x1a0] sm:$0xff]  ;;  %v4434_v53 = vpack.c.bf16 %v459_v45, %v451_v44  ;;  %v522_v44 = vld [vmem:[#allocation5 + $0x3f0] sm:$0xff] }
 0x154   : > { %1999 = vmatmul.mubr.f32.gmra.mrb[28].mxu1 %v386_v50  ;;  %4033 = vmatpush1.bf16.msra.mxu0 %v4032_v51  ;;  %v4242_v50 = vpack.c.bf16 %v457_v41, %v449_v40  ;;  %v450_v51 = vld [vmem:[#allocation5 + $0x1b0] sm:$0xff]  ;;  %v520_v40 = vld [vmem:[#allocation5 + $0x3e0] sm:$0xff]  ;;  %v347_v41 = vld [vmem:[%s5683_s25 + $0x178] sm:$0xff] }
 0x155   : > { %4225 = vmatpush1.bf16.msra.mxu1 %v4224_v54  ;;  %1521 = vmatprep.mubr.f32.mxu0 %v393_v57  ;;  %v465_v54 = vld [vmem:[#allocation5 + $0x228] sm:$0xff]  ;;  %v4436_v60 = vpack.c.bf16 %v458_v52, %v450_v51  ;;  %v539_v51 = vld [vmem:[#allocation5 + $0x478] sm:$0xff] }
 0x156   : > { %2004 = vmatprep.mubr.f32.mxu1 %v393_v57  ;;  %4035 = vmatprep.subr.bf16.mxu0 %v4034_v58  ;;  %v4244_v57 = vpack.c.bf16 %v456_v48, %v448_v47  ;;  %v467_v58 = vld [vmem:[#allocation5 + $0x238] sm:$0xff]  ;;  %v537_v47 = vld [vmem:[#allocation5 + $0x468] sm:$0xff]  ;;  %v346_v48 = vld [vmem:[%s5683_s25 + $0x170] sm:$0xff] }
 0x157   : > { %1522 = vmatmul.mubr.f32.gmra.mrb[30].mxu0 %v392_v0  ;;  %4227 = vmatprep.subr.bf16.mxu1 %v4226_v61  ;;  %v464_v61 = vld [vmem:[#allocation5 + $0x220] sm:$0xff]  ;;  %v4438_v3 = vpack.c.bf16 %v475_v59, %v467_v58  ;;  %v538_v58 = vld [vmem:[#allocation5 + $0x470] sm:$0xff] }
 0x158   : > { %2005 = vmatmul.mubr.f32.gmra.mrb[30].mxu1 %v392_v0  ;;  %4037 = vmatpush1.bf16.msra.mxu0 %v4036_v1  ;;  %v4246_v0 = vpack.c.bf16 %v473_v55, %v465_v54  ;;  %v466_v1 = vld [vmem:[#allocation5 + $0x230] sm:$0xff]  ;;  %v536_v54 = vld [vmem:[#allocation5 + $0x460] sm:$0xff]  ;;  %v353_v55 = vld [vmem:[%s5683_s25 + $0x1a8] sm:$0xff] }
 0x159   : > { %4229 = vmatpush1.bf16.msra.mxu1 %v4228_v4  ;;  %1592 = vmatprep.mubr.f32.mxu0 %v305_v7  ;;  %v481_v4 = vld [vmem:[#allocation5 + $0x2a8] sm:$0xff]  ;;  %v4440_v10 = vpack.c.bf16 %v474_v2, %v466_v1  ;;  %v555_v1 = vld [vmem:[#allocation5 + $0x4f8] sm:$0xff] }
 0x15a   : > { %2075 = vmatprep.mubr.f32.mxu1 %v305_v7  ;;  %4231 = vmatprep.subr.bf16.mxu0 %v4230_v8  ;;  %v4248_v7 = vpack.c.bf16 %v472_v62, %v464_v61  ;;  %v483_v8 = vld [vmem:[#allocation5 + $0x2b8] sm:$0xff]  ;;  %v553_v61 = vld [vmem:[#allocation5 + $0x4e8] sm:$0xff]  ;;  %v352_v62 = vld [vmem:[%s5683_s25 + $0x1a0] sm:$0xff] }
 0x15b   : > { %1593 = vmatmul.mubr.f32.vlgmr.msra.gmra.mrb[0].mxu0 %v304_v14  ;;  %4423 = vmatprep.subr.bf16.mxu1 %v4422_v11  ;;  %v480_v11 = vld [vmem:[#allocation5 + $0x2a0] sm:$0xff]  ;;  %v4442_v17 = vpack.c.bf16 %v491_v9, %v483_v8  ;;  %v554_v8 = vld [vmem:[#allocation5 + $0x4f0] sm:$0xff] }
 0x15c   : > { %2076 = vmatmul.mubr.f32.vlgmr.msra.gmra.mrb[0].mxu1 %v304_v14  ;;  %4233 = vmatpush1.bf16.msra.mxu0 %v4232_v15  ;;  %v4250_v14 = vpack.c.bf16 %v489_v5, %v481_v4  ;;  %v482_v15 = vld [vmem:[#allocation5 + $0x2b0] sm:$0xff]  ;;  %v552_v4 = vld [vmem:[#allocation5 + $0x4e0] sm:$0xff]  ;;  %v359_v5 = vld [vmem:[%s5683_s25 + $0x1d8] sm:$0xff] }
 0x15d   : > { %4425 = vmatpush1.bf16.msra.mxu1 %v4424_v18  ;;  %1598 = vmatprep.mubr.f32.mxu0 %v311_v21  ;;  %v497_v18 = vld [vmem:[#allocation5 + $0x328] sm:$0xff]  ;;  %v4444_v24 = vpack.c.bf16 %v490_v16, %v482_v15  ;;  %v571_v15 = vld [vmem:[#allocation5 + $0x578] sm:$0xff] }
 0x15e   : > { %2081 = vmatprep.mubr.f32.mxu1 %v311_v21  ;;  %4235 = vmatprep.subr.bf16.mxu0 %v4234_v22  ;;  %v4252_v21 = vpack.c.bf16 %v488_v12, %v480_v11  ;;  %v499_v22 = vld [vmem:[#allocation5 + $0x338] sm:$0xff]  ;;  %v569_v11 = vld [vmem:[#allocation5 + $0x568] sm:$0xff]  ;;  %v358_v12 = vld [vmem:[%s5683_s25 + $0x1d0] sm:$0xff] }
 0x15f   : > { %1599 = vmatmul.mubr.f32.gmra.mrb[2].mxu0 %v310_v28  ;;  %4427 = vmatprep.subr.bf16.mxu1 %v4426_v25  ;;  %v496_v25 = vld [vmem:[#allocation5 + $0x320] sm:$0xff]  ;;  %v4446_v31 = vpack.c.bf16 %v507_v23, %v499_v22  ;;  %v570_v22 = vld [vmem:[#allocation5 + $0x570] sm:$0xff] }
 0x160   : > { %2082 = vmatmul.mubr.f32.gmra.mrb[2].mxu1 %v310_v28  ;;  %4237 = vmatpush1.bf16.msra.mxu0 %v4236_v29  ;;  %v4254_v28 = vpack.c.bf16 %v505_v19, %v497_v18  ;;  %v498_v29 = vld [vmem:[#allocation5 + $0x330] sm:$0xff]  ;;  %v568_v18 = vld [vmem:[#allocation5 + $0x560] sm:$0xff]  ;;  %v365_v19 = vld [vmem:[%s5683_s25 + $0x208] sm:$0xff] }
 0x161   : > { %4429 = vmatpush1.bf16.msra.mxu1 %v4428_v32  ;;  %1604 = vmatprep.mubr.f32.mxu0 %v317_v35  ;;  %v513_v32 = vld [vmem:[#allocation5 + $0x3a8] sm:$0xff]  ;;  %v4448_v38 = vpack.c.bf16 %v506_v30, %v498_v29  ;;  %v587_v29 = vld [vmem:[#allocation5 + $0x5f8] sm:$0xff] }
 0x162   : > { %2087 = vmatprep.mubr.f32.mxu1 %v317_v35  ;;  %4239 = vmatprep.subr.bf16.mxu0 %v4238_v36  ;;  %v4256_v35 = vpack.c.bf16 %v504_v26, %v496_v25  ;;  %v515_v36 = vld [vmem:[#allocation5 + $0x3b8] sm:$0xff]  ;;  %v585_v25 = vld [vmem:[#allocation5 + $0x5e8] sm:$0xff]  ;;  %v364_v26 = vld [vmem:[%s5683_s25 + $0x200] sm:$0xff] }
 0x163   : > { %1605 = vmatmul.mubr.f32.gmra.mrb[4].mxu0 %v316_v42  ;;  %4431 = vmatprep.subr.bf16.mxu1 %v4430_v39  ;;  %v512_v39 = vld [vmem:[#allocation5 + $0x3a0] sm:$0xff]  ;;  %v4450_v45 = vpack.c.bf16 %v523_v37, %v515_v36  ;;  %v586_v36 = vld [vmem:[#allocation5 + $0x5f0] sm:$0xff] }
 0x164   : > { %2088 = vmatmul.mubr.f32.gmra.mrb[4].mxu1 %v316_v42  ;;  %4241 = vmatpush1.bf16.msra.mxu0 %v4240_v43  ;;  %v4258_v42 = vpack.c.bf16 %v521_v33, %v513_v32  ;;  %v514_v43 = vld [vmem:[#allocation5 + $0x3b0] sm:$0xff]  ;;  %v584_v32 = vld [vmem:[#allocation5 + $0x5e0] sm:$0xff]  ;;  %v371_v33 = vld [vmem:[%s5683_s25 + $0x238] sm:$0xff] }
 0x165   : > { %4433 = vmatpush1.bf16.msra.mxu1 %v4432_v46  ;;  %1610 = vmatprep.mubr.f32.mxu0 %v323_v49  ;;  %v529_v46 = vld [vmem:[#allocation5 + $0x428] sm:$0xff]  ;;  %v4452_v52 = vpack.c.bf16 %v522_v44, %v514_v43  ;;  %v603_v43 = vld [vmem:[#allocation5 + $0x678] sm:$0xff] }
 0x166   : > { %2093 = vmatprep.mubr.f32.mxu1 %v323_v49  ;;  %4243 = vmatprep.subr.bf16.mxu0 %v4242_v50  ;;  %v4260_v49 = vpack.c.bf16 %v520_v40, %v512_v39  ;;  %v531_v50 = vld [vmem:[#allocation5 + $0x438] sm:$0xff]  ;;  %v601_v39 = vld [vmem:[#allocation5 + $0x668] sm:$0xff]  ;;  %v370_v40 = vld [vmem:[%s5683_s25 + $0x230] sm:$0xff] }
 0x167   : > { %1611 = vmatmul.mubr.f32.gmra.mrb[6].mxu0 %v322_v56  ;;  %4435 = vmatprep.subr.bf16.mxu1 %v4434_v53  ;;  %v528_v53 = vld [vmem:[#allocation5 + $0x420] sm:$0xff]  ;;  %v4454_v59 = vpack.c.bf16 %v539_v51, %v531_v50  ;;  %v602_v50 = vld [vmem:[#allocation5 + $0x670] sm:$0xff] }
 0x168   : > { %2094 = vmatmul.mubr.f32.gmra.mrb[6].mxu1 %v322_v56  ;;  %4245 = vmatpush1.bf16.msra.mxu0 %v4244_v57  ;;  %v4262_v56 = vpack.c.bf16 %v537_v47, %v529_v46  ;;  %v530_v57 = vld [vmem:[#allocation5 + $0x430] sm:$0xff]  ;;  %v600_v46 = vld [vmem:[#allocation5 + $0x660] sm:$0xff]  ;;  %v377_v47 = vld [vmem:[%s5683_s25 + $0x268] sm:$0xff] }
 0x169   : > { %4437 = vmatpush1.bf16.msra.mxu1 %v4436_v60  ;;  %1616 = vmatprep.mubr.f32.mxu0 %v329_v63  ;;  %v545_v60 = vld [vmem:[#allocation5 + $0x4a8] sm:$0xff]  ;;  %v4456_v2 = vpack.c.bf16 %v538_v58, %v530_v57  ;;  %v619_v57 = vld [vmem:[#allocation5 + $0x6f8] sm:$0xff] }
 0x16a   : > { %2099 = vmatprep.mubr.f32.mxu1 %v329_v63  ;;  %4247 = vmatprep.subr.bf16.mxu0 %v4246_v0  ;;  %v4264_v63 = vpack.c.bf16 %v536_v54, %v528_v53  ;;  %v547_v0 = vld [vmem:[#allocation5 + $0x4b8] sm:$0xff]  ;;  %v617_v53 = vld [vmem:[#allocation5 + $0x6e8] sm:$0xff]  ;;  %v376_v54 = vld [vmem:[%s5683_s25 + $0x260] sm:$0xff] }
 0x16b   : > { %1617 = vmatmul.mubr.f32.gmra.mrb[8].mxu0 %v328_v6  ;;  %4439 = vmatprep.subr.bf16.mxu1 %v4438_v3  ;;  %v544_v3 = vld [vmem:[#allocation5 + $0x4a0] sm:$0xff]  ;;  %v4458_v9 = vpack.c.bf16 %v555_v1, %v547_v0  ;;  %v618_v0 = vld [vmem:[#allocation5 + $0x6f0] sm:$0xff] }
 0x16c   : > { %2100 = vmatmul.mubr.f32.gmra.mrb[8].mxu1 %v328_v6  ;;  %4249 = vmatpush1.bf16.msra.mxu0 %v4248_v7  ;;  %v4266_v6 = vpack.c.bf16 %v553_v61, %v545_v60  ;;  %v546_v7 = vld [vmem:[#allocation5 + $0x4b0] sm:$0xff]  ;;  %v616_v60 = vld [vmem:[#allocation5 + $0x6e0] sm:$0xff]  ;;  %v383_v61 = vld [vmem:[%s5683_s25 + $0x298] sm:$0xff] }
 0x16d   : > { %4441 = vmatpush1.bf16.msra.mxu1 %v4440_v10  ;;  %1622 = vmatprep.mubr.f32.mxu0 %v335_v13  ;;  %v561_v10 = vld [vmem:[#allocation5 + $0x528] sm:$0xff]  ;;  %v4460_v16 = vpack.c.bf16 %v554_v8, %v546_v7  ;;  %v635_v7 = vld [vmem:[#allocation5 + $0x778] sm:$0xff] }
 0x16e   : > { %2105 = vmatprep.mubr.f32.mxu1 %v335_v13  ;;  %4251 = vmatprep.subr.bf16.mxu0 %v4250_v14  ;;  %v4268_v13 = vpack.c.bf16 %v552_v4, %v544_v3  ;;  %v563_v14 = vld [vmem:[#allocation5 + $0x538] sm:$0xff]  ;;  %v633_v3 = vld [vmem:[#allocation5 + $0x768] sm:$0xff]  ;;  %v382_v4 = vld [vmem:[%s5683_s25 + $0x290] sm:$0xff] }
 0x16f   : > { %1623 = vmatmul.mubr.f32.gmra.mrb[10].mxu0 %v334_v20  ;;  %4443 = vmatprep.subr.bf16.mxu1 %v4442_v17  ;;  %v560_v17 = vld [vmem:[#allocation5 + $0x520] sm:$0xff]  ;;  %v4462_v23 = vpack.c.bf16 %v571_v15, %v563_v14  ;;  %v634_v14 = vld [vmem:[#allocation5 + $0x770] sm:$0xff] }
 0x170   : > { %2106 = vmatmul.mubr.f32.gmra.mrb[10].mxu1 %v334_v20  ;;  %4253 = vmatpush1.bf16.msra.mxu0 %v4252_v21  ;;  %v4270_v20 = vpack.c.bf16 %v569_v11, %v561_v10  ;;  %v562_v21 = vld [vmem:[#allocation5 + $0x530] sm:$0xff]  ;;  %v632_v10 = vld [vmem:[#allocation5 + $0x760] sm:$0xff]  ;;  %v389_v11 = vld [vmem:[%s5683_s25 + $0x2c8] sm:$0xff] }
 0x171   : > { %4445 = vmatpush1.bf16.msra.mxu1 %v4444_v24  ;;  %1628 = vmatprep.mubr.f32.mxu0 %v341_v27  ;;  %v577_v24 = vld [vmem:[#allocation5 + $0x5a8] sm:$0xff]  ;;  %v4464_v30 = vpack.c.bf16 %v570_v22, %v562_v21  ;;  %v651_v21 = vld [vmem:[#allocation5 + $0x7f8] sm:$0xff] }
 0x172   : > { %2111 = vmatprep.mubr.f32.mxu1 %v341_v27  ;;  %4255 = vmatprep.subr.bf16.mxu0 %v4254_v28  ;;  %v4272_v27 = vpack.c.bf16 %v568_v18, %v560_v17  ;;  %v579_v28 = vld [vmem:[#allocation5 + $0x5b8] sm:$0xff]  ;;  %v649_v17 = vld [vmem:[#allocation5 + $0x7e8] sm:$0xff]  ;;  %v388_v18 = vld [vmem:[%s5683_s25 + $0x2c0] sm:$0xff] }
 0x173   : > { %1629 = vmatmul.mubr.f32.gmra.mrb[12].mxu0 %v340_v34  ;;  %4447 = vmatprep.subr.bf16.mxu1 %v4446_v31  ;;  %v576_v31 = vld [vmem:[#allocation5 + $0x5a0] sm:$0xff]  ;;  %v4466_v37 = vpack.c.bf16 %v587_v29, %v579_v28  ;;  %v650_v28 = vld [vmem:[#allocation5 + $0x7f0] sm:$0xff] }
 0x174   : > { %2112 = vmatmul.mubr.f32.gmra.mrb[12].mxu1 %v340_v34  ;;  %4257 = vmatpush1.bf16.msra.mxu0 %v4256_v35  ;;  %v4274_v34 = vpack.c.bf16 %v585_v25, %v577_v24  ;;  %v578_v35 = vld [vmem:[#allocation5 + $0x5b0] sm:$0xff]  ;;  %v648_v24 = vld [vmem:[#allocation5 + $0x7e0] sm:$0xff]  ;;  %v395_v25 = vld [vmem:[%s5683_s25 + $0x2f8] sm:$0xff] }
 0x175   : > { %4449 = vmatpush1.bf16.msra.mxu1 %v4448_v38  ;;  %1634 = vmatprep.mubr.f32.mxu0 %v347_v41  ;;  %v593_v38 = vld [vmem:[#allocation5 + $0x628] sm:$0xff]  ;;  %v4468_v44 = vpack.c.bf16 %v586_v36, %v578_v35  ;;  %v667_v35 = vld [vmem:[#allocation5 + $0x878] sm:$0xff] }
 0x176   : > { %2117 = vmatprep.mubr.f32.mxu1 %v347_v41  ;;  %4259 = vmatprep.subr.bf16.mxu0 %v4258_v42  ;;  %v4276_v41 = vpack.c.bf16 %v584_v32, %v576_v31  ;;  %v595_v42 = vld [vmem:[#allocation5 + $0x638] sm:$0xff]  ;;  %v665_v31 = vld [vmem:[#allocation5 + $0x868] sm:$0xff]  ;;  %v394_v32 = vld [vmem:[%s5683_s25 + $0x2f0] sm:$0xff] }
 0x177   : > { %1635 = vmatmul.mubr.f32.gmra.mrb[14].mxu0 %v346_v48  ;;  %4451 = vmatprep.subr.bf16.mxu1 %v4450_v45  ;;  %v592_v45 = vld [vmem:[#allocation5 + $0x620] sm:$0xff]  ;;  %v4470_v51 = vpack.c.bf16 %v603_v43, %v595_v42  ;;  %v673_v43 = vld [vmem:[#allocation5 + $0x8a8] sm:$0xff] }
 0x178   : > { %2118 = vmatmul.mubr.f32.gmra.mrb[14].mxu1 %v346_v48  ;;  %4261 = vmatpush1.bf16.msra.mxu0 %v4260_v49  ;;  %v4278_v48 = vpack.c.bf16 %v601_v39, %v593_v38  ;;  %v594_v49 = vld [vmem:[#allocation5 + $0x630] sm:$0xff]  ;;  %v664_v38 = vld [vmem:[#allocation5 + $0x860] sm:$0xff] }
 0x179   : > { %4453 = vmatpush1.bf16.msra.mxu1 %v4452_v52  ;;  %1640 = vmatprep.mubr.f32.mxu0 %v353_v55  ;;  %v609_v52 = vld [vmem:[#allocation5 + $0x6a8] sm:$0xff]  ;;  %v4472_v58 = vpack.c.bf16 %v602_v50, %v594_v49  ;;  %v672_v50 = vld [vmem:[#allocation5 + $0x8a0] sm:$0xff] }
 0x17a   : > { %2123 = vmatprep.mubr.f32.mxu1 %v353_v55  ;;  %4263 = vmatprep.subr.bf16.mxu0 %v4262_v56  ;;  %v4280_v55 = vpack.c.bf16 %v600_v46, %v592_v45  ;;  %v611_v56 = vld [vmem:[#allocation5 + $0x6b8] sm:$0xff] }
 0x17b   : > { %1641 = vmatmul.mubr.f32.gmra.mrb[16].mxu0 %v352_v62  ;;  %4455 = vmatprep.subr.bf16.mxu1 %v4454_v59  ;;  %v608_v59 = vld [vmem:[#allocation5 + $0x6a0] sm:$0xff]  ;;  %v4474_v1 = vpack.c.bf16 %v619_v57, %v611_v56  ;;  %v675_v46 = vld [vmem:[#allocation5 + $0x8b8] sm:$0xff]  ;;  %v689_v57 = vld [vmem:[#allocation5 + $0x928] sm:$0xff] }
 0x17c   : > { %2124 = vmatmul.mubr.f32.gmra.mrb[16].mxu1 %v352_v62  ;;  %4265 = vmatpush1.bf16.msra.mxu0 %v4264_v63  ;;  %v4282_v62 = vpack.c.bf16 %v617_v53, %v609_v52  ;;  %v610_v63 = vld [vmem:[#allocation5 + $0x6b0] sm:$0xff] }
 0x17d   : > { %4457 = vmatpush1.bf16.msra.mxu1 %v4456_v2  ;;  %1646 = vmatprep.mubr.f32.mxu0 %v359_v5  ;;  %v625_v2 = vld [vmem:[#allocation5 + $0x728] sm:$0xff]  ;;  %v4476_v8 = vpack.c.bf16 %v618_v0, %v610_v63  ;;  %v674_v53 = vld [vmem:[#allocation5 + $0x8b0] sm:$0xff]  ;;  %v688_v0 = vld [vmem:[#allocation5 + $0x920] sm:$0xff] }
 0x17e   : > { %2129 = vmatprep.mubr.f32.mxu1 %v359_v5  ;;  %4267 = vmatprep.subr.bf16.mxu0 %v4266_v6  ;;  %v4284_v5 = vpack.c.bf16 %v616_v60, %v608_v59  ;;  %v627_v6 = vld [vmem:[#allocation5 + $0x738] sm:$0xff] }
 0x17f   : > { %1647 = vmatmul.mubr.f32.gmra.mrb[18].mxu0 %v358_v12  ;;  %4459 = vmatprep.subr.bf16.mxu1 %v4458_v9  ;;  %v624_v9 = vld [vmem:[#allocation5 + $0x720] sm:$0xff]  ;;  %v4478_v15 = vpack.c.bf16 %v635_v7, %v627_v6  ;;  %v691_v60 = vld [vmem:[#allocation5 + $0x938] sm:$0xff]  ;;  %v705_v7 = vld [vmem:[#allocation5 + $0x9a8] sm:$0xff] }
 0x180   : > { %2130 = vmatmul.mubr.f32.gmra.mrb[18].mxu1 %v358_v12  ;;  %4269 = vmatpush1.bf16.msra.mxu0 %v4268_v13  ;;  %v4286_v12 = vpack.c.bf16 %v633_v3, %v625_v2  ;;  %v626_v13 = vld [vmem:[#allocation5 + $0x730] sm:$0xff] }
 0x181   : > { %4461 = vmatpush1.bf16.msra.mxu1 %v4460_v16  ;;  %1652 = vmatprep.mubr.f32.mxu0 %v365_v19  ;;  %v641_v16 = vld [vmem:[#allocation5 + $0x7a8] sm:$0xff]  ;;  %v4480_v22 = vpack.c.bf16 %v634_v14, %v626_v13  ;;  %v690_v3 = vld [vmem:[#allocation5 + $0x930] sm:$0xff]  ;;  %v704_v14 = vld [vmem:[#allocation5 + $0x9a0] sm:$0xff] }
 0x182   : > { %2135 = vmatprep.mubr.f32.mxu1 %v365_v19  ;;  %4271 = vmatprep.subr.bf16.mxu0 %v4270_v20  ;;  %v4288_v19 = vpack.c.bf16 %v632_v10, %v624_v9  ;;  %v643_v20 = vld [vmem:[#allocation5 + $0x7b8] sm:$0xff] }
 0x183   : > { %1653 = vmatmul.mubr.f32.gmra.mrb[20].mxu0 %v364_v26  ;;  %4463 = vmatprep.subr.bf16.mxu1 %v4462_v23  ;;  %v640_v23 = vld [vmem:[#allocation5 + $0x7a0] sm:$0xff]  ;;  %v4482_v29 = vpack.c.bf16 %v651_v21, %v643_v20  ;;  %v707_v10 = vld [vmem:[#allocation5 + $0x9b8] sm:$0xff]  ;;  %v721_v21 = vld [vmem:[#allocation5 + $0xa28] sm:$0xff] }
 0x184   : > { %2136 = vmatmul.mubr.f32.gmra.mrb[20].mxu1 %v364_v26  ;;  %4273 = vmatpush1.bf16.msra.mxu0 %v4272_v27  ;;  %v4290_v26 = vpack.c.bf16 %v649_v17, %v641_v16  ;;  %v642_v27 = vld [vmem:[#allocation5 + $0x7b0] sm:$0xff] }
 0x185   : > { %4465 = vmatpush1.bf16.msra.mxu1 %v4464_v30  ;;  %1658 = vmatprep.mubr.f32.mxu0 %v371_v33  ;;  %v657_v30 = vld [vmem:[#allocation5 + $0x828] sm:$0xff]  ;;  %v4484_v36 = vpack.c.bf16 %v650_v28, %v642_v27  ;;  %v706_v17 = vld [vmem:[#allocation5 + $0x9b0] sm:$0xff]  ;;  %v720_v28 = vld [vmem:[#allocation5 + $0xa20] sm:$0xff] }
 0x186   : > { %2141 = vmatprep.mubr.f32.mxu1 %v371_v33  ;;  %4275 = vmatprep.subr.bf16.mxu0 %v4274_v34  ;;  %v4292_v33 = vpack.c.bf16 %v648_v24, %v640_v23  ;;  %v659_v34 = vld [vmem:[#allocation5 + $0x838] sm:$0xff]  ;;  %v4294_v39 = vpack.c.bf16 %v665_v31, %v657_v30  ;;  %v722_v31 = vld [vmem:[#allocation5 + $0xa30] sm:$0xff] }
 0x187   : > { %1659 = vmatmul.mubr.f32.gmra.mrb[22].mxu0 %v370_v40  ;;  %4467 = vmatprep.subr.bf16.mxu1 %v4466_v37  ;;  %v656_v37 = vld [vmem:[#allocation5 + $0x820] sm:$0xff]  ;;  %v4486_v42 = vpack.c.bf16 %v667_v35, %v659_v34  ;;  %v723_v24 = vld [vmem:[#allocation5 + $0xa38] sm:$0xff]  ;;  %v737_v35 = vld [vmem:[#allocation5 + $0xaa8] sm:$0xff] }
 0x188   : > { %2142 = vmatmul.mubr.f32.gmra.mrb[22].mxu1 %v370_v40  ;;  %4277 = vmatpush1.bf16.msra.mxu0 %v4276_v41  ;;  %v658_v40 = vld [vmem:[#allocation5 + $0x830] sm:$0xff]  ;;  %v4296_v45 = vpack.c.bf16 %v664_v38, %v656_v37  ;;  %v739_v38 = vld [vmem:[#allocation5 + $0xab8] sm:$0xff] }
 0x189   : > { %4469 = vmatpush1.bf16.msra.mxu1 %v4468_v44  ;;  %1664 = vmatprep.mubr.f32.mxu0 %v377_v47  ;;  %v666_v41 = vld [vmem:[#allocation5 + $0x870] sm:$0xff]  ;;  %v681_v44 = vld [vmem:[#allocation5 + $0x8e8] sm:$0xff] }
 0x18a   : > { %2147 = vmatprep.mubr.f32.mxu1 %v377_v47  ;;  %4279 = vmatprep.subr.bf16.mxu0 %v4278_v48  ;;  %v683_v47 = vld [vmem:[#allocation5 + $0x8f8] sm:$0xff]  ;;  %v5133_v48 = vld [vmem:[%s5683_s25 + $0x8] sm:$0xff]  ;;  %v4488_v49 = vpack.c.bf16 %v666_v41, %v658_v40  ;;  %v4298_v52 = vpack.c.bf16 %v681_v44, %v673_v43  ;;  %v744_v43 = vld [vmem:[#allocation5 + $0xae0] sm:$0xff] }
 0x18b   : > { %1665 = vmatmul.mubr.f32.gmra.mrb[24].mxu0 %v376_v54  ;;  %4471 = vmatprep.subr.bf16.mxu1 %v4470_v51  ;;  %v680_v51 = vld [vmem:[#allocation5 + $0x8e0] sm:$0xff]  ;;  %v4490_v56 = vpack.c.bf16 %v683_v47, %v675_v46  ;;  %v5141_v40 = vld [vmem:[%s5683_s25 + $0xc8] sm:$0xff]  ;;  %v746_v46 = vld [vmem:[#allocation5 + $0xaf0] sm:$0xff] }
 0x18c   : > { %2148 = vmatmul.mubr.f32.gmra.mrb[24].mxu1 %v376_v54  ;;  %4281 = vmatpush1.bf16.msra.mxu0 %v4280_v55  ;;  %v682_v54 = vld [vmem:[#allocation5 + $0x8f0] sm:$0xff]  ;;  %v5134_v55 = vld [vmem:[%s5683_s25] sm:$0xff]  ;;  %v4300_v59 = vpack.c.bf16 %v680_v51, %v672_v50  ;;  %v761_v50 = vld [vmem:[#allocation5 + $0xb68] sm:$0xff] }
 0x18d   : > { %4473 = vmatpush1.bf16.msra.mxu1 %v4472_v58  ;;  %1670 = vmatprep.mubr.f32.mxu0 %v383_v61  ;;  %v697_v58 = vld [vmem:[#allocation5 + $0x968] sm:$0xff]  ;;  %v4492_v63 = vpack.c.bf16 %v682_v54, %v674_v53  ;;  %v5142_v47 = vld [vmem:[%s5683_s25 + $0xc0] sm:$0xff]  ;;  %v763_v53 = vld [vmem:[#allocation5 + $0xb78] sm:$0xff] }
 0x18e   : > { %2153 = vmatprep.mubr.f32.mxu1 %v383_v61  ;;  %4283 = vmatprep.subr.bf16.mxu0 %v4282_v62  ;;  %v699_v61 = vld [vmem:[#allocation5 + $0x978] sm:$0xff]  ;;  %v4302_v2 = vpack.c.bf16 %v697_v58, %v689_v57  ;;  %v760_v57 = vld [vmem:[#allocation5 + $0xb60] sm:$0xff] }
 0x18f   : > { %1671 = vmatmul.mubr.f32.gmra.mrb[26].mxu0 %v382_v4  ;;  %4475 = vmatprep.subr.bf16.mxu1 %v4474_v1  ;;  %v5135_v62 = vld [vmem:[%s5683_s25 + $0x38] sm:$0xff]  ;;  %v696_v1 = vld [vmem:[#allocation5 + $0x960] sm:$0xff]  ;;  %v4494_v6 = vpack.c.bf16 %v699_v61, %v691_v60  ;;  %v762_v60 = vld [vmem:[#allocation5 + $0xb70] sm:$0xff] }
 0x190   : > { %2154 = vmatmul.mubr.f32.gmra.mrb[26].mxu1 %v382_v4  ;;  %4285 = vmatpush1.bf16.msra.mxu0 %v4284_v5  ;;  %v698_v4 = vld [vmem:[#allocation5 + $0x970] sm:$0xff]  ;;  %v4304_v9 = vpack.c.bf16 %v696_v1, %v688_v0  ;;  %v5143_v54 = vld [vmem:[%s5683_s25 + $0xf8] sm:$0xff]  ;;  %v777_v0 = vld [vmem:[#allocation5 + $0xbe8] sm:$0xff] }
 0x191   : > { %4477 = vmatpush1.bf16.msra.mxu1 %v4476_v8  ;;  %1676 = vmatprep.mubr.f32.mxu0 %v389_v11  ;;  %v5136_v5 = vld [vmem:[%s5683_s25 + $0x30] sm:$0xff]  ;;  %v713_v8 = vld [vmem:[#allocation5 + $0x9e8] sm:$0xff]  ;;  %v4496_v13 = vpack.c.bf16 %v698_v4, %v690_v3  ;;  %v779_v3 = vld [vmem:[#allocation5 + $0xbf8] sm:$0xff] }
 0x192   : > { %2159 = vmatprep.mubr.f32.mxu1 %v389_v11  ;;  %4287 = vmatprep.subr.bf16.mxu0 %v4286_v12  ;;  %v715_v11 = vld [vmem:[#allocation5 + $0x9f8] sm:$0xff]  ;;  %v5137_v12 = vld [vmem:[%s5683_s25 + $0x68] sm:$0xff]  ;;  %v4306_v16 = vpack.c.bf16 %v713_v8, %v705_v7  ;;  %v5144_v61 = vld [vmem:[%s5683_s25 + $0xf0] sm:$0xff] }
 0x193   : > { %1677 = vmatmul.mubr.f32.gmra.mrb[28].mxu0 %v388_v18  ;;  %4479 = vmatprep.subr.bf16.mxu1 %v4478_v15  ;;  %v712_v15 = vld [vmem:[#allocation5 + $0x9e0] sm:$0xff]  ;;  %v4498_v20 = vpack.c.bf16 %v715_v11, %v707_v10  ;;  %v5145_v4 = vld [vmem:[%s5683_s25 + $0x128] sm:$0xff]  ;;  %v778_v10 = vld [vmem:[#allocation5 + $0xbf0] sm:$0xff] }
 0x194   : > { %2160 = vmatmul.mubr.f32.gmra.mrb[28].mxu1 %v388_v18  ;;  %4289 = vmatpush1.bf16.msra.mxu0 %v4288_v19  ;;  %v714_v18 = vld [vmem:[#allocation5 + $0x9f0] sm:$0xff]  ;;  %v5138_v19 = vld [vmem:[%s5683_s25 + $0x60] sm:$0xff]  ;;  %v4308_v23 = vpack.c.bf16 %v712_v15, %v704_v14  ;;  %v793_v14 = vld [vmem:[#allocation5 + $0xc68] sm:$0xff] }
 0x195   : > { %4481 = vmatpush1.bf16.msra.mxu1 %v4480_v22  ;;  %1682 = vmatprep.mubr.f32.mxu0 %v395_v25  ;;  %v729_v22 = vld [vmem:[#allocation5 + $0xa68] sm:$0xff]  ;;  %v4500_v27 = vpack.c.bf16 %v714_v18, %v706_v17  ;;  %v776_v7 = vld [vmem:[#allocation5 + $0xbe0] sm:$0xff]  ;;  %v795_v17 = vld [vmem:[#allocation5 + $0xc78] sm:$0xff] }
 0x196   : > { %2165 = vmatprep.mubr.f32.mxu1 %v395_v25  ;;  %4291 = vmatprep.subr.bf16.mxu0 %v4290_v26  ;;  %v731_v25 = vld [vmem:[#allocation5 + $0xa78] sm:$0xff]  ;;  %v4310_v30 = vpack.c.bf16 %v729_v22, %v721_v21  ;;  %v5146_v11 = vld [vmem:[%s5683_s25 + $0x120] sm:$0xff] }
 0x197   : > { %1683 = vmatmul.mubr.f32.gmra.mrb[30].mxu0 %v394_v32  ;;  %4483 = vmatprep.subr.bf16.mxu1 %v4482_v29  ;;  %v5139_v26 = vld [vmem:[%s5683_s25 + $0x98] sm:$0xff]  ;;  %v728_v29 = vld [vmem:[#allocation5 + $0xa60] sm:$0xff]  ;;  %v4502_v34 = vpack.c.bf16 %v731_v25, %v723_v24  ;;  %v794_v24 = vld [vmem:[#allocation5 + $0xc70] sm:$0xff] }
 0x198   : > { %2166 = vmatmul.mubr.f32.gmra.mrb[30].mxu1 %v394_v32  ;;  %4293 = vmatpush1.bf16.msra.mxu0 %v4292_v33  ;;  %v730_v32 = vld [vmem:[#allocation5 + $0xa70] sm:$0xff]  ;;  %v4312_v37 = vpack.c.bf16 %v728_v29, %v720_v28  ;;  %v5147_v18 = vld [vmem:[%s5683_s25 + $0x158] sm:$0xff]  ;;  %v792_v21 = vld [vmem:[#allocation5 + $0xc60] sm:$0xff] }
 0x199   : > { %4485 = vmatpush1.bf16.msra.mxu1 %v4484_v36  ;;  %2236 = vmatprep.mubr.f32.mxu0 %v5133_v48  ;;  %v5140_v33 = vld [vmem:[%s5683_s25 + $0x90] sm:$0xff]  ;;  %v745_v36 = vld [vmem:[#allocation5 + $0xae8] sm:$0xff]  ;;  %v4504_v41 = vpack.c.bf16 %v730_v32, %v722_v31  ;;  %v811_v31 = vld [vmem:[#allocation5 + $0xcf8] sm:$0xff] }
 0x19a   : > { %2719 = vmatprep.mubr.f32.mxu1 %v5133_v48  ;;  %4295 = vmatprep.subr.bf16.mxu0 %v4294_v39  ;;  %v747_v39 = vld [vmem:[#allocation5 + $0xaf8] sm:$0xff]  ;;  %v4314_v44 = vpack.c.bf16 %v745_v36, %v737_v35  ;;  %v5148_v25 = vld [vmem:[%s5683_s25 + $0x150] sm:$0xff]  ;;  %v809_v28 = vld [vmem:[#allocation5 + $0xce8] sm:$0xff] }
 0x19b   : > { %2237 = vmatmul.mubr.f32.vlgmr.msra.gmra.mrb[32].mxu0 %v5134_v55  ;;  %4487 = vmatprep.subr.bf16.mxu1 %v4486_v42  ;;  %v736_v42 = vld [vmem:[#allocation5 + $0xaa0] sm:$0xff]  ;;  %v4506_v48 = vpack.c.bf16 %v747_v39, %v739_v38  ;;  %v5149_v32 = vld [vmem:[%s5683_s25 + $0x188] sm:$0xff]  ;;  %v810_v38 = vld [vmem:[#allocation5 + $0xcf0] sm:$0xff] }
 0x19c   : > { %2720 = vmatmul.mubr.f32.vlgmr.msra.gmra.mrb[32].mxu1 %v5134_v55  ;;  %4297 = vmatpush1.bf16.msra.mxu0 %v4296_v45  ;;  %v738_v45 = vld [vmem:[#allocation5 + $0xab0] sm:$0xff]  ;;  %v4316_v51 = vpack.c.bf16 %v744_v43, %v736_v42  ;;  %v808_v35 = vld [vmem:[#allocation5 + $0xce0] sm:$0xff]  ;;  %v825_v42 = vld [vmem:[#allocation5 + $0xd68] sm:$0xff] }
 0x19d   : > { %4489 = vmatpush1.bf16.msra.mxu1 %v4488_v49  ;;  %2242 = vmatprep.mubr.f32.mxu0 %v5135_v62  ;;  %v753_v49 = vld [vmem:[#allocation5 + $0xb28] sm:$0xff]  ;;  %v4508_v55 = vpack.c.bf16 %v746_v46, %v738_v45  ;;  %v5150_v39 = vld [vmem:[%s5683_s25 + $0x180] sm:$0xff]  ;;  %v827_v45 = vld [vmem:[#allocation5 + $0xd78] sm:$0xff] }
 0x19e   : > { %2725 = vmatprep.mubr.f32.mxu1 %v5135_v62  ;;  %4299 = vmatprep.subr.bf16.mxu0 %v4298_v52  ;;  %v755_v52 = vld [vmem:[#allocation5 + $0xb38] sm:$0xff]  ;;  %v4318_v58 = vpack.c.bf16 %v761_v50, %v753_v49  ;;  %v824_v49 = vld [vmem:[#allocation5 + $0xd60] sm:$0xff] }
 0x19f   : > { %2243 = vmatmul.mubr.f32.gmra.mrb[34].mxu0 %v5136_v5  ;;  %4491 = vmatprep.subr.bf16.mxu1 %v4490_v56  ;;  %v752_v56 = vld [vmem:[#allocation5 + $0xb20] sm:$0xff]  ;;  %v4510_v62 = vpack.c.bf16 %v763_v53, %v755_v52  ;;  %v5151_v46 = vld [vmem:[%s5683_s25 + $0x1b8] sm:$0xff]  ;;  %v826_v52 = vld [vmem:[#allocation5 + $0xd70] sm:$0xff] }
 0x1a0   : > { %2726 = vmatmul.mubr.f32.gmra.mrb[34].mxu1 %v5136_v5  ;;  %4301 = vmatpush1.bf16.msra.mxu0 %v4300_v59  ;;  %v754_v59 = vld [vmem:[#allocation5 + $0xb30] sm:$0xff]  ;;  %v4320_v1 = vpack.c.bf16 %v760_v57, %v752_v56  ;;  %v841_v56 = vld [vmem:[#allocation5 + $0xde8] sm:$0xff] }
 0x1a1   : > { %4493 = vmatpush1.bf16.msra.mxu1 %v4492_v63  ;;  %2248 = vmatprep.mubr.f32.mxu0 %v5137_v12  ;;  %v769_v63 = vld [vmem:[#allocation5 + $0xba8] sm:$0xff]  ;;  %v4512_v5 = vpack.c.bf16 %v762_v60, %v754_v59  ;;  %v5152_v53 = vld [vmem:[%s5683_s25 + $0x1b0] sm:$0xff]  ;;  %v843_v59 = vld [vmem:[#allocation5 + $0xdf8] sm:$0xff] }
 0x1a2   : > { %2731 = vmatprep.mubr.f32.mxu1 %v5137_v12  ;;  %4303 = vmatprep.subr.bf16.mxu0 %v4302_v2  ;;  %v771_v2 = vld [vmem:[#allocation5 + $0xbb8] sm:$0xff]  ;;  %v4322_v8 = vpack.c.bf16 %v777_v0, %v769_v63  ;;  %v5153_v60 = vld [vmem:[%s5683_s25 + $0x1e8] sm:$0xff]  ;;  %v840_v63 = vld [vmem:[#allocation5 + $0xde0] sm:$0xff] }
 0x1a3   : > { %2249 = vmatmul.mubr.f32.gmra.mrb[36].mxu0 %v5138_v19  ;;  %4495 = vmatprep.subr.bf16.mxu1 %v4494_v6  ;;  %v768_v6 = vld [vmem:[#allocation5 + $0xba0] sm:$0xff]  ;;  %v4514_v12 = vpack.c.bf16 %v779_v3, %v771_v2  ;;  %v842_v2 = vld [vmem:[#allocation5 + $0xdf0] sm:$0xff] }
 0x1a4   : > { %2732 = vmatmul.mubr.f32.gmra.mrb[36].mxu1 %v5138_v19  ;;  %4305 = vmatpush1.bf16.msra.mxu0 %v4304_v9  ;;  %v770_v9 = vld [vmem:[#allocation5 + $0xbb0] sm:$0xff]  ;;  %v4324_v15 = vpack.c.bf16 %v776_v7, %v768_v6  ;;  %v5154_v3 = vld [vmem:[%s5683_s25 + $0x1e0] sm:$0xff]  ;;  %v857_v6 = vld [vmem:[#allocation5 + $0xe68] sm:$0xff] }
 0x1a5   : > { %4497 = vmatpush1.bf16.msra.mxu1 %v4496_v13  ;;  %2254 = vmatprep.mubr.f32.mxu0 %v5139_v26  ;;  %v785_v13 = vld [vmem:[#allocation5 + $0xc28] sm:$0xff]  ;;  %v4516_v19 = vpack.c.bf16 %v778_v10, %v770_v9  ;;  %v859_v9 = vld [vmem:[#allocation5 + $0xe78] sm:$0xff] }
 0x1a6   : > { %2737 = vmatprep.mubr.f32.mxu1 %v5139_v26  ;;  %4307 = vmatprep.subr.bf16.mxu0 %v4306_v16  ;;  %v787_v16 = vld [vmem:[#allocation5 + $0xc38] sm:$0xff]  ;;  %v4326_v22 = vpack.c.bf16 %v793_v14, %v785_v13  ;;  %v856_v13 = vld [vmem:[#allocation5 + $0xe60] sm:$0xff] }
 0x1a7   : > { %2255 = vmatmul.mubr.f32.gmra.mrb[38].mxu0 %v5140_v33  ;;  %4499 = vmatprep.subr.bf16.mxu1 %v4498_v20  ;;  %v784_v20 = vld [vmem:[#allocation5 + $0xc20] sm:$0xff]  ;;  %v4518_v26 = vpack.c.bf16 %v795_v17, %v787_v16  ;;  %v5155_v10 = vld [vmem:[%s5683_s25 + $0x218] sm:$0xff]  ;;  %v858_v16 = vld [vmem:[#allocation5 + $0xe70] sm:$0xff] }
 0x1a8   : > { %2738 = vmatmul.mubr.f32.gmra.mrb[38].mxu1 %v5140_v33  ;;  %4309 = vmatpush1.bf16.msra.mxu0 %v4308_v23  ;;  %v786_v23 = vld [vmem:[#allocation5 + $0xc30] sm:$0xff]  ;;  %v4328_v29 = vpack.c.bf16 %v792_v21, %v784_v20  ;;  %v873_v20 = vld [vmem:[#allocation5 + $0xee8] sm:$0xff] }
 0x1a9   : > { %4501 = vmatpush1.bf16.msra.mxu1 %v4500_v27  ;;  %2260 = vmatprep.mubr.f32.mxu0 %v5141_v40  ;;  %v801_v27 = vld [vmem:[#allocation5 + $0xca8] sm:$0xff]  ;;  %v4520_v33 = vpack.c.bf16 %v794_v24, %v786_v23  ;;  %v5156_v17 = vld [vmem:[%s5683_s25 + $0x210] sm:$0xff]  ;;  %v875_v23 = vld [vmem:[#allocation5 + $0xef8] sm:$0xff] }
 0x1aa   : > { %2743 = vmatprep.mubr.f32.mxu1 %v5141_v40  ;;  %4311 = vmatprep.subr.bf16.mxu0 %v4310_v30  ;;  %v803_v30 = vld [vmem:[#allocation5 + $0xcb8] sm:$0xff]  ;;  %v4330_v36 = vpack.c.bf16 %v809_v28, %v801_v27  ;;  %v5157_v24 = vld [vmem:[%s5683_s25 + $0x248] sm:$0xff]  ;;  %v872_v27 = vld [vmem:[#allocation5 + $0xee0] sm:$0xff] }
 0x1ab   : > { %2261 = vmatmul.mubr.f32.gmra.mrb[40].mxu0 %v5142_v47  ;;  %4503 = vmatprep.subr.bf16.mxu1 %v4502_v34  ;;  %v800_v34 = vld [vmem:[#allocation5 + $0xca0] sm:$0xff]  ;;  %v4522_v40 = vpack.c.bf16 %v811_v31, %v803_v30  ;;  %v874_v30 = vld [vmem:[#allocation5 + $0xef0] sm:$0xff] }
 0x1ac   : > { %2744 = vmatmul.mubr.f32.gmra.mrb[40].mxu1 %v5142_v47  ;;  %4313 = vmatpush1.bf16.msra.mxu0 %v4312_v37  ;;  %v802_v37 = vld [vmem:[#allocation5 + $0xcb0] sm:$0xff]  ;;  %v4332_v43 = vpack.c.bf16 %v808_v35, %v800_v34  ;;  %v5158_v31 = vld [vmem:[%s5683_s25 + $0x240] sm:$0xff]  ;;  %v889_v34 = vld [vmem:[#allocation5 + $0xf68] sm:$0xff] }
 0x1ad   : > { %4505 = vmatpush1.bf16.msra.mxu1 %v4504_v41  ;;  %2266 = vmatprep.mubr.f32.mxu0 %v5143_v54  ;;  %v817_v41 = vld [vmem:[#allocation5 + $0xd28] sm:$0xff]  ;;  %v4524_v47 = vpack.c.bf16 %v810_v38, %v802_v37  ;;  %v891_v37 = vld [vmem:[#allocation5 + $0xf78] sm:$0xff] }
 0x1ae   : > { %2749 = vmatprep.mubr.f32.mxu1 %v5143_v54  ;;  %4315 = vmatprep.subr.bf16.mxu0 %v4314_v44  ;;  %v819_v44 = vld [vmem:[#allocation5 + $0xd38] sm:$0xff]  ;;  %v4334_v50 = vpack.c.bf16 %v825_v42, %v817_v41  ;;  %v888_v41 = vld [vmem:[#allocation5 + $0xf60] sm:$0xff] }
 0x1af   : > { %2267 = vmatmul.mubr.f32.gmra.mrb[42].mxu0 %v5144_v61  ;;  %4507 = vmatprep.subr.bf16.mxu1 %v4506_v48  ;;  %v816_v48 = vld [vmem:[#allocation5 + $0xd20] sm:$0xff]  ;;  %v4526_v54 = vpack.c.bf16 %v827_v45, %v819_v44  ;;  %v5159_v38 = vld [vmem:[%s5683_s25 + $0x278] sm:$0xff]  ;;  %v890_v44 = vld [vmem:[#allocation5 + $0xf70] sm:$0xff] }
 0x1b0   : > { %2750 = vmatmul.mubr.f32.gmra.mrb[42].mxu1 %v5144_v61  ;;  %4317 = vmatpush1.bf16.msra.mxu0 %v4316_v51  ;;  %v818_v51 = vld [vmem:[#allocation5 + $0xd30] sm:$0xff]  ;;  %v4336_v57 = vpack.c.bf16 %v824_v49, %v816_v48  ;;  %v905_v48 = vld [vmem:[#allocation5 + $0xfe8] sm:$0xff] }
 0x1b1   : > { %4509 = vmatpush1.bf16.msra.mxu1 %v4508_v55  ;;  %2272 = vmatprep.mubr.f32.mxu0 %v5145_v4  ;;  %v833_v55 = vld [vmem:[#allocation5 + $0xda8] sm:$0xff]  ;;  %v4528_v61 = vpack.c.bf16 %v826_v52, %v818_v51  ;;  %v5160_v45 = vld [vmem:[%s5683_s25 + $0x270] sm:$0xff]  ;;  %v907_v51 = vld [vmem:[#allocation5 + $0xff8] sm:$0xff] }
 0x1b2   : > { %2755 = vmatprep.mubr.f32.mxu1 %v5145_v4  ;;  %4319 = vmatprep.subr.bf16.mxu0 %v4318_v58  ;;  %v835_v58 = vld [vmem:[#allocation5 + $0xdb8] sm:$0xff]  ;;  %v4338_v0 = vpack.c.bf16 %v841_v56, %v833_v55  ;;  %v5161_v52 = vld [vmem:[%s5683_s25 + $0x2a8] sm:$0xff]  ;;  %v904_v55 = vld [vmem:[#allocation5 + $0xfe0] sm:$0xff] }
 0x1b3   : > { %2273 = vmatmul.mubr.f32.gmra.mrb[44].mxu0 %v5146_v11  ;;  %4511 = vmatprep.subr.bf16.mxu1 %v4510_v62  ;;  %v832_v62 = vld [vmem:[#allocation5 + $0xda0] sm:$0xff]  ;;  %v4530_v4 = vpack.c.bf16 %v843_v59, %v835_v58  ;;  %v906_v58 = vld [vmem:[#allocation5 + $0xff0] sm:$0xff] }
 0x1b4   : > { %2756 = vmatmul.mubr.f32.gmra.mrb[44].mxu1 %v5146_v11  ;;  %4321 = vmatpush1.bf16.msra.mxu0 %v4320_v1  ;;  %v834_v1 = vld [vmem:[#allocation5 + $0xdb0] sm:$0xff]  ;;  %v4340_v7 = vpack.c.bf16 %v840_v63, %v832_v62  ;;  %v5162_v59 = vld [vmem:[%s5683_s25 + $0x2a0] sm:$0xff]  ;;  %v921_v62 = vld [vmem:[#allocation5 + $0x1068] sm:$0xff] }
 0x1b5   : > { %4513 = vmatpush1.bf16.msra.mxu1 %v4512_v5  ;;  %2278 = vmatprep.mubr.f32.mxu0 %v5147_v18  ;;  %v849_v5 = vld [vmem:[#allocation5 + $0xe28] sm:$0xff]  ;;  %v4532_v11 = vpack.c.bf16 %v842_v2, %v834_v1  ;;  %v923_v1 = vld [vmem:[#allocation5 + $0x1078] sm:$0xff] }
 0x1b6   : > { %2761 = vmatprep.mubr.f32.mxu1 %v5147_v18  ;;  %4323 = vmatprep.subr.bf16.mxu0 %v4322_v8  ;;  %v851_v8 = vld [vmem:[#allocation5 + $0xe38] sm:$0xff]  ;;  %v4342_v14 = vpack.c.bf16 %v857_v6, %v849_v5  ;;  %v920_v5 = vld [vmem:[#allocation5 + $0x1060] sm:$0xff] }
 0x1b7   : > { %2279 = vmatmul.mubr.f32.gmra.mrb[46].mxu0 %v5148_v25  ;;  %4515 = vmatprep.subr.bf16.mxu1 %v4514_v12  ;;  %v848_v12 = vld [vmem:[#allocation5 + $0xe20] sm:$0xff]  ;;  %v4534_v18 = vpack.c.bf16 %v859_v9, %v851_v8  ;;  %v5163_v2 = vld [vmem:[%s5683_s25 + $0x2d8] sm:$0xff]  ;;  %v922_v8 = vld [vmem:[#allocation5 + $0x1070] sm:$0xff] }
 0x1b8   : > { %2762 = vmatmul.mubr.f32.gmra.mrb[46].mxu1 %v5148_v25  ;;  %4325 = vmatpush1.bf16.msra.mxu0 %v4324_v15  ;;  %v850_v15 = vld [vmem:[#allocation5 + $0xe30] sm:$0xff]  ;;  %v4344_v21 = vpack.c.bf16 %v856_v13, %v848_v12  ;;  %v937_v12 = vld [vmem:[#allocation5 + $0x10e8] sm:$0xff] }
 0x1b9   : > { %4517 = vmatpush1.bf16.msra.mxu1 %v4516_v19  ;;  %2284 = vmatprep.mubr.f32.mxu0 %v5149_v32  ;;  %v865_v19 = vld [vmem:[#allocation5 + $0xea8] sm:$0xff]  ;;  %v4536_v25 = vpack.c.bf16 %v858_v16, %v850_v15  ;;  %v5164_v9 = vld [vmem:[%s5683_s25 + $0x2d0] sm:$0xff]  ;;  %v939_v15 = vld [vmem:[#allocation5 + $0x10f8] sm:$0xff] }
 0x1ba   : > { %2767 = vmatprep.mubr.f32.mxu1 %v5149_v32  ;;  %4327 = vmatprep.subr.bf16.mxu0 %v4326_v22  ;;  %v867_v22 = vld [vmem:[#allocation5 + $0xeb8] sm:$0xff]  ;;  %v4346_v28 = vpack.c.bf16 %v873_v20, %v865_v19  ;;  %v936_v19 = vld [vmem:[#allocation5 + $0x10e0] sm:$0xff] }
 0x1bb   : > { %2285 = vmatmul.mubr.f32.gmra.mrb[48].mxu0 %v5150_v39  ;;  %4519 = vmatprep.subr.bf16.mxu1 %v4518_v26  ;;  %v864_v26 = vld [vmem:[#allocation5 + $0xea0] sm:$0xff]  ;;  %v4538_v32 = vpack.c.bf16 %v875_v23, %v867_v22  ;;  %v5165_v16 = vld [vmem:[%s5683_s25 + $0x18] sm:$0xff]  ;;  %v938_v22 = vld [vmem:[#allocation5 + $0x10f0] sm:$0xff] }
 0x1bc   : > { %2768 = vmatmul.mubr.f32.gmra.mrb[48].mxu1 %v5150_v39  ;;  %4329 = vmatpush1.bf16.msra.mxu0 %v4328_v29  ;;  %v866_v29 = vld [vmem:[#allocation5 + $0xeb0] sm:$0xff]  ;;  %v4348_v35 = vpack.c.bf16 %v872_v27, %v864_v26  ;;  %v953_v26 = vld [vmem:[#allocation5 + $0x1168] sm:$0xff] }
 0x1bd   : > { %4521 = vmatpush1.bf16.msra.mxu1 %v4520_v33  ;;  %2290 = vmatprep.mubr.f32.mxu0 %v5151_v46  ;;  %v881_v33 = vld [vmem:[#allocation5 + $0xf28] sm:$0xff]  ;;  %v4540_v39 = vpack.c.bf16 %v874_v30, %v866_v29  ;;  %v5166_v23 = vld [vmem:[%s5683_s25 + $0x10] sm:$0xff]  ;;  %v955_v29 = vld [vmem:[#allocation5 + $0x1178] sm:$0xff] }
 0x1be   : > { %2773 = vmatprep.mubr.f32.mxu1 %v5151_v46  ;;  %4331 = vmatprep.subr.bf16.mxu0 %v4330_v36  ;;  %v883_v36 = vld [vmem:[#allocation5 + $0xf38] sm:$0xff]  ;;  %v4350_v42 = vpack.c.bf16 %v889_v34, %v881_v33  ;;  %v5167_v30 = vld [vmem:[%s5683_s25 + $0x48] sm:$0xff]  ;;  %v952_v33 = vld [vmem:[#allocation5 + $0x1160] sm:$0xff] }
 0x1bf   : > { %2291 = vmatmul.mubr.f32.gmra.mrb[50].mxu0 %v5152_v53  ;;  %4523 = vmatprep.subr.bf16.mxu1 %v4522_v40  ;;  %v880_v40 = vld [vmem:[#allocation5 + $0xf20] sm:$0xff]  ;;  %v4542_v46 = vpack.c.bf16 %v891_v37, %v883_v36  ;;  %v954_v36 = vld [vmem:[#allocation5 + $0x1170] sm:$0xff] }
 0x1c0   : > { %2774 = vmatmul.mubr.f32.gmra.mrb[50].mxu1 %v5152_v53  ;;  %4333 = vmatpush1.bf16.msra.mxu0 %v4332_v43  ;;  %v882_v43 = vld [vmem:[#allocation5 + $0xf30] sm:$0xff]  ;;  %v4352_v49 = vpack.c.bf16 %v888_v41, %v880_v40  ;;  %v5168_v37 = vld [vmem:[%s5683_s25 + $0x40] sm:$0xff]  ;;  %v969_v40 = vld [vmem:[#allocation5 + $0x11e8] sm:$0xff] }
 0x1c1   : > { %4525 = vmatpush1.bf16.msra.mxu1 %v4524_v47  ;;  %2296 = vmatprep.mubr.f32.mxu0 %v5153_v60  ;;  %v897_v47 = vld [vmem:[#allocation5 + $0xfa8] sm:$0xff]  ;;  %v4544_v53 = vpack.c.bf16 %v890_v44, %v882_v43  ;;  %v971_v43 = vld [vmem:[#allocation5 + $0x11f8] sm:$0xff] }
 0x1c2   : > { %2779 = vmatprep.mubr.f32.mxu1 %v5153_v60  ;;  %4335 = vmatprep.subr.bf16.mxu0 %v4334_v50  ;;  %v899_v50 = vld [vmem:[#allocation5 + $0xfb8] sm:$0xff]  ;;  %v4354_v56 = vpack.c.bf16 %v905_v48, %v897_v47  ;;  %v968_v47 = vld [vmem:[#allocation5 + $0x11e0] sm:$0xff] }
 0x1c3   : > { %2297 = vmatmul.mubr.f32.gmra.mrb[52].mxu0 %v5154_v3  ;;  %4527 = vmatprep.subr.bf16.mxu1 %v4526_v54  ;;  %v896_v54 = vld [vmem:[#allocation5 + $0xfa0] sm:$0xff]  ;;  %v4546_v60 = vpack.c.bf16 %v907_v51, %v899_v50  ;;  %v5169_v44 = vld [vmem:[%s5683_s25 + $0x78] sm:$0xff]  ;;  %v970_v50 = vld [vmem:[#allocation5 + $0x11f0] sm:$0xff] }
 0x1c4   : > { %2780 = vmatmul.mubr.f32.gmra.mrb[52].mxu1 %v5154_v3  ;;  %4337 = vmatpush1.bf16.msra.mxu0 %v4336_v57  ;;  %v898_v57 = vld [vmem:[#allocation5 + $0xfb0] sm:$0xff]  ;;  %v4356_v63 = vpack.c.bf16 %v904_v55, %v896_v54  ;;  %v985_v54 = vld [vmem:[#allocation5 + $0x1268] sm:$0xff] }
 0x1c5   : > { %4529 = vmatpush1.bf16.msra.mxu1 %v4528_v61  ;;  %2302 = vmatprep.mubr.f32.mxu0 %v5155_v10  ;;  %v913_v61 = vld [vmem:[#allocation5 + $0x1028] sm:$0xff]  ;;  %v4548_v3 = vpack.c.bf16 %v906_v58, %v898_v57  ;;  %v5170_v51 = vld [vmem:[%s5683_s25 + $0x70] sm:$0xff]  ;;  %v987_v57 = vld [vmem:[#allocation5 + $0x1278] sm:$0xff] }
 0x1c6   : > { %2785 = vmatprep.mubr.f32.mxu1 %v5155_v10  ;;  %4339 = vmatprep.subr.bf16.mxu0 %v4338_v0  ;;  %v915_v0 = vld [vmem:[#allocation5 + $0x1038] sm:$0xff]  ;;  %v4358_v6 = vpack.c.bf16 %v921_v62, %v913_v61  ;;  %v5171_v58 = vld [vmem:[%s5683_s25 + $0xa8] sm:$0xff]  ;;  %v984_v61 = vld [vmem:[#allocation5 + $0x1260] sm:$0xff] }
 0x1c7   : > { %2303 = vmatmul.mubr.f32.gmra.mrb[54].mxu0 %v5156_v17  ;;  %4531 = vmatprep.subr.bf16.mxu1 %v4530_v4  ;;  %v912_v4 = vld [vmem:[#allocation5 + $0x1020] sm:$0xff]  ;;  %v4550_v10 = vpack.c.bf16 %v923_v1, %v915_v0  ;;  %v986_v0 = vld [vmem:[#allocation5 + $0x1270] sm:$0xff] }
 0x1c8   : > { %2786 = vmatmul.mubr.f32.gmra.mrb[54].mxu1 %v5156_v17  ;;  %4341 = vmatpush1.bf16.msra.mxu0 %v4340_v7  ;;  %v914_v7 = vld [vmem:[#allocation5 + $0x1030] sm:$0xff]  ;;  %v4360_v13 = vpack.c.bf16 %v920_v5, %v912_v4  ;;  %v5172_v1 = vld [vmem:[%s5683_s25 + $0xa0] sm:$0xff]  ;;  %v1001_v4 = vld [vmem:[#allocation5 + $0x12e8] sm:$0xff] }
 0x1c9   : > { %4533 = vmatpush1.bf16.msra.mxu1 %v4532_v11  ;;  %2308 = vmatprep.mubr.f32.mxu0 %v5157_v24  ;;  %v929_v11 = vld [vmem:[#allocation5 + $0x10a8] sm:$0xff]  ;;  %v4552_v17 = vpack.c.bf16 %v922_v8, %v914_v7  ;;  %v1003_v7 = vld [vmem:[#allocation5 + $0x12f8] sm:$0xff] }
 0x1ca   : > { %2791 = vmatprep.mubr.f32.mxu1 %v5157_v24  ;;  %4343 = vmatprep.subr.bf16.mxu0 %v4342_v14  ;;  %v931_v14 = vld [vmem:[#allocation5 + $0x10b8] sm:$0xff]  ;;  %v4362_v20 = vpack.c.bf16 %v937_v12, %v929_v11  ;;  %v1000_v11 = vld [vmem:[#allocation5 + $0x12e0] sm:$0xff] }
 0x1cb   : > { %2309 = vmatmul.mubr.f32.gmra.mrb[56].mxu0 %v5158_v31  ;;  %4535 = vmatprep.subr.bf16.mxu1 %v4534_v18  ;;  %v928_v18 = vld [vmem:[#allocation5 + $0x10a0] sm:$0xff]  ;;  %v4554_v24 = vpack.c.bf16 %v939_v15, %v931_v14  ;;  %v5173_v8 = vld [vmem:[%s5683_s25 + $0xd8] sm:$0xff]  ;;  %v1002_v14 = vld [vmem:[#allocation5 + $0x12f0] sm:$0xff] }
 0x1cc   : > { %2792 = vmatmul.mubr.f32.gmra.mrb[56].mxu1 %v5158_v31  ;;  %4345 = vmatpush1.bf16.msra.mxu0 %v4344_v21  ;;  %v930_v21 = vld [vmem:[#allocation5 + $0x10b0] sm:$0xff]  ;;  %v4364_v27 = vpack.c.bf16 %v936_v19, %v928_v18  ;;  %v1017_v18 = vld [vmem:[#allocation5 + $0x1368] sm:$0xff] }
 0x1cd   : > { %4537 = vmatpush1.bf16.msra.mxu1 %v4536_v25  ;;  %2314 = vmatprep.mubr.f32.mxu0 %v5159_v38  ;;  %v945_v25 = vld [vmem:[#allocation5 + $0x1128] sm:$0xff]  ;;  %v4556_v31 = vpack.c.bf16 %v938_v22, %v930_v21  ;;  %v5174_v15 = vld [vmem:[%s5683_s25 + $0xd0] sm:$0xff]  ;;  %v1019_v21 = vld [vmem:[#allocation5 + $0x1378] sm:$0xff] }
 0x1ce   : > { %2797 = vmatprep.mubr.f32.mxu1 %v5159_v38  ;;  %4347 = vmatprep.subr.bf16.mxu0 %v4346_v28  ;;  %v947_v28 = vld [vmem:[#allocation5 + $0x1138] sm:$0xff]  ;;  %v4366_v34 = vpack.c.bf16 %v953_v26, %v945_v25  ;;  %v5175_v22 = vld [vmem:[%s5683_s25 + $0x108] sm:$0xff]  ;;  %v1016_v25 = vld [vmem:[#allocation5 + $0x1360] sm:$0xff] }
 0x1cf   : > { %2315 = vmatmul.mubr.f32.gmra.mrb[58].mxu0 %v5160_v45  ;;  %4539 = vmatprep.subr.bf16.mxu1 %v4538_v32  ;;  %v944_v32 = vld [vmem:[#allocation5 + $0x1120] sm:$0xff]  ;;  %v4558_v38 = vpack.c.bf16 %v955_v29, %v947_v28  ;;  %v1018_v28 = vld [vmem:[#allocation5 + $0x1370] sm:$0xff] }
 0x1d0   : > { %2798 = vmatmul.mubr.f32.gmra.mrb[58].mxu1 %v5160_v45  ;;  %4349 = vmatpush1.bf16.msra.mxu0 %v4348_v35  ;;  %v946_v35 = vld [vmem:[#allocation5 + $0x1130] sm:$0xff]  ;;  %v4368_v41 = vpack.c.bf16 %v952_v33, %v944_v32  ;;  %v5176_v29 = vld [vmem:[%s5683_s25 + $0x100] sm:$0xff]  ;;  %v1033_v32 = vld [vmem:[#allocation5 + $0x13e8] sm:$0xff] }
 0x1d1   : > { %4541 = vmatpush1.bf16.msra.mxu1 %v4540_v39  ;;  %2320 = vmatprep.mubr.f32.mxu0 %v5161_v52  ;;  %v961_v39 = vld [vmem:[#allocation5 + $0x11a8] sm:$0xff]  ;;  %v4560_v45 = vpack.c.bf16 %v954_v36, %v946_v35  ;;  %v1035_v35 = vld [vmem:[#allocation5 + $0x13f8] sm:$0xff] }
 0x1d2   : > { %2803 = vmatprep.mubr.f32.mxu1 %v5161_v52  ;;  %4351 = vmatprep.subr.bf16.mxu0 %v4350_v42  ;;  %v963_v42 = vld [vmem:[#allocation5 + $0x11b8] sm:$0xff]  ;;  %v4370_v48 = vpack.c.bf16 %v969_v40, %v961_v39  ;;  %v1032_v39 = vld [vmem:[#allocation5 + $0x13e0] sm:$0xff] }
 0x1d3   : > { %2321 = vmatmul.mubr.f32.gmra.mrb[60].mxu0 %v5162_v59  ;;  %4543 = vmatprep.subr.bf16.mxu1 %v4542_v46  ;;  %v960_v46 = vld [vmem:[#allocation5 + $0x11a0] sm:$0xff]  ;;  %v4562_v52 = vpack.c.bf16 %v971_v43, %v963_v42  ;;  %v5177_v36 = vld [vmem:[%s5683_s25 + $0x138] sm:$0xff]  ;;  %v1034_v42 = vld [vmem:[#allocation5 + $0x13f0] sm:$0xff] }
 0x1d4   : > { %2804 = vmatmul.mubr.f32.gmra.mrb[60].mxu1 %v5162_v59  ;;  %4353 = vmatpush1.bf16.msra.mxu0 %v4352_v49  ;;  %v962_v49 = vld [vmem:[#allocation5 + $0x11b0] sm:$0xff]  ;;  %v4372_v55 = vpack.c.bf16 %v968_v47, %v960_v46  ;;  %v1049_v46 = vld [vmem:[#allocation5 + $0x1468] sm:$0xff] }
 0x1d5   : > { %4545 = vmatpush1.bf16.msra.mxu1 %v4544_v53  ;;  %2326 = vmatprep.mubr.f32.mxu0 %v5163_v2  ;;  %v977_v53 = vld [vmem:[#allocation5 + $0x1228] sm:$0xff]  ;;  %v4564_v59 = vpack.c.bf16 %v970_v50, %v962_v49  ;;  %v5178_v43 = vld [vmem:[%s5683_s25 + $0x130] sm:$0xff]  ;;  %v1051_v49 = vld [vmem:[#allocation5 + $0x1478] sm:$0xff] }
 0x1d6   : > { %2809 = vmatprep.mubr.f32.mxu1 %v5163_v2  ;;  %4355 = vmatprep.subr.bf16.mxu0 %v4354_v56  ;;  %v979_v56 = vld [vmem:[#allocation5 + $0x1238] sm:$0xff]  ;;  %v4374_v62 = vpack.c.bf16 %v985_v54, %v977_v53  ;;  %v5179_v50 = vld [vmem:[%s5683_s25 + $0x168] sm:$0xff]  ;;  %v1048_v53 = vld [vmem:[#allocation5 + $0x1460] sm:$0xff] }
 0x1d7   : > { %2327 = vmatmul.mubr.f32.gmra.mrb[62].mxu0 %v5164_v9  ;;  %4547 = vmatprep.subr.bf16.mxu1 %v4546_v60  ;;  %v976_v60 = vld [vmem:[#allocation5 + $0x1220] sm:$0xff]  ;;  %v4566_v2 = vpack.c.bf16 %v987_v57, %v979_v56  ;;  %v1050_v56 = vld [vmem:[#allocation5 + $0x1470] sm:$0xff] }
 0x1d8   : > { %2810 = vmatmul.mubr.f32.gmra.mrb[62].mxu1 %v5164_v9  ;;  %4357 = vmatpush1.bf16.msra.mxu0 %v4356_v63  ;;  %v978_v63 = vld [vmem:[#allocation5 + $0x1230] sm:$0xff]  ;;  %v4376_v5 = vpack.c.bf16 %v984_v61, %v976_v60  ;;  %v5180_v57 = vld [vmem:[%s5683_s25 + $0x160] sm:$0xff]  ;;  %v1065_v60 = vld [vmem:[#allocation5 + $0x14e8] sm:$0xff] }
 0x1d9   : > { %4549 = vmatpush1.bf16.msra.mxu1 %v4548_v3  ;;  %2397 = vmatprep.mubr.f32.mxu0 %v5165_v16  ;;  %v993_v3 = vld [vmem:[#allocation5 + $0x12a8] sm:$0xff]  ;;  %v4568_v9 = vpack.c.bf16 %v986_v0, %v978_v63  ;;  %v1067_v63 = vld [vmem:[#allocation5 + $0x14f8] sm:$0xff] }
 0x1da   : > { %2880 = vmatprep.mubr.f32.mxu1 %v5165_v16  ;;  %4359 = vmatprep.subr.bf16.mxu0 %v4358_v6  ;;  %v995_v6 = vld [vmem:[#allocation5 + $0x12b8] sm:$0xff]  ;;  %v4378_v12 = vpack.c.bf16 %v1001_v4, %v993_v3  ;;  %v1064_v3 = vld [vmem:[#allocation5 + $0x14e0] sm:$0xff] }
 0x1db   : > { %2398 = vmatmul.mubr.f32.vlgmr.msra.gmra.mrb[32].mxu0 %v5166_v23  ;;  %4551 = vmatprep.subr.bf16.mxu1 %v4550_v10  ;;  %v992_v10 = vld [vmem:[#allocation5 + $0x12a0] sm:$0xff]  ;;  %v4570_v16 = vpack.c.bf16 %v1003_v7, %v995_v6  ;;  %v5181_v0 = vld [vmem:[%s5683_s25 + $0x198] sm:$0xff]  ;;  %v1066_v6 = vld [vmem:[#allocation5 + $0x14f0] sm:$0xff] }
 0x1dc   : > { %2881 = vmatmul.mubr.f32.vlgmr.msra.gmra.mrb[32].mxu1 %v5166_v23  ;;  %4361 = vmatpush1.bf16.msra.mxu0 %v4360_v13  ;;  %v994_v13 = vld [vmem:[#allocation5 + $0x12b0] sm:$0xff]  ;;  %v4380_v19 = vpack.c.bf16 %v1000_v11, %v992_v10  ;;  %v1081_v10 = vld [vmem:[#allocation5 + $0x1568] sm:$0xff] }
 0x1dd   : > { %4553 = vmatpush1.bf16.msra.mxu1 %v4552_v17  ;;  %2403 = vmatprep.mubr.f32.mxu0 %v5167_v30  ;;  %v1009_v17 = vld [vmem:[#allocation5 + $0x1328] sm:$0xff]  ;;  %v4572_v23 = vpack.c.bf16 %v1002_v14, %v994_v13  ;;  %v5182_v7 = vld [vmem:[%s5683_s25 + $0x190] sm:$0xff]  ;;  %v1083_v13 = vld [vmem:[#allocation5 + $0x1578] sm:$0xff] }
 0x1de   : > { %2886 = vmatprep.mubr.f32.mxu1 %v5167_v30  ;;  %4363 = vmatprep.subr.bf16.mxu0 %v4362_v20  ;;  %v1011_v20 = vld [vmem:[#allocation5 + $0x1338] sm:$0xff]  ;;  %v4382_v26 = vpack.c.bf16 %v1017_v18, %v1009_v17  ;;  %v5183_v14 = vld [vmem:[%s5683_s25 + $0x1c8] sm:$0xff]  ;;  %v1080_v17 = vld [vmem:[#allocation5 + $0x1560] sm:$0xff] }
 0x1df   : > { %2404 = vmatmul.mubr.f32.gmra.mrb[34].mxu0 %v5168_v37  ;;  %4555 = vmatprep.subr.bf16.mxu1 %v4554_v24  ;;  %v1008_v24 = vld [vmem:[#allocation5 + $0x1320] sm:$0xff]  ;;  %v4574_v30 = vpack.c.bf16 %v1019_v21, %v1011_v20  ;;  %v1082_v20 = vld [vmem:[#allocation5 + $0x1570] sm:$0xff] }
 0x1e0   : > { %2887 = vmatmul.mubr.f32.gmra.mrb[34].mxu1 %v5168_v37  ;;  %4365 = vmatpush1.bf16.msra.mxu0 %v4364_v27  ;;  %v1010_v27 = vld [vmem:[#allocation5 + $0x1330] sm:$0xff]  ;;  %v4384_v33 = vpack.c.bf16 %v1016_v25, %v1008_v24  ;;  %v5184_v21 = vld [vmem:[%s5683_s25 + $0x1c0] sm:$0xff]  ;;  %v1097_v24 = vld [vmem:[#allocation5 + $0x15e8] sm:$0xff] }
 0x1e1   : > { %4557 = vmatpush1.bf16.msra.mxu1 %v4556_v31  ;;  %2409 = vmatprep.mubr.f32.mxu0 %v5169_v44  ;;  %v1025_v31 = vld [vmem:[#allocation5 + $0x13a8] sm:$0xff]  ;;  %v4576_v37 = vpack.c.bf16 %v1018_v28, %v1010_v27  ;;  %v1099_v27 = vld [vmem:[#allocation5 + $0x15f8] sm:$0xff] }
 0x1e2   : > { %2892 = vmatprep.mubr.f32.mxu1 %v5169_v44  ;;  %4367 = vmatprep.subr.bf16.mxu0 %v4366_v34  ;;  %v1027_v34 = vld [vmem:[#allocation5 + $0x13b8] sm:$0xff]  ;;  %v4386_v40 = vpack.c.bf16 %v1033_v32, %v1025_v31  ;;  %v1096_v31 = vld [vmem:[#allocation5 + $0x15e0] sm:$0xff] }
 0x1e3   : > { %2410 = vmatmul.mubr.f32.gmra.mrb[36].mxu0 %v5170_v51  ;;  %4559 = vmatprep.subr.bf16.mxu1 %v4558_v38  ;;  %v1024_v38 = vld [vmem:[#allocation5 + $0x13a0] sm:$0xff]  ;;  %v4578_v44 = vpack.c.bf16 %v1035_v35, %v1027_v34  ;;  %v5185_v28 = vld [vmem:[%s5683_s25 + $0x1f8] sm:$0xff]  ;;  %v1098_v34 = vld [vmem:[#allocation5 + $0x15f0] sm:$0xff] }
 0x1e4   : > { %2893 = vmatmul.mubr.f32.gmra.mrb[36].mxu1 %v5170_v51  ;;  %4369 = vmatpush1.bf16.msra.mxu0 %v4368_v41  ;;  %v1026_v41 = vld [vmem:[#allocation5 + $0x13b0] sm:$0xff]  ;;  %v4388_v47 = vpack.c.bf16 %v1032_v39, %v1024_v38  ;;  %v1113_v38 = vld [vmem:[#allocation5 + $0x1668] sm:$0xff] }
 0x1e5   : > { %4561 = vmatpush1.bf16.msra.mxu1 %v4560_v45  ;;  %2415 = vmatprep.mubr.f32.mxu0 %v5171_v58  ;;  %v1041_v45 = vld [vmem:[#allocation5 + $0x1428] sm:$0xff]  ;;  %v4580_v51 = vpack.c.bf16 %v1034_v42, %v1026_v41  ;;  %v5186_v35 = vld [vmem:[%s5683_s25 + $0x1f0] sm:$0xff]  ;;  %v1115_v41 = vld [vmem:[#allocation5 + $0x1678] sm:$0xff] }
 0x1e6   : > { %2898 = vmatprep.mubr.f32.mxu1 %v5171_v58  ;;  %4371 = vmatprep.subr.bf16.mxu0 %v4370_v48  ;;  %v1043_v48 = vld [vmem:[#allocation5 + $0x1438] sm:$0xff]  ;;  %v4390_v54 = vpack.c.bf16 %v1049_v46, %v1041_v45  ;;  %v5187_v42 = vld [vmem:[%s5683_s25 + $0x228] sm:$0xff]  ;;  %v1112_v45 = vld [vmem:[#allocation5 + $0x1660] sm:$0xff] }
 0x1e7   : > { %2416 = vmatmul.mubr.f32.gmra.mrb[38].mxu0 %v5172_v1  ;;  %4563 = vmatprep.subr.bf16.mxu1 %v4562_v52  ;;  %v1040_v52 = vld [vmem:[#allocation5 + $0x1420] sm:$0xff]  ;;  %v4582_v58 = vpack.c.bf16 %v1051_v49, %v1043_v48  ;;  %v1114_v48 = vld [vmem:[#allocation5 + $0x1670] sm:$0xff] }
 0x1e8   : > { %2899 = vmatmul.mubr.f32.gmra.mrb[38].mxu1 %v5172_v1  ;;  %4373 = vmatpush1.bf16.msra.mxu0 %v4372_v55  ;;  %v1042_v55 = vld [vmem:[#allocation5 + $0x1430] sm:$0xff]  ;;  %v4392_v61 = vpack.c.bf16 %v1048_v53, %v1040_v52  ;;  %v5188_v49 = vld [vmem:[%s5683_s25 + $0x220] sm:$0xff]  ;;  %v1129_v52 = vld [vmem:[#allocation5 + $0x16e8] sm:$0xff] }
 0x1e9   : > { %4565 = vmatpush1.bf16.msra.mxu1 %v4564_v59  ;;  %2421 = vmatprep.mubr.f32.mxu0 %v5173_v8  ;;  %v1057_v59 = vld [vmem:[#allocation5 + $0x14a8] sm:$0xff]  ;;  %v4584_v1 = vpack.c.bf16 %v1050_v56, %v1042_v55  ;;  %v1131_v55 = vld [vmem:[#allocation5 + $0x16f8] sm:$0xff] }
 0x1ea   : > { %2904 = vmatprep.mubr.f32.mxu1 %v5173_v8  ;;  %4375 = vmatprep.subr.bf16.mxu0 %v4374_v62  ;;  %v1059_v62 = vld [vmem:[#allocation5 + $0x14b8] sm:$0xff]  ;;  %v4394_v4 = vpack.c.bf16 %v1065_v60, %v1057_v59  ;;  %v1128_v59 = vld [vmem:[#allocation5 + $0x16e0] sm:$0xff] }
 0x1eb   : > { %2422 = vmatmul.mubr.f32.gmra.mrb[40].mxu0 %v5174_v15  ;;  %4567 = vmatprep.subr.bf16.mxu1 %v4566_v2  ;;  %v1056_v2 = vld [vmem:[#allocation5 + $0x14a0] sm:$0xff]  ;;  %v4586_v8 = vpack.c.bf16 %v1067_v63, %v1059_v62  ;;  %v5189_v56 = vld [vmem:[%s5683_s25 + $0x258] sm:$0xff]  ;;  %v1130_v62 = vld [vmem:[#allocation5 + $0x16f0] sm:$0xff] }
 0x1ec   : > { %2905 = vmatmul.mubr.f32.gmra.mrb[40].mxu1 %v5174_v15  ;;  %4377 = vmatpush1.bf16.msra.mxu0 %v4376_v5  ;;  %v1058_v5 = vld [vmem:[#allocation5 + $0x14b0] sm:$0xff]  ;;  %v4396_v11 = vpack.c.bf16 %v1064_v3, %v1056_v2  ;;  %v1145_v2 = vld [vmem:[#allocation5 + $0x1768] sm:$0xff] }
 0x1ed   : > { %4569 = vmatpush1.bf16.msra.mxu1 %v4568_v9  ;;  %2427 = vmatprep.mubr.f32.mxu0 %v5175_v22  ;;  %v1073_v9 = vld [vmem:[#allocation5 + $0x1528] sm:$0xff]  ;;  %v4588_v15 = vpack.c.bf16 %v1066_v6, %v1058_v5  ;;  %v5190_v63 = vld [vmem:[%s5683_s25 + $0x250] sm:$0xff]  ;;  %v1147_v5 = vld [vmem:[#allocation5 + $0x1778] sm:$0xff] }
 0x1ee   : > { %2910 = vmatprep.mubr.f32.mxu1 %v5175_v22  ;;  %4379 = vmatprep.subr.bf16.mxu0 %v4378_v12  ;;  %v1075_v12 = vld [vmem:[#allocation5 + $0x1538] sm:$0xff]  ;;  %v4398_v18 = vpack.c.bf16 %v1081_v10, %v1073_v9  ;;  %v5191_v6 = vld [vmem:[%s5683_s25 + $0x288] sm:$0xff]  ;;  %v1144_v9 = vld [vmem:[#allocation5 + $0x1760] sm:$0xff] }
 0x1ef   : > { %2428 = vmatmul.mubr.f32.gmra.mrb[42].mxu0 %v5176_v29  ;;  %4571 = vmatprep.subr.bf16.mxu1 %v4570_v16  ;;  %v1072_v16 = vld [vmem:[#allocation5 + $0x1520] sm:$0xff]  ;;  %v4590_v22 = vpack.c.bf16 %v1083_v13, %v1075_v12  ;;  %v1146_v12 = vld [vmem:[#allocation5 + $0x1770] sm:$0xff] }
 0x1f0   : > { %2911 = vmatmul.mubr.f32.gmra.mrb[42].mxu1 %v5176_v29  ;;  %4381 = vmatpush1.bf16.msra.mxu0 %v4380_v19  ;;  %v1074_v19 = vld [vmem:[#allocation5 + $0x1530] sm:$0xff]  ;;  %v4400_v25 = vpack.c.bf16 %v1080_v17, %v1072_v16  ;;  %v5192_v13 = vld [vmem:[%s5683_s25 + $0x280] sm:$0xff]  ;;  %v1161_v16 = vld [vmem:[#allocation5 + $0x17e8] sm:$0xff] }
 0x1f1   : > { %4573 = vmatpush1.bf16.msra.mxu1 %v4572_v23  ;;  %2433 = vmatprep.mubr.f32.mxu0 %v5177_v36  ;;  %v1089_v23 = vld [vmem:[#allocation5 + $0x15a8] sm:$0xff]  ;;  %v4592_v29 = vpack.c.bf16 %v1082_v20, %v1074_v19  ;;  %v1163_v19 = vld [vmem:[#allocation5 + $0x17f8] sm:$0xff] }
 0x1f2   : > { %2916 = vmatprep.mubr.f32.mxu1 %v5177_v36  ;;  %4383 = vmatprep.subr.bf16.mxu0 %v4382_v26  ;;  %v1091_v26 = vld [vmem:[#allocation5 + $0x15b8] sm:$0xff]  ;;  %v4402_v32 = vpack.c.bf16 %v1097_v24, %v1089_v23  ;;  %v1160_v23 = vld [vmem:[#allocation5 + $0x17e0] sm:$0xff] }
 0x1f3   : > { %2434 = vmatmul.mubr.f32.gmra.mrb[44].mxu0 %v5178_v43  ;;  %4575 = vmatprep.subr.bf16.mxu1 %v4574_v30  ;;  %v1088_v30 = vld [vmem:[#allocation5 + $0x15a0] sm:$0xff]  ;;  %v4594_v36 = vpack.c.bf16 %v1099_v27, %v1091_v26  ;;  %v5193_v20 = vld [vmem:[%s5683_s25 + $0x2b8] sm:$0xff]  ;;  %v1162_v26 = vld [vmem:[#allocation5 + $0x17f0] sm:$0xff] }
 0x1f4   : > { %2917 = vmatmul.mubr.f32.gmra.mrb[44].mxu1 %v5178_v43  ;;  %4385 = vmatpush1.bf16.msra.mxu0 %v4384_v33  ;;  %v1090_v33 = vld [vmem:[#allocation5 + $0x15b0] sm:$0xff]  ;;  %v4404_v39 = vpack.c.bf16 %v1096_v31, %v1088_v30  ;;  %v5195_v30 = vld [vmem:[%s5683_s25 + $0x2e8] sm:$0xff] }
 0x1f5   : > { %4577 = vmatpush1.bf16.msra.mxu1 %v4576_v37  ;;  %2439 = vmatprep.mubr.f32.mxu0 %v5179_v50  ;;  %v1105_v37 = vld [vmem:[#allocation5 + $0x1628] sm:$0xff]  ;;  %v4596_v43 = vpack.c.bf16 %v1098_v34, %v1090_v33  ;;  %v5194_v27 = vld [vmem:[%s5683_s25 + $0x2b0] sm:$0xff]  ;;  %v5198_v34 = vld [vmem:[%s5683_s25 + $0x20] sm:$0xff] }
 0x1f6   : > { %2922 = vmatprep.mubr.f32.mxu1 %v5179_v50  ;;  %4387 = vmatprep.subr.bf16.mxu0 %v4386_v40  ;;  %v1107_v40 = vld [vmem:[#allocation5 + $0x1638] sm:$0xff]  ;;  %v4406_v46 = vpack.c.bf16 %v1113_v38, %v1105_v37  ;;  %v5197_v33 = vld [vmem:[%s5683_s25 + $0x28] sm:$0xff]  ;;  %v1166_v37 = vlaneseq }
 0x1f7   : > { %2440 = vmatmul.mubr.f32.gmra.mrb[46].mxu0 %v5180_v57  ;;  %4579 = vmatprep.subr.bf16.mxu1 %v4578_v44  ;;  %v1104_v44 = vld [vmem:[#allocation5 + $0x1620] sm:$0xff]  ;;  %v4598_v50 = vpack.c.bf16 %v1115_v41, %v1107_v40  ;;  %v5201_v38 = vld [vmem:[%s5683_s25 + $0x88] sm:$0xff]  ;;  %v5203_v41 = vld [vmem:[%s5683_s25 + $0xb8] sm:$0xff] }
 0x1f8   : > { %2923 = vmatmul.mubr.f32.gmra.mrb[46].mxu1 %v5180_v57  ;;  %4389 = vmatpush1.bf16.msra.mxu0 %v4388_v47  ;;  %v1106_v47 = vld [vmem:[#allocation5 + $0x1630] sm:$0xff]  ;;  %v4408_v53 = vpack.c.bf16 %v1112_v45, %v1104_v44  ;;  %v5863_v40 = vshrl.u32 %v1166_v37, 7  ;;  %v5205_v44 = vld [vmem:[%s5683_s25 + $0xe8] sm:$0xff]  ;;  %v5869_v45 = vld [vmem:[#allocation7] sm:$0xff] }
 0x1f9   : > { %4581 = vmatpush1.bf16.msra.mxu1 %v4580_v51  ;;  %2445 = vmatprep.mubr.f32.mxu0 %v5181_v0  ;;  %v1121_v51 = vld [vmem:[#allocation5 + $0x16a8] sm:$0xff]  ;;  %v4600_v57 = vpack.c.bf16 %v1114_v48, %v1106_v47 }
 0x1fa   : > { %2928 = vmatprep.mubr.f32.mxu1 %v5181_v0  ;;  %4391 = vmatprep.subr.bf16.mxu0 %v4390_v54  ;;  %v1123_v54 = vld [vmem:[#allocation5 + $0x16b8] sm:$0xff]  ;;  %v4410_v60 = vpack.c.bf16 %v1129_v52, %v1121_v51  ;;  %v1172_v47 = vsub.s32 1, %v5863_v40  ;;  %v5873_v48 = vld [vmem:[#allocation8] sm:$0xff] }
 0x1fb   : > { %2446 = vmatmul.mubr.f32.gmra.mrb[48].mxu0 %v5182_v7  ;;  %4583 = vmatprep.subr.bf16.mxu1 %v4582_v58  ;;  %v1120_v58 = vld [vmem:[#allocation5 + $0x16a0] sm:$0xff]  ;;  %v4602_v0 = vpack.c.bf16 %v1131_v55, %v1123_v54 }
 0x1fc   : > { %2929 = vmatmul.mubr.f32.gmra.mrb[48].mxu1 %v5182_v7  ;;  %4393 = vmatpush1.bf16.msra.mxu0 %v4392_v61  ;;  %v1122_v61 = vld [vmem:[#allocation5 + $0x16b0] sm:$0xff]  ;;  %v4412_v3 = vpack.c.bf16 %v1128_v59, %v1120_v58  ;;  %v5885_v54 = vrot.slane %v5869_v45, %v1172_v47 }
 0x1fd   : > { %4585 = vmatpush1.bf16.msra.mxu1 %v4584_v1  ;;  %2451 = vmatprep.mubr.f32.mxu0 %v5183_v14  ;;  %v1137_v1 = vld [vmem:[#allocation5 + $0x1728] sm:$0xff]  ;;  %v4604_v7 = vpack.c.bf16 %v1130_v62, %v1122_v61 }
 0x1fe   : > { %2934 = vmatprep.mubr.f32.mxu1 %v5183_v14  ;;  %4395 = vmatprep.subr.bf16.mxu0 %v4394_v4  ;;  %v1139_v4 = vld [vmem:[#allocation5 + $0x1738] sm:$0xff]  ;;  %v4414_v10 = vpack.c.bf16 %v1145_v2, %v1137_v1 }
 0x1ff   : > { %2452 = vmatmul.mubr.f32.gmra.mrb[50].mxu0 %v5184_v21  ;;  %4587 = vmatprep.subr.bf16.mxu1 %v4586_v8  ;;  %v1136_v8 = vld [vmem:[#allocation5 + $0x1720] sm:$0xff]  ;;  %v4606_v14 = vpack.c.bf16 %v1147_v5, %v1139_v4 }
 0x200   : > { %2935 = vmatmul.mubr.f32.gmra.mrb[50].mxu1 %v5184_v21  ;;  %4397 = vmatpush1.bf16.msra.mxu0 %v4396_v11  ;;  %v1138_v11 = vld [vmem:[#allocation5 + $0x1730] sm:$0xff]  ;;  %v4416_v17 = vpack.c.bf16 %v1144_v9, %v1136_v8 }
 0x201   : > { %4589 = vmatpush1.bf16.msra.mxu1 %v4588_v15  ;;  %2457 = vmatprep.mubr.f32.mxu0 %v5185_v28  ;;  %v1153_v15 = vld [vmem:[#allocation5 + $0x17a8] sm:$0xff]  ;;  %v4608_v21 = vpack.c.bf16 %v1146_v12, %v1138_v11 }
 0x202   : > { %2940 = vmatprep.mubr.f32.mxu1 %v5185_v28  ;;  %4399 = vmatprep.subr.bf16.mxu0 %v4398_v18  ;;  %v1155_v18 = vld [vmem:[#allocation5 + $0x17b8] sm:$0xff]  ;;  %v4418_v24 = vpack.c.bf16 %v1161_v16, %v1153_v15 }
 0x203   : > { %2458 = vmatmul.mubr.f32.gmra.mrb[52].mxu0 %v5186_v35  ;;  %4591 = vmatprep.subr.bf16.mxu1 %v4590_v22  ;;  %v1152_v22 = vld [vmem:[#allocation5 + $0x17a0] sm:$0xff]  ;;  %v4610_v28 = vpack.c.bf16 %v1163_v19, %v1155_v18  ;;  %v5211_v18 = vld [vmem:[%s5683_s25 + $0x178] sm:$0xff] }
 0x204   : > { %2941 = vmatmul.mubr.f32.gmra.mrb[52].mxu1 %v5186_v35  ;;  %4401 = vmatpush1.bf16.msra.mxu0 %v4400_v25  ;;  %v1154_v25 = vld [vmem:[#allocation5 + $0x17b0] sm:$0xff]  ;;  %v5199_v35 = vld [vmem:[%s5683_s25 + $0x58] sm:$0xff] }
 0x205   : > { %4593 = vmatpush1.bf16.msra.mxu1 %v4592_v29  ;;  %2463 = vmatprep.mubr.f32.mxu0 %v5187_v42  ;;  %v4420_v29 = vpack.c.bf16 %v1160_v23, %v1152_v22  ;;  %v4612_v31 = vpack.c.bf16 %v1162_v26, %v1154_v25 }
 0x206   : > { %2946 = vmatprep.mubr.f32.mxu1 %v5187_v42  ;;  %4403 = vmatprep.subr.bf16.mxu0 %v4402_v32  ;;  %v5196_v32 = vld [vmem:[%s5683_s25 + $0x2e0] sm:$0xff]  ;;  %v5204_v42 = vld [vmem:[%s5683_s25 + $0xb0] sm:$0xff] }
 0x207   : > { %2464 = vmatmul.mubr.f32.gmra.mrb[54].mxu0 %v5188_v49  ;;  %4595 = vmatprep.subr.bf16.mxu1 %v4594_v36  ;;  %v5200_v36 = vld [vmem:[%s5683_s25 + $0x50] sm:$0xff] }
 0x208   : > { %2947 = vmatmul.mubr.f32.gmra.mrb[54].mxu1 %v5188_v49  ;;  %4405 = vmatpush1.bf16.msra.mxu0 %v4404_v39  ;;  %v5202_v39 = vld [vmem:[%s5683_s25 + $0x80] sm:$0xff]  ;;  %v1180_v49 = vsub.s32 3, %v5863_v40 }
 0x209   : > { %4597 = vmatpush1.bf16.msra.mxu1 %v4596_v43  ;;  %2469 = vmatprep.mubr.f32.mxu0 %v5189_v56  ;;  %v1168_v43 = vsub.s32 0, %v5863_v40 }
 0x20a   : > { %2952 = vmatprep.mubr.f32.mxu1 %v5189_v56  ;;  %4407 = vmatprep.subr.bf16.mxu0 %v4406_v46  ;;  %v1176_v46 = vsub.s32 2, %v5863_v40  ;;  %v5894_v58 = vrot.slane %v5869_v45, %v1180_v49 }
 0x20b   : > { %2470 = vmatmul.mubr.f32.gmra.mrb[56].mxu0 %v5190_v63  ;;  %4599 = vmatprep.subr.bf16.mxu1 %v4598_v50  ;;  %v5206_v50 = vld [vmem:[%s5683_s25 + $0xe0] sm:$0xff]  ;;  %v5878_v51 = vrot.slane %v5869_v45, %v1168_v43  ;;  %v5888_v55 = vrot.slane %v5873_v48, %v1168_v43 }
 0x20c   : > { %2953 = vmatmul.mubr.f32.gmra.mrb[56].mxu1 %v5190_v63  ;;  %4409 = vmatpush1.bf16.msra.mxu0 %v4408_v53  ;;  %v5881_v52 = vrot.slane %v5869_v45, %v1176_v46  ;;  %v5207_v53 = vld [vmem:[%s5683_s25 + $0x118] sm:$0xff]  ;;  %v5898_v61 = vrot.slane %v5873_v48, %v1176_v46  ;;  %v5208_v63 = vld [vmem:[%s5683_s25 + $0x110] sm:$0xff] }
 0x20d   : > { %4601 = vmatpush1.bf16.msra.mxu1 %v4600_v57  ;;  %2475 = vmatprep.mubr.f32.mxu0 %v5191_v6  ;;  %v5891_v57 = vrot.slane %v5873_v48, %v1172_v47 }
 0x20e   : > { %2958 = vmatprep.mubr.f32.mxu1 %v5191_v6  ;;  %4411 = vmatprep.subr.bf16.mxu0 %v4410_v60 }
 0x20f   : > { %2476 = vmatmul.mubr.f32.gmra.mrb[58].mxu0 %v5192_v13  ;;  %4603 = vmatprep.subr.bf16.mxu1 %v4602_v0 }
 0x210   : > { %2959 = vmatmul.mubr.f32.gmra.mrb[58].mxu1 %v5192_v13  ;;  %4413 = vmatpush1.bf16.msra.mxu0 %v4412_v3  ;;  %v5209_v3 = vld [vmem:[%s5683_s25 + $0x148] sm:$0xff]  ;;  %v5210_v13 = vld [vmem:[%s5683_s25 + $0x140] sm:$0xff] }
 0x211   : > { %4605 = vmatpush1.bf16.msra.mxu1 %v4604_v7  ;;  %2481 = vmatprep.mubr.f32.mxu0 %v5193_v20  ;;  %v5908_v7 = vrot.slane %v5873_v48, %v1180_v49  ;;  %v5214_v49 = vld [vmem:[%s5683_s25 + $0x1a0] sm:$0xff] }
 0x212   : > { %2964 = vmatprep.mubr.f32.mxu1 %v5193_v20  ;;  %4415 = vmatprep.subr.bf16.mxu0 %v4414_v10 }
 0x213   : > { %2482 = vmatmul.mubr.f32.gmra.mrb[60].mxu0 %v5194_v27  ;;  %4607 = vmatprep.subr.bf16.mxu1 %v4606_v14 }
 0x214   : > { %2965 = vmatmul.mubr.f32.gmra.mrb[60].mxu1 %v5194_v27  ;;  %4417 = vmatpush1.bf16.msra.mxu0 %v4416_v17 }
 0x215   : > { %4609 = vmatpush1.bf16.msra.mxu1 %v4608_v21  ;;  %2487 = vmatprep.mubr.f32.mxu0 %v5195_v30 }
 0x216   : > { %2970 = vmatprep.mubr.f32.mxu1 %v5195_v30  ;;  %4419 = vmatprep.subr.bf16.mxu0 %v4418_v24 }
 0x217   : > { %2488 = vmatmul.mubr.f32.gmra.mrb[62].mxu0 %v5196_v32  ;;  %4611 = vmatprep.subr.bf16.mxu1 %v4610_v28 }
 0x218   : > { %2971 = vmatmul.mubr.f32.gmra.mrb[62].mxu1 %v5196_v32  ;;  %4421 = vmatpush1.bf16.msra.mxu0 %v4420_v29  ;;  %v5212_v29 = vld [vmem:[%s5683_s25 + $0x170] sm:$0xff] }
 0x219   : > { %4613 = vmatpush1.bf16.msra.mxu1 %v4612_v31  ;;  %2558 = vmatprep.mubr.f32.mxu0 %v5197_v33 }
 0x21a   : > { %3041 = vmatprep.mubr.f32.mxu1 %v5197_v33 }
 0x21b   : > { %2559 = vmatmul.mubr.f32.vlgmr.msra.gmra.mrb[32].mxu0 %v5198_v34 }
 0x21c   : > { %3042 = vmatmul.mubr.f32.vlgmr.msra.gmra.mrb[32].mxu1 %v5198_v34  ;;  %2564 = vmatprep.mubr.f32.mxu0 %v5199_v35 }
 0x21d   : > { %3047 = vmatprep.mubr.f32.mxu1 %v5199_v35 }
 0x21f   : > { %2565 = vmatmul.mubr.f32.gmra.mrb[34].mxu0 %v5200_v36 }
 0x220   : > { %3048 = vmatmul.mubr.f32.gmra.mrb[34].mxu1 %v5200_v36  ;;  %2570 = vmatprep.mubr.f32.mxu0 %v5201_v38  ;;  %v5213_v36 = vld [vmem:[%s5683_s25 + $0x1a8] sm:$0xff] }
 0x221   : > { %3053 = vmatprep.mubr.f32.mxu1 %v5201_v38 }
 0x223   : > { %2571 = vmatmul.mubr.f32.gmra.mrb[36].mxu0 %v5202_v39 }
 0x224   : > { %3054 = vmatmul.mubr.f32.gmra.mrb[36].mxu1 %v5202_v39  ;;  %2576 = vmatprep.mubr.f32.mxu0 %v5203_v41 }
 0x225   : > { %3059 = vmatprep.mubr.f32.mxu1 %v5203_v41 }
 0x227   : > { %2577 = vmatmul.mubr.f32.gmra.mrb[38].mxu0 %v5204_v42 }
 0x228   : > { %3060 = vmatmul.mubr.f32.gmra.mrb[38].mxu1 %v5204_v42  ;;  %2582 = vmatprep.mubr.f32.mxu0 %v5205_v44 }
 0x229   : > { %3065 = vmatprep.mubr.f32.mxu1 %v5205_v44 }
 0x22b   : > { %2583 = vmatmul.mubr.f32.gmra.mrb[40].mxu0 %v5206_v50 }
 0x22c   : > { %3066 = vmatmul.mubr.f32.gmra.mrb[40].mxu1 %v5206_v50  ;;  %2588 = vmatprep.mubr.f32.mxu0 %v5207_v53 }
 0x22d   : > { %3071 = vmatprep.mubr.f32.mxu1 %v5207_v53 }
 0x22e   : > { %v1594_v56 = vpop.f32.mrb[0].mxu0 }
 0x22f   : > { %v4614_v59 = vadd.f32 %v1594_v56, %v5878_v51  ;;  %v2077_v60 = vpop.f32.mrb[0].mxu1  ;;  %v1596_v62 = vpop.f32.mrb[1].mxu0  ;;  %2589 = vmatmul.mubr.f32.gmra.mrb[42].mxu0 %v5208_v63 }
 0x230   : > { %v4646_v0 = vadd.f32 %v2077_v60, %v5881_v52  ;;  %v4615_v1 = vadd.f32 %v1596_v62, %v5885_v54  ;;  %v2079_v2 = vpop.f32.mrb[1].mxu1  ;;  %3072 = vmatmul.mubr.f32.gmra.mrb[42].mxu1 %v5208_v63  ;;  %2594 = vmatprep.mubr.f32.mxu0 %v5209_v3  ;;  %v5215_v63 = vld [vmem:[%s5683_s25 + $0x1d8] sm:$0xff] }
 0x231   : > { %v3180_v4 = vmul.f32 %v4614_v59, %v5888_v55  ;;  %3077 = vmatprep.mubr.f32.mxu1 %v5209_v3  ;;  %v4647_v6 = vadd.f32 %v2079_v2, %v5894_v58 }
 0x232   : > { %v3181_v5 = vmul.f32 %v4615_v1, %v5891_v57  ;;  %v1600_v8 = vpop.f32.mrb[2].mxu0  ;;  %v3182_v9 = vmul.f32 %v4646_v0, %v5898_v61 }
 0x233   : > { %v4616_v10 = vadd.f32 %v1600_v8, %v5878_v51  ;;  %v2083_v11 = vpop.f32.mrb[2].mxu1  ;;  %v1602_v12 = vpop.f32.mrb[3].mxu0  ;;  %2595 = vmatmul.mubr.f32.gmra.mrb[44].mxu0 %v5210_v13  ;;  %v3183_v20 = vmul.f32 %v4647_v6, %v5908_v7 }
 0x234   : > { %v3308_v14 = vadd.f32 %v3181_v5, %v3180_v4  ;;  %v4648_v15 = vadd.f32 %v2083_v11, %v5881_v52  ;;  %v4617_v16 = vadd.f32 %v1602_v12, %v5885_v54  ;;  %v2085_v17 = vpop.f32.mrb[3].mxu1  ;;  %3078 = vmatmul.mubr.f32.gmra.mrb[44].mxu1 %v5210_v13  ;;  %2600 = vmatprep.mubr.f32.mxu0 %v5211_v18 }
 0x235   : > { %v3188_v19 = vmul.f32 %v4616_v10, %v5888_v55  ;;  %3083 = vmatprep.mubr.f32.mxu1 %v5211_v18  ;;  %v4649_v23 = vadd.f32 %v2085_v17, %v5894_v58  ;;  %v5216_v10 = vld [vmem:[%s5683_s25 + $0x1d0] sm:$0xff]  ;;  %v5217_v17 = vld [vmem:[%s5683_s25 + $0x208] sm:$0xff] }
 0x236   : > { %v3309_v21 = vadd.f32 %v3308_v14, %v3182_v9  ;;  %v3189_v22 = vmul.f32 %v4617_v16, %v5891_v57  ;;  %v1606_v24 = vpop.f32.mrb[4].mxu0  ;;  %v3190_v25 = vmul.f32 %v4648_v15, %v5898_v61 }
 0x237   : > { %v4618_v26 = vadd.f32 %v1606_v24, %v5878_v51  ;;  %v2089_v27 = vpop.f32.mrb[4].mxu1  ;;  %v1608_v28 = vpop.f32.mrb[5].mxu0  ;;  %2601 = vmatmul.mubr.f32.gmra.mrb[46].mxu0 %v5212_v29  ;;  %v3191_v37 = vmul.f32 %v4649_v23, %v5908_v7 }
 0x238   : > { %v5923_v30 = vadd.f32 %v3309_v21, %v3183_v20  ;;  %v3317_v31 = vadd.f32 %v3189_v22, %v3188_v19  ;;  %v4650_v32 = vadd.f32 %v2089_v27, %v5881_v52  ;;  %v4619_v33 = vadd.f32 %v1608_v28, %v5885_v54  ;;  %v2091_v34 = vpop.f32.mrb[5].mxu1  ;;  %3084 = vmatmul.mubr.f32.gmra.mrb[46].mxu1 %v5212_v29  ;;  %v5218_v27 = vld [vmem:[%s5683_s25 + $0x200] sm:$0xff] }
 0x239   : > { %v3196_v35 = vmul.f32 %v4618_v26, %v5888_v55  ;;  %2606 = vmatprep.mubr.f32.mxu0 %v5213_v36  ;;  %3089 = vmatprep.mubr.f32.mxu1 %v5213_v36  ;;  %v4651_v41 = vadd.f32 %v2091_v34, %v5894_v58 }
 0x23a   : > { %v3318_v38 = vadd.f32 %v3317_v31, %v3190_v25  ;;  %v3197_v39 = vmul.f32 %v4619_v33, %v5891_v57  ;;  %v1612_v42 = vpop.f32.mrb[6].mxu0  ;;  %v3198_v43 = vmul.f32 %v4650_v32, %v5898_v61 }
 0x23b   : > { %v4620_v44 = vadd.f32 %v1612_v42, %v5878_v51  ;;  %v2095_v46 = vpop.f32.mrb[6].mxu1  ;;  %v1614_v47 = vpop.f32.mrb[7].mxu0  ;;  %2607 = vmatmul.mubr.f32.gmra.mrb[48].mxu0 %v5214_v49  ;;  %v3199_v0 = vmul.f32 %v4651_v41, %v5908_v7 }
 0x23c   : > { %v5935_v50 = vadd.f32 %v3318_v38, %v3191_v37  ;;  %v3326_v53 = vadd.f32 %v3197_v39, %v3196_v35  ;;  %v4652_v56 = vadd.f32 %v2095_v46, %v5881_v52  ;;  %v4621_v59 = vadd.f32 %v1614_v47, %v5885_v54  ;;  %v2097_v60 = vpop.f32.mrb[7].mxu1  ;;  %3090 = vmatmul.mubr.f32.gmra.mrb[48].mxu1 %v5214_v49  ;;  %v5219_v35 = vld [vmem:[%s5683_s25 + $0x238] sm:$0xff]  ;;  %v5220_v47 = vld [vmem:[%s5683_s25 + $0x230] sm:$0xff] }
 0x23d   : > { %v3204_v62 = vmul.f32 %v4620_v44, %v5888_v55  ;;  %2612 = vmatprep.mubr.f32.mxu0 %v5215_v63  ;;  %3095 = vmatprep.mubr.f32.mxu1 %v5215_v63  ;;  %v4653_v3 = vadd.f32 %v2097_v60, %v5894_v58  ;;  %v5221_v63 = vld [vmem:[%s5683_s25 + $0x268] sm:$0xff] }
 0x23e   : > { %v3327_v1 = vadd.f32 %v3326_v53, %v3198_v43  ;;  %v3205_v2 = vmul.f32 %v4621_v59, %v5891_v57  ;;  %v1618_v4 = vpop.f32.mrb[8].mxu0  ;;  %v3206_v5 = vmul.f32 %v4652_v56, %v5898_v61 }
 0x23f   : > { %v4622_v6 = vadd.f32 %v1618_v4, %v5878_v51  ;;  %v2101_v8 = vpop.f32.mrb[8].mxu1  ;;  %v1620_v9 = vpop.f32.mrb[9].mxu0  ;;  %2613 = vmatmul.mubr.f32.gmra.mrb[50].mxu0 %v5216_v10  ;;  %v3207_v18 = vmul.f32 %v4653_v3, %v5908_v7 }
 0x240   : > { %v5947_v11 = vadd.f32 %v3327_v1, %v3199_v0  ;;  %v3335_v12 = vadd.f32 %v3205_v2, %v3204_v62  ;;  %v4654_v13 = vadd.f32 %v2101_v8, %v5881_v52  ;;  %v4623_v14 = vadd.f32 %v1620_v9, %v5885_v54  ;;  %v2103_v15 = vpop.f32.mrb[9].mxu1  ;;  %3096 = vmatmul.mubr.f32.gmra.mrb[50].mxu1 %v5216_v10  ;;  %v5222_v10 = vld [vmem:[%s5683_s25 + $0x260] sm:$0xff] }
 0x241   : > { %v3212_v16 = vmul.f32 %v4622_v6, %v5888_v55  ;;  %2618 = vmatprep.mubr.f32.mxu0 %v5217_v17  ;;  %3101 = vmatprep.mubr.f32.mxu1 %v5217_v17  ;;  %v4655_v21 = vadd.f32 %v2103_v15, %v5894_v58 }
 0x242   : > { %v3336_v19 = vadd.f32 %v3335_v12, %v3206_v5  ;;  %v3213_v20 = vmul.f32 %v4623_v14, %v5891_v57  ;;  %v1624_v22 = vpop.f32.mrb[10].mxu0  ;;  %v3214_v23 = vmul.f32 %v4654_v13, %v5898_v61 }
 0x243   : > { %v4624_v24 = vadd.f32 %v1624_v22, %v5878_v51  ;;  %v2107_v25 = vpop.f32.mrb[10].mxu1  ;;  %v1626_v26 = vpop.f32.mrb[11].mxu0  ;;  %2619 = vmatmul.mubr.f32.gmra.mrb[52].mxu0 %v5218_v27  ;;  %v3215_v36 = vmul.f32 %v4655_v21, %v5908_v7 }
 0x244   : > { %v5959_v28 = vadd.f32 %v3336_v19, %v3207_v18  ;;  %v3344_v29 = vadd.f32 %v3213_v20, %v3212_v16  ;;  %v4656_v31 = vadd.f32 %v2107_v25, %v5881_v52  ;;  %v4625_v32 = vadd.f32 %v1626_v26, %v5885_v54  ;;  %v2109_v33 = vpop.f32.mrb[11].mxu1  ;;  %3102 = vmatmul.mubr.f32.gmra.mrb[52].mxu1 %v5218_v27  ;;  %v5223_v18 = vld [vmem:[%s5683_s25 + $0x298] sm:$0xff] }
 0x245   : > { %v3220_v34 = vmul.f32 %v4624_v24, %v5888_v55  ;;  %2624 = vmatprep.mubr.f32.mxu0 %v5219_v35  ;;  %3107 = vmatprep.mubr.f32.mxu1 %v5219_v35  ;;  %v4657_v39 = vadd.f32 %v2109_v33, %v5894_v58 }
 0x246   : > { %v3345_v37 = vadd.f32 %v3344_v29, %v3214_v23  ;;  %v3221_v38 = vmul.f32 %v4625_v32, %v5891_v57  ;;  %v1630_v41 = vpop.f32.mrb[12].mxu0  ;;  %v3222_v42 = vmul.f32 %v4656_v31, %v5898_v61  ;;  %v5224_v29 = vld [vmem:[%s5683_s25 + $0x290] sm:$0xff] }
 0x247   : > { %v4626_v43 = vadd.f32 %v1630_v41, %v5878_v51  ;;  %v2113_v44 = vpop.f32.mrb[12].mxu1  ;;  %v1632_v46 = vpop.f32.mrb[13].mxu0  ;;  %2625 = vmatmul.mubr.f32.gmra.mrb[54].mxu0 %v5220_v47  ;;  %v3223_v0 = vmul.f32 %v4657_v39, %v5908_v7 }
 0x248   : > { %v5971_v49 = vadd.f32 %v3345_v37, %v3215_v36  ;;  %v3353_v53 = vadd.f32 %v3221_v38, %v3220_v34  ;;  %v4658_v56 = vadd.f32 %v2113_v44, %v5881_v52  ;;  %v4627_v59 = vadd.f32 %v1632_v46, %v5885_v54  ;;  %v2115_v60 = vpop.f32.mrb[13].mxu1  ;;  %3108 = vmatmul.mubr.f32.gmra.mrb[54].mxu1 %v5220_v47  ;;  %v5225_v37 = vld [vmem:[%s5683_s25 + $0x2c8] sm:$0xff] }
 0x249   : > { %v3228_v62 = vmul.f32 %v4626_v43, %v5888_v55  ;;  %2630 = vmatprep.mubr.f32.mxu0 %v5221_v63  ;;  %3113 = vmatprep.mubr.f32.mxu1 %v5221_v63  ;;  %v4659_v3 = vadd.f32 %v2115_v60, %v5894_v58 }
 0x24a   : > { %v3354_v1 = vadd.f32 %v3353_v53, %v3222_v42  ;;  %v3229_v2 = vmul.f32 %v4627_v59, %v5891_v57  ;;  %v1636_v4 = vpop.f32.mrb[14].mxu0  ;;  %v3230_v5 = vmul.f32 %v4658_v56, %v5898_v61  ;;  %v5226_v56 = vld [vmem:[%s5683_s25 + $0x2c0] sm:$0xff] }
 0x24b   : > { %v4628_v6 = vadd.f32 %v1636_v4, %v5878_v51  ;;  %v2119_v8 = vpop.f32.mrb[14].mxu1  ;;  %v1638_v9 = vpop.f32.mrb[15].mxu0  ;;  %2631 = vmatmul.mubr.f32.gmra.mrb[56].mxu0 %v5222_v10  ;;  %v3231_v19 = vmul.f32 %v4659_v3, %v5908_v7 }
 0x24c   : > { %v5983_v12 = vadd.f32 %v3354_v1, %v3223_v0  ;;  %v3362_v13 = vadd.f32 %v3229_v2, %v3228_v62  ;;  %v4660_v14 = vadd.f32 %v2119_v8, %v5881_v52  ;;  %v4629_v15 = vadd.f32 %v1638_v9, %v5885_v54  ;;  %v2121_v16 = vpop.f32.mrb[15].mxu1  ;;  %3114 = vmatmul.mubr.f32.gmra.mrb[56].mxu1 %v5222_v10  ;;  %v5227_v2 = vld [vmem:[%s5683_s25 + $0x2f8] sm:$0xff] }
 0x24d   : > { %v3236_v17 = vmul.f32 %v4628_v6, %v5888_v55  ;;  %2636 = vmatprep.mubr.f32.mxu0 %v5223_v18  ;;  %3119 = vmatprep.mubr.f32.mxu1 %v5223_v18  ;;  %v4661_v22 = vadd.f32 %v2121_v16, %v5894_v58 }
 0x24e   : > { %v3363_v20 = vadd.f32 %v3362_v13, %v3230_v5  ;;  %v3237_v21 = vmul.f32 %v4629_v15, %v5891_v57  ;;  %v1642_v23 = vpop.f32.mrb[16].mxu0  ;;  %v3238_v24 = vmul.f32 %v4660_v14, %v5898_v61  ;;  %v5228_v15 = vld [vmem:[%s5683_s25 + $0x2f0] sm:$0xff] }
 0x24f   : > { %v4630_v25 = vadd.f32 %v1642_v23, %v5878_v51  ;;  %v2125_v26 = vpop.f32.mrb[16].mxu1  ;;  %v1644_v27 = vpop.f32.mrb[17].mxu0  ;;  %2637 = vmatmul.mubr.f32.gmra.mrb[58].mxu0 %v5224_v29  ;;  %v3239_v38 = vmul.f32 %v4661_v22, %v5908_v7 }
 0x250   : > { %v5995_v31 = vadd.f32 %v3363_v20, %v3231_v19  ;;  %v3371_v32 = vadd.f32 %v3237_v21, %v3236_v17  ;;  %v4662_v33 = vadd.f32 %v2125_v26, %v5881_v52  ;;  %v4631_v34 = vadd.f32 %v1644_v27, %v5885_v54  ;;  %v2127_v35 = vpop.f32.mrb[17].mxu1  ;;  %3120 = vmatmul.mubr.f32.gmra.mrb[58].mxu1 %v5224_v29 }
 0x251   : > { %v3244_v36 = vmul.f32 %v4630_v25, %v5888_v55  ;;  %2642 = vmatprep.mubr.f32.mxu0 %v5225_v37  ;;  %3125 = vmatprep.mubr.f32.mxu1 %v5225_v37  ;;  %v4663_v42 = vadd.f32 %v2127_v35, %v5894_v58 }
 0x252   : > { %v3372_v39 = vadd.f32 %v3371_v32, %v3238_v24  ;;  %v3245_v41 = vmul.f32 %v4631_v34, %v5891_v57  ;;  %v1648_v43 = vpop.f32.mrb[18].mxu0  ;;  %v3246_v44 = vmul.f32 %v4662_v33, %v5898_v61 }
 0x253   : > { %v4632_v46 = vadd.f32 %v1648_v43, %v5878_v51  ;;  %v2131_v47 = vpop.f32.mrb[18].mxu1  ;;  %v1650_v53 = vpop.f32.mrb[19].mxu0  ;;  %2643 = vmatmul.mubr.f32.gmra.mrb[60].mxu0 %v5226_v56  ;;  %v3247_v3 = vmul.f32 %v4663_v42, %v5908_v7 }
 0x254   : > { %v6007_v59 = vadd.f32 %v3372_v39, %v3239_v38  ;;  %v3380_v60 = vadd.f32 %v3245_v41, %v3244_v36  ;;  %v4664_v62 = vadd.f32 %v2131_v47, %v5881_v52  ;;  %v4633_v63 = vadd.f32 %v1650_v53, %v5885_v54  ;;  %v2133_v0 = vpop.f32.mrb[19].mxu1  ;;  %3126 = vmatmul.mubr.f32.gmra.mrb[60].mxu1 %v5226_v56 }
 0x255   : > { %v3252_v1 = vmul.f32 %v4632_v46, %v5888_v55  ;;  %2648 = vmatprep.mubr.f32.mxu0 %v5227_v2  ;;  %3131 = vmatprep.mubr.f32.mxu1 %v5227_v2  ;;  %v4665_v6 = vadd.f32 %v2133_v0, %v5894_v58 }
 0x256   : > { %v3381_v4 = vadd.f32 %v3380_v60, %v3246_v44  ;;  %v3253_v5 = vmul.f32 %v4633_v63, %v5891_v57  ;;  %v1654_v8 = vpop.f32.mrb[20].mxu0  ;;  %v3254_v9 = vmul.f32 %v4664_v62, %v5898_v61 }
 0x257   : > { %v4634_v10 = vadd.f32 %v1654_v8, %v5878_v51  ;;  %v2137_v13 = vpop.f32.mrb[20].mxu1  ;;  %v1656_v14 = vpop.f32.mrb[21].mxu0  ;;  %2649 = vmatmul.mubr.f32.gmra.mrb[62].mxu0 %v5228_v15  ;;  %v3255_v22 = vmul.f32 %v4665_v6, %v5908_v7 }
 0x258   : > { %v6019_v16 = vadd.f32 %v3381_v4, %v3247_v3  ;;  %v3389_v17 = vadd.f32 %v3253_v5, %v3252_v1  ;;  %v4666_v18 = vadd.f32 %v2137_v13, %v5881_v52  ;;  %v4635_v19 = vadd.f32 %v1656_v14, %v5885_v54  ;;  %v2139_v20 = vpop.f32.mrb[21].mxu1  ;;  %3132 = vmatmul.mubr.f32.gmra.mrb[62].mxu1 %v5228_v15 }
 0x259   : > { %v3260_v21 = vmul.f32 %v4634_v10, %v5888_v55  ;;  %v4667_v25 = vadd.f32 %v2139_v20, %v5894_v58 }
 0x25a   : > { %v3390_v23 = vadd.f32 %v3389_v17, %v3254_v9  ;;  %v3261_v24 = vmul.f32 %v4635_v19, %v5891_v57  ;;  %v1660_v26 = vpop.f32.mrb[22].mxu0  ;;  %v3262_v27 = vmul.f32 %v4666_v18, %v5898_v61 }
 0x25b   : > { %v4636_v29 = vadd.f32 %v1660_v26, %v5878_v51  ;;  %v2143_v32 = vpop.f32.mrb[22].mxu1  ;;  %v1662_v33 = vpop.f32.mrb[23].mxu0  ;;  %v3263_v41 = vmul.f32 %v4667_v25, %v5908_v7 }
 0x25c   : > { %v6029_v34 = vadd.f32 %v3390_v23, %v3255_v22  ;;  %v3398_v35 = vadd.f32 %v3261_v24, %v3260_v21  ;;  %v4668_v36 = vadd.f32 %v2143_v32, %v5881_v52  ;;  %v4637_v37 = vadd.f32 %v1662_v33, %v5885_v54  ;;  %v2145_v38 = vpop.f32.mrb[23].mxu1 }
 0x25d   : > { %v3268_v39 = vmul.f32 %v4636_v29, %v5888_v55  ;;  %v4669_v44 = vadd.f32 %v2145_v38, %v5894_v58 }
 0x25e   : > { %v3399_v42 = vadd.f32 %v3398_v35, %v3262_v27  ;;  %v3269_v43 = vmul.f32 %v4637_v37, %v5891_v57  ;;  %v1666_v46 = vpop.f32.mrb[24].mxu0  ;;  %v3270_v47 = vmul.f32 %v4668_v36, %v5898_v61 }
 0x25f   : > { %v4638_v53 = vadd.f32 %v1666_v46, %v5878_v51  ;;  %v2149_v56 = vpop.f32.mrb[24].mxu1  ;;  %v1668_v60 = vpop.f32.mrb[25].mxu0  ;;  %v3271_v4 = vmul.f32 %v4669_v44, %v5908_v7 }
 0x260   : > { %v6039_v62 = vadd.f32 %v3399_v42, %v3263_v41  ;;  %v3407_v63 = vadd.f32 %v3269_v43, %v3268_v39  ;;  %v4670_v0 = vadd.f32 %v2149_v56, %v5881_v52  ;;  %v4639_v1 = vadd.f32 %v1668_v60, %v5885_v54  ;;  %v2151_v2 = vpop.f32.mrb[25].mxu1 }
 0x261   : > { %v3276_v3 = vmul.f32 %v4638_v53, %v5888_v55  ;;  %v4671_v8 = vadd.f32 %v2151_v2, %v5894_v58 }
 0x262   : > { %v3408_v5 = vadd.f32 %v3407_v63, %v3270_v47  ;;  %v3277_v6 = vmul.f32 %v4639_v1, %v5891_v57  ;;  %v1672_v9 = vpop.f32.mrb[26].mxu0  ;;  %v3278_v10 = vmul.f32 %v4670_v0, %v5898_v61 }
 0x263   : > { %v4640_v13 = vadd.f32 %v1672_v9, %v5878_v51  ;;  %v2155_v14 = vpop.f32.mrb[26].mxu1  ;;  %v1674_v15 = vpop.f32.mrb[27].mxu0  ;;  %v3279_v23 = vmul.f32 %v4671_v8, %v5908_v7 }
 0x264   : > { %v6049_v17 = vadd.f32 %v3408_v5, %v3271_v4  ;;  %v3416_v18 = vadd.f32 %v3277_v6, %v3276_v3  ;;  %v4672_v19 = vadd.f32 %v2155_v14, %v5881_v52  ;;  %v4641_v20 = vadd.f32 %v1674_v15, %v5885_v54  ;;  %v2157_v21 = vpop.f32.mrb[27].mxu1 }
 0x265   : > { %v3284_v22 = vmul.f32 %v4640_v13, %v5888_v55  ;;  %v4673_v26 = vadd.f32 %v2157_v21, %v5894_v58 }
 0x266   : > { %v3417_v24 = vadd.f32 %v3416_v18, %v3278_v10  ;;  %v3285_v25 = vmul.f32 %v4641_v20, %v5891_v57  ;;  %v1678_v27 = vpop.f32.mrb[28].mxu0  ;;  %v3286_v29 = vmul.f32 %v4672_v19, %v5898_v61  ;;  %v1192_v20 = vsub.s32 6, %v5863_v40 }
 0x267   : > { %v4642_v32 = vadd.f32 %v1678_v27, %v5878_v51  ;;  %v2161_v33 = vpop.f32.mrb[28].mxu1  ;;  %v1680_v35 = vpop.f32.mrb[29].mxu0  ;;  %v3287_v43 = vmul.f32 %v4673_v26, %v5908_v7 }
 0x268   : > { %v6059_v36 = vadd.f32 %v3417_v24, %v3279_v23  ;;  %v3425_v37 = vadd.f32 %v3285_v25, %v3284_v22  ;;  %v4674_v38 = vadd.f32 %v2161_v33, %v5881_v52  ;;  %v4643_v39 = vadd.f32 %v1680_v35, %v5885_v54  ;;  %v2163_v41 = vpop.f32.mrb[29].mxu1 }
 0x269   : > { %v3292_v42 = vmul.f32 %v4642_v32, %v5888_v55  ;;  %v4675_v47 = vadd.f32 %v2163_v41, %v5894_v58  ;;  %v6110_v35 = vrot.slane %v5873_v48, %v1192_v20 }
 0x26a   : > { %v3426_v44 = vadd.f32 %v3425_v37, %v3286_v29  ;;  %v3293_v46 = vmul.f32 %v4643_v39, %v5891_v57  ;;  %v1684_v53 = vpop.f32.mrb[30].mxu0  ;;  %v3294_v56 = vmul.f32 %v4674_v38, %v5898_v61 }
 0x26b   : > { %v4644_v60 = vadd.f32 %v1684_v53, %v5878_v51  ;;  %v2167_v63 = vpop.f32.mrb[30].mxu1  ;;  %v1686_v0 = vpop.f32.mrb[31].mxu0  ;;  %v3295_v8 = vmul.f32 %v4675_v47, %v5908_v7 }
 0x26c   : > { %v6069_v1 = vadd.f32 %v3426_v44, %v3287_v43  ;;  %v3434_v2 = vadd.f32 %v3293_v46, %v3292_v42  ;;  %v4676_v3 = vadd.f32 %v2167_v63, %v5881_v52  ;;  %v4645_v4 = vadd.f32 %v1686_v0, %v5885_v54  ;;  %v2169_v5 = vpop.f32.mrb[31].mxu1 }
 0x26d   : > { %v3300_v6 = vmul.f32 %v4644_v60, %v5888_v55  ;;  %v4677_v13 = vadd.f32 %v2169_v5, %v5894_v58  ;;  %v1184_v54 = vsub.s32 4, %v5863_v40  ;;  %v1188_v55 = vsub.s32 5, %v5863_v40 }
 0x26e   : > { %v3435_v9 = vadd.f32 %v3434_v2, %v3294_v56  ;;  %v3301_v10 = vmul.f32 %v4645_v4, %v5891_v57  ;;  %v3302_v14 = vmul.f32 %v4676_v3, %v5898_v61  ;;  %v1196_v58 = vsub.s32 7, %v5863_v40 }
 0x26f   : > { %v3303_v18 = vmul.f32 %v4677_v13, %v5908_v7  ;;  %v6087_v57 = vrot.slane %v5869_v45, %v1184_v54  ;;  %v6091_v21 = vrot.slane %v5869_v45, %v1188_v55  ;;  %v6094_v61 = vrot.slane %v5873_v48, %v1184_v54 }
 0x270   : > { %v6077_v51 = vadd.f32 %v3435_v9, %v3295_v8  ;;  %v3443_v15 = vadd.f32 %v3301_v10, %v3300_v6  ;;  %v6097_v7 = vrot.slane %v5869_v45, %v1192_v20  ;;  %v6100_v23 = vrot.slane %v5873_v48, %v1188_v55 }
 0x271   : > { %v6104_v27 = vrot.slane %v5869_v45, %v1196_v58  ;;  %v6117_v44 = vrot.slane %v5873_v48, %v1196_v58 }
 0x272   : > { %v3444_v52 = vadd.f32 %v3443_v15, %v3302_v14 }
 0x274   : > { %v6081_v19 = vadd.f32 %v3444_v52, %v3303_v18 }
 0x2ee   : > { %v2560_v22 = vpop.f32.mrb[32].mxu0 }
 0x2ef   : > { %v4678_v24 = vadd.f32 %v2560_v22, %v6087_v57  ;;  %v3043_v25 = vpop.f32.mrb[32].mxu1  ;;  %v2562_v26 = vpop.f32.mrb[33].mxu0 }
 0x2f0   : > { %v4679_v40 = vadd.f32 %v2562_v26, %v6091_v21  ;;  %v3045_v29 = vpop.f32.mrb[33].mxu1  ;;  %v4710_v33 = vadd.f32 %v3043_v25, %v6097_v7 }
 0x2f1   : > { %v3184_v32 = vmul.f32 %v4678_v24, %v6094_v61  ;;  %v4711_v41 = vadd.f32 %v3045_v29, %v6104_v27 }
 0x2f2   : > { %v3185_v37 = vmul.f32 %v4679_v40, %v6100_v23  ;;  %v2566_v38 = vpop.f32.mrb[34].mxu0  ;;  %v3186_v53 = vmul.f32 %v4710_v33, %v6110_v35 }
 0x2f3   : > { %v3311_v39 = vadd.f32 %v5923_v30, %v3184_v32  ;;  %v4680_v45 = vadd.f32 %v2566_v38, %v6087_v57  ;;  %v3049_v42 = vpop.f32.mrb[34].mxu1  ;;  %v2568_v43 = vpop.f32.mrb[35].mxu0  ;;  %v3187_v6 = vmul.f32 %v4711_v41, %v6117_v44 }
 0x2f4   : > { %v4681_v46 = vadd.f32 %v2568_v43, %v6091_v21  ;;  %v3051_v47 = vpop.f32.mrb[35].mxu1  ;;  %v4712_v60 = vadd.f32 %v3049_v42, %v6097_v7 }
 0x2f5   : > { %v3192_v56 = vmul.f32 %v4680_v45, %v6094_v61  ;;  %v3312_v63 = vadd.f32 %v3311_v39, %v3185_v37  ;;  %v4713_v0 = vadd.f32 %v3051_v47, %v6104_v27 }
 0x2f6   : > { %v3193_v30 = vmul.f32 %v4681_v46, %v6100_v23  ;;  %v2572_v2 = vpop.f32.mrb[36].mxu0  ;;  %v3194_v14 = vmul.f32 %v4712_v60, %v6110_v35 }
 0x2f7   : > { %v3320_v3 = vadd.f32 %v5935_v50, %v3192_v56  ;;  %v4682_v48 = vadd.f32 %v2572_v2, %v6087_v57  ;;  %v3055_v4 = vpop.f32.mrb[36].mxu1  ;;  %v2574_v5 = vpop.f32.mrb[37].mxu0  ;;  %v3313_v8 = vadd.f32 %v3312_v63, %v3186_v53  ;;  %v3195_v50 = vmul.f32 %v4713_v0, %v6117_v44 }
 0x2f8   : > { %v4714_v9 = vadd.f32 %v3055_v4, %v6097_v7  ;;  %v4683_v10 = vadd.f32 %v2574_v5, %v6091_v21  ;;  %v3057_v13 = vpop.f32.mrb[37].mxu1 }
 0x2f9   : > { %v3321_v15 = vadd.f32 %v3320_v3, %v3193_v30  ;;  %v3200_v18 = vmul.f32 %v4682_v48, %v6094_v61  ;;  %v3314_v52 = vadd.f32 %v3313_v8, %v3187_v6  ;;  %v4715_v58 = vadd.f32 %v3057_v13, %v6104_v27 }
 0x2fa   : > { %v3201_v54 = vmul.f32 %v4683_v10, %v6100_v23  ;;  %v2578_v55 = vpop.f32.mrb[38].mxu0  ;;  %v3202_v40 = vmul.f32 %v4714_v9, %v6110_v35 }
 0x2fb   : > { %v3329_v20 = vadd.f32 %v5947_v11, %v3200_v18  ;;  %v4684_v22 = vadd.f32 %v2578_v55, %v6087_v57  ;;  %v3061_v24 = vpop.f32.mrb[38].mxu1  ;;  %v2580_v25 = vpop.f32.mrb[39].mxu0  ;;  %3315 = vadd.xlane.f32.xlu0 %v3314_v52  ;;  %v3322_v26 = vadd.f32 %v3321_v15, %v3194_v14  ;;  %v3203_v53 = vmul.f32 %v4715_v58, %v6117_v44 }
 0x2fc   : > { %v4685_v29 = vadd.f32 %v2580_v25, %v6091_v21  ;;  %v3063_v32 = vpop.f32.mrb[39].mxu1  ;;  %v4716_v37 = vadd.f32 %v3061_v24, %v6097_v7 }
 0x2fd   : > { %v3208_v33 = vmul.f32 %v4684_v22, %v6094_v61  ;;  %v3323_v38 = vadd.f32 %v3322_v26, %v3195_v50  ;;  %v3330_v39 = vadd.f32 %v3329_v20, %v3201_v54  ;;  %v4717_v41 = vadd.f32 %v3063_v32, %v6104_v27 }
 0x2fe   : > { %v3209_v11 = vmul.f32 %v4685_v29, %v6100_v23  ;;  %v2584_v45 = vpop.f32.mrb[40].mxu0  ;;  %v3210_v0 = vmul.f32 %v4716_v37, %v6110_v35 }
 0x2ff   : > { %v3338_v42 = vadd.f32 %v5959_v28, %v3208_v33  ;;  %v4686_v43 = vadd.f32 %v2584_v45, %v6087_v57  ;;  %v3067_v46 = vpop.f32.mrb[40].mxu1  ;;  %v2586_v47 = vpop.f32.mrb[41].mxu0  ;;  %3324 = vadd.xlane.f32.xlu0 %v3323_v38  ;;  %v3331_v56 = vadd.f32 %v3330_v39, %v3202_v40  ;;  %v3211_v28 = vmul.f32 %v4717_v41, %v6117_v44 }
 0x300   : > { %v4718_v60 = vadd.f32 %v3067_v46, %v6097_v7  ;;  %v4687_v63 = vadd.f32 %v2586_v47, %v6091_v21  ;;  %v3069_v30 = vpop.f32.mrb[41].mxu1 }
 0x301   : > { %v3339_v2 = vadd.f32 %v3338_v42, %v3209_v11  ;;  %v3216_v3 = vmul.f32 %v4686_v43, %v6094_v61  ;;  %v3332_v48 = vadd.f32 %v3331_v56, %v3203_v53  ;;  %v4719_v8 = vadd.f32 %v3069_v30, %v6104_v27 }
 0x302   : > { %v3217_v4 = vmul.f32 %v4687_v63, %v6100_v23  ;;  %v2590_v5 = vpop.f32.mrb[42].mxu0  ;;  %v3218_v15 = vmul.f32 %v4718_v60, %v6110_v35 }
 0x303   : > { %v3347_v6 = vadd.f32 %v5971_v49, %v3216_v3  ;;  %v4688_v9 = vadd.f32 %v2590_v5, %v6087_v57  ;;  %v3073_v10 = vpop.f32.mrb[42].mxu1  ;;  %v2592_v13 = vpop.f32.mrb[43].mxu0  ;;  %3333 = vadd.xlane.f32.xlu1 %v3332_v48  ;;  %v3340_v14 = vadd.f32 %v3339_v2, %v3210_v0  ;;  %v3219_v24 = vmul.f32 %v4719_v8, %v6117_v44 }
 0x304   : > { %v4689_v18 = vadd.f32 %v2592_v13, %v6091_v21  ;;  %v3075_v52 = vpop.f32.mrb[43].mxu1  ;;  %v4720_v55 = vadd.f32 %v3073_v10, %v6097_v7 }
 0x305   : > { %v3348_v50 = vadd.f32 %v3347_v6, %v3217_v4  ;;  %v3224_v54 = vmul.f32 %v4688_v9, %v6094_v61  ;;  %v3341_v20 = vadd.f32 %v3340_v14, %v3211_v28  ;;  %v4721_v58 = vadd.f32 %v3075_v52, %v6104_v27 }
 0x306   : > { %v3225_v49 = vmul.f32 %v4689_v18, %v6100_v23  ;;  %v2596_v22 = vpop.f32.mrb[44].mxu0  ;;  %v3226_v39 = vmul.f32 %v4720_v55, %v6110_v35 }
 0x307   : > { %v3356_v25 = vadd.f32 %v5983_v12, %v3224_v54  ;;  %v4690_v26 = vadd.f32 %v2596_v22, %v6087_v57  ;;  %v3079_v40 = vpop.f32.mrb[44].mxu1  ;;  %v2598_v29 = vpop.f32.mrb[45].mxu0  ;;  %3342 = vadd.xlane.f32.xlu1 %v3341_v20  ;;  %v3349_v32 = vadd.f32 %v3348_v50, %v3218_v15  ;;  %v3227_v42 = vmul.f32 %v4721_v58, %v6117_v44 }
 0x308   : > { %v4722_v33 = vadd.f32 %v3079_v40, %v6097_v7  ;;  %v4691_v37 = vadd.f32 %v2598_v29, %v6091_v21  ;;  %v3081_v38 = vpop.f32.mrb[45].mxu1 }
 0x309   : > { %v3357_v11 = vadd.f32 %v3356_v25, %v3225_v49  ;;  %v3232_v41 = vmul.f32 %v4690_v26, %v6094_v61  ;;  %v3350_v45 = vadd.f32 %v3349_v32, %v3219_v24  ;;  %v4723_v47 = vadd.f32 %v3081_v38, %v6104_v27 }
 0x30a   : > { %v3233_v12 = vmul.f32 %v4691_v37, %v6100_v23  ;;  %v2602_v43 = vpop.f32.mrb[46].mxu0  ;;  %v3234_v30 = vmul.f32 %v4722_v33, %v6110_v35 }
 0x30b   : > { %v3365_v46 = vadd.f32 %v5995_v31, %v3232_v41  ;;  %v4692_v53 = vadd.f32 %v2602_v43, %v6087_v57  ;;  %v3085_v56 = vpop.f32.mrb[46].mxu1  ;;  %v2604_v60 = vpop.f32.mrb[47].mxu0  ;;  %3351 = vadd.xlane.f32.xlu0 %v3350_v45  ;;  %v3358_v63 = vadd.f32 %v3357_v11, %v3226_v39  ;;  %v3235_v8 = vmul.f32 %v4723_v47, %v6117_v44 }
 0x30c   : > { %v4693_v0 = vadd.f32 %v2604_v60, %v6091_v21  ;;  %v3087_v2 = vpop.f32.mrb[47].mxu1  ;;  %v4724_v28 = vadd.f32 %v3085_v56, %v6097_v7 }
 0x30d   : > { %v3366_v3 = vadd.f32 %v3365_v46, %v3233_v12  ;;  %v3240_v48 = vmul.f32 %v4692_v53, %v6094_v61  ;;  %v3359_v4 = vadd.f32 %v3358_v63, %v3227_v42  ;;  %v4725_v5 = vadd.f32 %v3087_v2, %v6104_v27 }
 0x30e   : > { %v3241_v31 = vmul.f32 %v4693_v0, %v6100_v23  ;;  %v2608_v6 = vpop.f32.mrb[48].mxu0  ;;  %v3242_v54 = vmul.f32 %v4724_v28, %v6110_v35 }
 0x30f   : > { %v3374_v9 = vadd.f32 %v6007_v59, %v3240_v48  ;;  %v4694_v10 = vadd.f32 %v2608_v6, %v6087_v57  ;;  %v3091_v13 = vpop.f32.mrb[48].mxu1  ;;  %v2610_v14 = vpop.f32.mrb[49].mxu0  ;;  %3360 = vadd.xlane.f32.xlu1 %v3359_v4  ;;  %v3367_v15 = vadd.f32 %v3366_v3, %v3234_v30  ;;  %v3243_v58 = vmul.f32 %v4725_v5, %v6117_v44 }
 0x310   : > { %v4726_v18 = vadd.f32 %v3091_v13, %v6097_v7  ;;  %v4695_v52 = vadd.f32 %v2610_v14, %v6091_v21  ;;  %v3093_v50 = vpop.f32.mrb[49].mxu1 }
 0x311   : > { %v3375_v55 = vadd.f32 %v3374_v9, %v3241_v31  ;;  %v3248_v20 = vmul.f32 %v4694_v10, %v6094_v61  ;;  %v3368_v49 = vadd.f32 %v3367_v15, %v3235_v8  ;;  %v4727_v25 = vadd.f32 %v3093_v50, %v6104_v27 }
 0x312   : > { %v3249_v59 = vmul.f32 %v4695_v52, %v6100_v23  ;;  %v2614_v22 = vpop.f32.mrb[50].mxu0  ;;  %v3250_v33 = vmul.f32 %v4726_v18, %v6110_v35 }
 0x313   : > { %v3383_v24 = vadd.f32 %v6019_v16, %v3248_v20  ;;  %v4696_v26 = vadd.f32 %v2614_v22, %v6087_v57  ;;  %v3097_v40 = vpop.f32.mrb[50].mxu1  ;;  %v2616_v29 = vpop.f32.mrb[51].mxu0  ;;  %3369 = vadd.xlane.f32.xlu0 %v3368_v49  ;;  %v3376_v32 = vadd.f32 %v3375_v55, %v3242_v54  ;;  %v3251_v43 = vmul.f32 %v4727_v25, %v6117_v44 }
 0x314   : > { %v4697_v37 = vadd.f32 %v2616_v29, %v6091_v21  ;;  %v3099_v38 = vpop.f32.mrb[51].mxu1  ;;  %v4728_v41 = vadd.f32 %v3097_v40, %v6097_v7 }
 0x315   : > { %v3384_v39 = vadd.f32 %v3383_v24, %v3249_v59  ;;  %v3256_v11 = vmul.f32 %v4696_v26, %v6094_v61  ;;  %v3377_v45 = vadd.f32 %v3376_v32, %v3243_v58  ;;  %v4729_v42 = vadd.f32 %v3099_v38, %v6104_v27 }
 0x316   : > { %v3257_v16 = vmul.f32 %v4697_v37, %v6100_v23  ;;  %v2620_v12 = vpop.f32.mrb[52].mxu0  ;;  %v3258_v2 = vmul.f32 %v4728_v41, %v6110_v35 }
 0x317   : > { %v3392_v46 = vadd.f32 %v6029_v34, %v3256_v11  ;;  %v4698_v47 = vadd.f32 %v2620_v12, %v6087_v57  ;;  %v3103_v53 = vpop.f32.mrb[52].mxu1  ;;  %v2622_v56 = vpop.f32.mrb[53].mxu0  ;;  %3378 = vadd.xlane.f32.xlu1 %v3377_v45  ;;  %v3385_v60 = vadd.f32 %v3384_v39, %v3250_v33  ;;  %v3259_v4 = vmul.f32 %v4729_v42, %v6117_v44 }
 0x318   : > { %v4730_v63 = vadd.f32 %v3103_v53, %v6097_v7  ;;  %v4699_v30 = vadd.f32 %v2622_v56, %v6091_v21  ;;  %v3105_v0 = vpop.f32.mrb[53].mxu1 }
 0x319   : > { %v3393_v3 = vadd.f32 %v3392_v46, %v3257_v16  ;;  %v3264_v48 = vmul.f32 %v4698_v47, %v6094_v61  ;;  %v3386_v28 = vadd.f32 %v3385_v60, %v3251_v43  ;;  %v4731_v6 = vadd.f32 %v3105_v0, %v6104_v27 }
 0x31a   : > { %v3265_v34 = vmul.f32 %v4699_v30, %v6100_v23  ;;  %v2626_v31 = vpop.f32.mrb[54].mxu0  ;;  %v3266_v14 = vmul.f32 %v4730_v63, %v6110_v35 }
 0x31b   : > { %v3401_v5 = vadd.f32 %v6039_v62, %v3264_v48  ;;  %v4700_v8 = vadd.f32 %v2626_v31, %v6087_v57  ;;  %v3109_v9 = vpop.f32.mrb[54].mxu1  ;;  %v2628_v10 = vpop.f32.mrb[55].mxu0  ;;  %3387 = vadd.xlane.f32.xlu0 %v3386_v28  ;;  %v3394_v13 = vadd.f32 %v3393_v3, %v3258_v2  ;;  %v3267_v58 = vmul.f32 %v4731_v6, %v6117_v44 }
 0x31c   : > { %v4701_v15 = vadd.f32 %v2628_v10, %v6091_v21  ;;  %v3111_v18 = vpop.f32.mrb[55].mxu1  ;;  %v4732_v54 = vadd.f32 %v3109_v9, %v6097_v7 }
 0x31d   : > { %v3402_v52 = vadd.f32 %v3401_v5, %v3265_v34  ;;  %v3272_v50 = vmul.f32 %v4700_v8, %v6094_v61  ;;  %v3395_v55 = vadd.f32 %v3394_v13, %v3259_v4  ;;  %v4733_v20 = vadd.f32 %v3111_v18, %v6104_v27 }
 0x31e   : > { %v3273_v62 = vmul.f32 %v4701_v15, %v6100_v23  ;;  %v2632_v49 = vpop.f32.mrb[56].mxu0  ;;  %v3274_v33 = vmul.f32 %v4732_v54, %v6110_v35 }
 0x31f   : > { %v3410_v59 = vadd.f32 %v6049_v17, %v3272_v50  ;;  %v4702_v22 = vadd.f32 %v2632_v49, %v6087_v57  ;;  %v3115_v24 = vpop.f32.mrb[56].mxu1  ;;  %v2634_v25 = vpop.f32.mrb[57].mxu0  ;;  %3396 = vadd.xlane.f32.xlu1 %v3395_v55  ;;  %v3403_v26 = vadd.f32 %v3402_v52, %v3266_v14  ;;  %v3275_v11 = vmul.f32 %v4733_v20, %v6117_v44 }
 0x320   : > { %v4734_v40 = vadd.f32 %v3115_v24, %v6097_v7  ;;  %v4703_v29 = vadd.f32 %v2634_v25, %v6091_v21  ;;  %v3117_v32 = vpop.f32.mrb[57].mxu1 }
 0x321   : > { %v3411_v37 = vadd.f32 %v3410_v59, %v3273_v62  ;;  %v3280_v38 = vmul.f32 %v4702_v22, %v6094_v61  ;;  %v3404_v39 = vadd.f32 %v3403_v26, %v3267_v58  ;;  %v4735_v16 = vadd.f32 %v3117_v32, %v6104_v27 }
 0x322   : > { %v3281_v17 = vmul.f32 %v4703_v29, %v6100_v23  ;;  %v2638_v41 = vpop.f32.mrb[58].mxu0  ;;  %v3282_v47 = vmul.f32 %v4734_v40, %v6110_v35 }
 0x323   : > { %v3419_v45 = vadd.f32 %v6059_v36, %v3280_v38  ;;  %v4704_v42 = vadd.f32 %v2638_v41, %v6087_v57  ;;  %v3121_v12 = vpop.f32.mrb[58].mxu1  ;;  %v2640_v43 = vpop.f32.mrb[59].mxu0  ;;  %3405 = vadd.xlane.f32.xlu0 %v3404_v39  ;;  %v3412_v46 = vadd.f32 %v3411_v37, %v3274_v33  ;;  %v3283_v48 = vmul.f32 %v4735_v16, %v6117_v44 }
 0x324   : > { %v4705_v53 = vadd.f32 %v2640_v43, %v6091_v21  ;;  %v3123_v56 = vpop.f32.mrb[59].mxu1  ;;  %v4736_v30 = vadd.f32 %v3121_v12, %v6097_v7 }
 0x325   : > { %v3420_v60 = vadd.f32 %v3419_v45, %v3281_v17  ;;  %v3288_v63 = vmul.f32 %v4704_v42, %v6094_v61  ;;  %v3413_v0 = vadd.f32 %v3412_v46, %v3275_v11  ;;  %v4737_v2 = vadd.f32 %v3123_v56, %v6104_v27 }
 0x326   : > { %v3289_v36 = vmul.f32 %v4705_v53, %v6100_v23  ;;  %v2644_v3 = vpop.f32.mrb[60].mxu0  ;;  %v3290_v10 = vmul.f32 %v4736_v30, %v6110_v35 }
 0x327   : > { %v3428_v28 = vadd.f32 %v6069_v1, %v3288_v63  ;;  %v4706_v4 = vadd.f32 %v2644_v3, %v6087_v57  ;;  %v3127_v34 = vpop.f32.mrb[60].mxu1  ;;  %v2646_v31 = vpop.f32.mrb[61].mxu0  ;;  %3414 = vadd.xlane.f32.xlu1 %v3413_v0  ;;  %v3421_v5 = vadd.f32 %v3420_v60, %v3282_v47  ;;  %v3291_v18 = vmul.f32 %v4737_v2, %v6117_v44 }
 0x328   : > { %v4738_v6 = vadd.f32 %v3127_v34, %v6097_v7  ;;  %v4707_v8 = vadd.f32 %v2646_v31, %v6091_v21  ;;  %v3129_v9 = vpop.f32.mrb[61].mxu1 }
 0x329   : > { %v3429_v13 = vadd.f32 %v3428_v28, %v3289_v36  ;;  %v3296_v14 = vmul.f32 %v4706_v4, %v6094_v61  ;;  %v3422_v15 = vadd.f32 %v3421_v5, %v3283_v48  ;;  %v4739_v54 = vadd.f32 %v3129_v9, %v6104_v27 }
 0x32a   : > { %v3297_v1 = vmul.f32 %v4707_v8, %v6100_v23  ;;  %v2650_v52 = vpop.f32.mrb[62].mxu0  ;;  %v3298_v58 = vmul.f32 %v4738_v6, %v6110_v35 }
 0x32b   : > { %v3437_v50 = vadd.f32 %v6077_v51, %v3296_v14  ;;  %v4708_v55 = vadd.f32 %v2650_v52, %v6087_v57  ;;  %v3133_v62 = vpop.f32.mrb[62].mxu1  ;;  %v2652_v20 = vpop.f32.mrb[63].mxu0  ;;  %3423 = vadd.xlane.f32.xlu0 %v3422_v15  ;;  %v3430_v49 = vadd.f32 %v3429_v13, %v3290_v10  ;;  %v3299_v57 = vmul.f32 %v4739_v54, %v6117_v44 }
 0x32c   : > { %v4709_v59 = vadd.f32 %v2652_v20, %v6091_v21  ;;  %v3135_v22 = vpop.f32.mrb[63].mxu1  ;;  %v4740_v26 = vadd.f32 %v3133_v62, %v6097_v7 }
 0x32d   : > { %v3438_v24 = vadd.f32 %v3437_v50, %v3297_v1  ;;  %v3304_v25 = vmul.f32 %v4708_v55, %v6094_v61  ;;  %v3431_v51 = vadd.f32 %v3430_v49, %v3291_v18  ;;  %v4741_v32 = vadd.f32 %v3135_v22, %v6104_v27 }
 0x32e   : > { %v3305_v40 = vmul.f32 %v4709_v59, %v6100_v23  ;;  %v3306_v21 = vmul.f32 %v4740_v26, %v6110_v35  ;;  %v3825_v23 = vld [vmem:[#allocation2] ss:$0 sm:$0xff] }
 0x32f   : > { %v3446_v29 = vadd.f32 %v6081_v19, %v3304_v25  ;;  %3432 = vadd.xlane.f32.xlu1 %v3431_v51  ;;  %v3439_v33 = vadd.f32 %v3438_v24, %v3298_v58  ;;  %v3307_v61 = vmul.f32 %v4741_v32, %v6117_v44 }
 0x331   : > { %v3447_v37 = vadd.f32 %v3446_v29, %v3305_v40  ;;  %v3440_v38 = vadd.f32 %v3439_v33, %v3299_v57 }
 0x333   : > { %3441 = vadd.xlane.f32.xlu0 %v3440_v38  ;;  %v3448_v7 = vadd.f32 %v3447_v37, %v3306_v21 }
 0x335   : > { %v3449_v39 = vadd.f32 %v3448_v7, %v3307_v61 }
 0x337   : > { %3450 = vadd.xlane.f32.xlu1 %v3449_v39 }
 0x388   : > { %v3316_v11 = vpop.xlane.xlu0 %3315 }
 0x389   : > { %v3459_v17 = vadd.f32 %v3825_v23, %v3316_v11 }
 0x38b   : > { %3476 = vst.msk [vmem:[%s6256_s6] sm:$0xff] %vm3475_vm0, %v3459_v17 }
 0x38c   : > { %v3325_v19 = vpop.xlane.xlu0 %3324 }
 0x38d   : > { %v3460_v27 = vadd.f32 %v3825_v23, %v3325_v19 }
 0x38f   : > { %3477 = vst.msk [vmem:[%s6256_s6 + $0x8] sm:$0xff] %vm3475_vm0, %v3460_v27 }
 0x390   : > { %v3334_v35 = vpop.xlane.xlu1 %3333 }
 0x391   : > { %v3461_v44 = vadd.f32 %v3825_v23, %v3334_v35 }
 0x393   : > { %3478 = vst.msk [vmem:[%s6256_s6 + $0x10] sm:$0xff] %vm3475_vm0, %v3461_v44 }
 0x394   : > { %v3343_v41 = vpop.xlane.xlu1 %3342 }
 0x395   : > { %v3462_v45 = vadd.f32 %v3825_v23, %v3343_v41 }
 0x397   : > { %3479 = vst.msk [vmem:[%s6256_s6 + $0x18] sm:$0xff] %vm3475_vm0, %v3462_v45 }
 0x398   : > { %v3352_v16 = vpop.xlane.xlu0 %3351 }
 0x399   : > { %v3463_v42 = vadd.f32 %v3825_v23, %v3352_v16 }
 0x39b   : > { %3480 = vst.msk [vmem:[%s6256_s6 + $0x20] sm:$0xff] %vm3475_vm0, %v3463_v42 }
 0x39c   : > { %v3361_v12 = vpop.xlane.xlu1 %3360 }
 0x39d   : > { %v3464_v43 = vadd.f32 %v3825_v23, %v3361_v12 }
 0x39f   : > { %3481 = vst.msk [vmem:[%s6256_s6 + $0x28] sm:$0xff] %vm3475_vm0, %v3464_v43 }
 0x3a0   : > { %v3370_v46 = vpop.xlane.xlu0 %3369 }
 0x3a1   : > { %v3465_v47 = vadd.f32 %v3825_v23, %v3370_v46 }
 0x3a3   : > { %3482 = vst.msk [vmem:[%s6256_s6 + $0x30] sm:$0xff] %vm3475_vm0, %v3465_v47 }
 0x3a4   : > { %v3379_v53 = vpop.xlane.xlu1 %3378 }
 0x3a5   : > { %v3466_v56 = vadd.f32 %v3825_v23, %v3379_v53 }
 0x3a7   : > { %3483 = vst.msk [vmem:[%s6256_s6 + $0x38] sm:$0xff] %vm3475_vm0, %v3466_v56 }
 0x3a8   : > { %v3388_v60 = vpop.xlane.xlu0 %3387 }
 0x3a9   : > { %v3467_v63 = vadd.f32 %v3825_v23, %v3388_v60 }
 0x3ab   : > { %3484 = vst.msk [vmem:[%s6256_s6 + $0x40] sm:$0xff] %vm3475_vm0, %v3467_v63 }
 0x3ac   : > { %v3397_v30 = vpop.xlane.xlu1 %3396 }
 0x3ad   : > { %v3468_v0 = vadd.f32 %v3825_v23, %v3397_v30 }
 0x3af   : > { %3485 = vst.msk [vmem:[%s6256_s6 + $0x48] sm:$0xff] %vm3475_vm0, %v3468_v0 }
 0x3b0   : > { %v3406_v36 = vpop.xlane.xlu0 %3405 }
 0x3b1   : > { %v3469_v2 = vadd.f32 %v3825_v23, %v3406_v36 }
 0x3b3   : > { %3486 = vst.msk [vmem:[%s6256_s6 + $0x50] sm:$0xff] %vm3475_vm0, %v3469_v2 }
 0x3b4   : > { %v3415_v3 = vpop.xlane.xlu1 %3414 }
 0x3b5   : > { %v3470_v48 = vadd.f32 %v3825_v23, %v3415_v3 }
 0x3b7   : > { %3487 = vst.msk [vmem:[%s6256_s6 + $0x58] sm:$0xff] %vm3475_vm0, %v3470_v48 }
 0x3b8   : > { %v3424_v28 = vpop.xlane.xlu0 %3423 }
 0x3b9   : > { %v3471_v4 = vadd.f32 %v3825_v23, %v3424_v28 }
 0x3bb   : > { %3488 = vst.msk [vmem:[%s6256_s6 + $0x60] sm:$0xff] %vm3475_vm0, %v3471_v4 }
 0x3bc   : > { %v3433_v34 = vpop.xlane.xlu1 %3432 }
 0x3bd   : > { %v3472_v31 = vadd.f32 %v3825_v23, %v3433_v34 }
 0x3bf   : > { %3489 = vst.msk [vmem:[%s6256_s6 + $0x68] sm:$0xff] %vm3475_vm0, %v3472_v31 }
 0x3c0   : > { %v3442_v5 = vpop.xlane.xlu0 %3441 }
 0x3c1   : > { %v3473_v6 = vadd.f32 %v3825_v23, %v3442_v5  ;;  %3498 = sbr.rel (!%p6415_p8) target bundleno = 1017 (0x3f9), region = 60 }
 0x3c3   : > { %3490 = vst.msk [vmem:[%s6256_s6 + $0x70] sm:$0xff] %vm3475_vm0, %v3473_v6 }
 0x3c4   : > { %v3451_v8 = vpop.xlane.xlu1 %3450 }
 0x3c5   : > { %v3474_v9 = vadd.f32 %v3825_v23, %v3451_v8 }
 0x3c7   : > { %3491 = vst.msk [vmem:[%s6256_s6 + $0x78] sm:$0xff] %vm3475_vm0, %v3474_v9 }
 0x3c8   : > { %s6426_s15 = smov (!%p3501_p5, %s3500_s15), 16 }
 0x3c9   : > { %s3828_s26 = sshll.u32 %s6426_s15, 7 }
 0x3ca   : > { %p3831_p10 = scmp.eq.s32.totalorder %s3828_s26, 0 }
 0x3cb   : > { %s6303_s30 = sshrl.u32 (!%p3831_p10), %s6426_s15, 4 }
 0x3cc   : > { %3509 = sbr.rel (%p3831_p10) target bundleno = 1017 (0x3f9), region = 64  ;;  %p3832_p3 = scmp.le.s32.totalorder (!%p3831_p10), %s6303_s30, 0 }
 0x3d3   : > { %3733 = sbr.rel (%p3832_p3) target bundleno = 996 (0x3e4), region = 146  ;;  %s6416_s4 = smov (!%p3832_p3), %s6297_s23 }
 0x3d4   : > { %s6417_s19 = smov (!%p3832_p3), %s6256_s6  ;;  %s6312_s8 = smov (!%p3832_p3), 0  }
 0x3d5   : > { %s6314_s7 = smov (!%p3832_p3), 0  }
 0x3da LB: >> { %v3601_v10 = vld [vmem:[%s5423_s19] sm:$0xff]  ;;  %v3603_v13 = vld [vmem:[%s5423_s19 + $0x8] sm:$0xff]  ;;  %v3605_v14 = vld [vmem:[%s5423_s19 + $0x10] sm:$0xff]  ;;  %s3633_s10 = sadd.s32 1, %s5427_s8  ;;  %s3595_s7 = sadd.s32 1, %s5431_s7   ;;  %s5431_s7 = sphi %s6314_s7, %s3595_s7   ;;  %s5427_s8 = sphi %s6312_s8, %s6418_s8   ;;  %s5423_s19 = sphi %s6417_s19, %s3638_s19   ;;  %s5419_s4 = sphi %s6416_s4, %s3639_s4  }
 0x3db   : >> { %3602 = vst [vmem:[%s5419_s4] sm:$0xff] %v3601_v10  ;;  %3604 = vst [vmem:[%s5419_s4 + $0x8] sm:$0xff] %v3603_v13  ;;  %v3607_v15 = vld [vmem:[%s5423_s19 + $0x18] sm:$0xff]  ;;  %v3609_v18 = vld [vmem:[%s5423_s19 + $0x20] sm:$0xff]  ;;  %p3634_p11 = scmp.ge.s32.totalorder %s3633_s10, %s6303_s30  ;;  %p3594_p13 = scmp.ge.s32.totalorder %s3595_s7, %s6303_s30 }
 0x3dc   : >> { %3606 = vst [vmem:[%s5419_s4 + $0x10] sm:$0xff] %v3605_v14  ;;  %v3611_v1 = vld [vmem:[%s5423_s19 + $0x28] sm:$0xff]  ;;  %3608 = vst [vmem:[%s5419_s4 + $0x18] sm:$0xff] %v3607_v15  ;;  %v3613_v52 = vld [vmem:[%s5423_s19 + $0x30] sm:$0xff] }
 0x3dd   : >> { %3610 = vst [vmem:[%s5419_s4 + $0x20] sm:$0xff] %v3609_v18  ;;  %3612 = vst [vmem:[%s5419_s4 + $0x28] sm:$0xff] %v3611_v1  ;;  %v3615_v50 = vld [vmem:[%s5423_s19 + $0x38] sm:$0xff]  ;;  %v3617_v54 = vld [vmem:[%s5423_s19 + $0x40] sm:$0xff]  ;;  %s6428_s10 = smov (%p3634_p11, %s3633_s10), 0  ;;  %3597 = sbr.rel (!%p3594_p13) target bundleno = 986 (0x3da), region = 152 }
 0x3de   : >> { %3614 = vst [vmem:[%s5419_s4 + $0x30] sm:$0xff] %v3613_v52  ;;  %3616 = vst [vmem:[%s5419_s4 + $0x38] sm:$0xff] %v3615_v50  ;;  %v3619_v55 = vld [vmem:[%s5423_s19 + $0x48] sm:$0xff]  ;;  %v3621_v62 = vld [vmem:[%s5423_s19 + $0x50] sm:$0xff]  ;;  %s3833_s9 = sshll.u32 %s6428_s10, 7  ;;  %s6418_s8 = smov %s6428_s10 }
 0x3df   : >> { %3618 = vst [vmem:[%s5419_s4 + $0x40] sm:$0xff] %v3617_v54  ;;  %v3623_v20 = vld [vmem:[%s5423_s19 + $0x58] sm:$0xff]  ;;  %3620 = vst [vmem:[%s5419_s4 + $0x48] sm:$0xff] %v3619_v55  ;;  %v3625_v49 = vld [vmem:[%s5423_s19 + $0x60] sm:$0xff] }
 0x3e0   : >> { %3622 = vst [vmem:[%s5419_s4 + $0x50] sm:$0xff] %v3621_v62  ;;  %3624 = vst [vmem:[%s5419_s4 + $0x58] sm:$0xff] %v3623_v20  ;;  %v3627_v58 = vld [vmem:[%s5423_s19 + $0x68] sm:$0xff]  ;;  %v3629_v59 = vld [vmem:[%s5423_s19 + $0x70] sm:$0xff] }
 0x3e1   : >> { %3626 = vst [vmem:[%s5419_s4 + $0x60] sm:$0xff] %v3625_v49  ;;  %3628 = vst [vmem:[%s5419_s4 + $0x68] sm:$0xff] %v3627_v58  ;;  %v3631_v22 = vld [vmem:[%s5423_s19 + $0x78] sm:$0xff]  ;;  %s3638_s19 = scalar_lea.vmem %s6256_s6, %s3833_s9 [#allocation10]  }
 0x3e2   : >> { %3630 = vst [vmem:[%s5419_s4 + $0x70] sm:$0xff] %v3629_v59  ;;  %3632 = vst [vmem:[%s5419_s4 + $0x78] sm:$0xff] %v3631_v22  ;;  %s3639_s4 = scalar_lea.vmem %s6297_s23, %s3833_s9  }
 0x3e4 PF: > { %s6372_s13 = sand.u32 15, %s6426_s15   ;;  %s3844_s28 = sshll.u32 %s6303_s30, 7 }
 0x3e5   : > { %s3644_s16 = scalar_lea.vmem %s6256_s6, %s3844_s28 [#allocation10]   ;;  %s3646_s17 = scalar_lea.vmem %s6297_s23, %s3844_s28  }
 0x3e6   : > { %p3838_p1 = scmp.le.s32.totalorder %s6372_s13, 0 }
 0x3e7   : > { %s5433_s20 = smov (!%p3838_p1), %s3646_s17   ;;  %s5437_s25 = smov (!%p3838_p1), %s3644_s16  }
 0x3e8   : > { %3747 = sbr.rel (%p3838_p1) target bundleno = 1017 (0x3f9), region = 157  ;;  %s5441_s29 = smov (!%p3838_p1), 0  }
 0x3e9   : > { %s5445_s12 = smov (!%p3838_p1), 0  }
 0x3ef LB: >> { %v3656_v24 = vld [vmem:[%s5439_s25] sm:$0xff]  ;;  %s3658_s14 = sadd.s32 1, %s5443_s29  ;;  %s3650_s12 = sadd.s32 1, %s5447_s12   ;;  %s5447_s12 = sphi %s5445_s12, %s3650_s12   ;;  %s5443_s29 = sphi %s5441_s29, %s5442_s29   ;;  %s5439_s25 = sphi %s5437_s25, %s3663_s25   ;;  %s5435_s20 = sphi %s5433_s20, %s3664_s20  }
 0x3f0   : >> { %3657 = vst [vmem:[%s5435_s20] sm:$0xff] %v3656_v24  ;;  %p3659_p7 = scmp.ge.s32.totalorder %s3658_s14, %s6372_s13  ;;  %p3649_p6 = scmp.ge.s32.totalorder %s3650_s12, %s6372_s13 }
 0x3f2   : >> { %s6430_s14 = smov (%p3659_p7, %s3658_s14), 0  ;;  %3652 = sbr.rel (!%p3649_p6) target bundleno = 1007 (0x3ef), region = 163 }
 0x3f3   : >> { %s3839_s6 = sshll.u32 %s6430_s14, 3  ;;  %s5442_s29 = smov %s6430_s14  }
 0x3f4   : >> { %s3663_s25 = scalar_lea.vmem %s3644_s16, %s3839_s6 [#allocation10]   ;;  %s3664_s20 = scalar_lea.vmem %s3646_s17, %s3839_s6  }
 0x3f9 PF: > { %p19_p9 = scmp.ge.s32.totalorder %s5512_s24, 4   ;;  %s6419_s20 = smov %s5407_s21 }
 0x3fa   : > { %s6420_s21 = smov %s5411_s22  ;;  %s6421_s22 = smov %s5522_s27 }
 0x3fb   : > { %s6422_s23 = smov %s5512_s24  ;;  %21 = sbr.rel (!%p19_p9) target bundleno = 8 (0x8), region = 174 }
 0x402   :  { %3680 = vsyncpa [#allocation4], 1 }
 0x403   :  { %3682 = vsyncpa [#allocation4 + $0x1], 1 }
 0x404   :  { %3683 = vsyncpa [#allocation6], 1 }
 0x405   :  { %3684 = vsyncpa [#allocation9], 1 }

</bundles_post_ra>
